<compile_context>
chip_gen: v5e
topology: v5e:2x2
jax: 0.10.0
libtpu: 0.0.40
codegen_flags: <defaults>
</compile_context>

<pallas_src>
import numpy as np

import jax
import jax.numpy as jnp
from jax import lax
from jax.experimental import pallas as pl
from jax.experimental.pallas import tpu as pltpu


# ---------------------------------------------------------------------------
# Constant-matrix builders (run once per weight set, OUTSIDE the kernel).
# Internal activation layout:  A2d[b*H + y, x*C + c] == act[b, c, y, x]
# ---------------------------------------------------------------------------
def _conv_row_sel(B, Hin, Hout, kh, stride, pad):
    """P[i, b*Hout+y, b*Hin+yin] = 1  where  yin = stride*y + i - pad."""
    P = np.zeros((kh, B * Hout, B * Hin), np.float32)
    for i in range(kh):
        for b in range(B):
            for y in range(Hout):
                yin = stride * y + i - pad
                if 0 <= yin < Hin:
                    P[i, b * Hout + y, b * Hin + yin] = 1.0
    return jnp.asarray(P)


def _convT_row_sel(B, Hin, Hout, kh, stride):
    """P[i, b*Hout+y, b*Hin+yin] = 1  where  y = stride*yin + i."""
    P = np.zeros((kh, B * Hout, B * Hin), np.float32)
    for i in range(kh):
        for b in range(B):
            for yin in range(Hin):
                y = stride * yin + i
                if 0 <= y < Hout:
                    P[i, b * Hout + y, b * Hin + yin] = 1.0
    return jnp.asarray(P)


def _conv_col_mix(w, Win, Wout, stride, pad):
    """G[i, xin*Cin+ci, x*Cout+co] = sum_j [xin == stride*x+j-pad] * w[co,ci,i,j].

    w: PyTorch Conv2d weight (Cout, Cin, kh, kw)."""
    Cout, Cin, kh, kw = w.shape
    S = np.zeros((kw, Win, Wout), np.float32)
    for x in range(Wout):
        for j in range(kw):
            xin = stride * x + j - pad
            if 0 <= xin < Win:
                S[j, xin, x] = 1.0
    G = jnp.einsum("jnx,ocij->incxo", jnp.asarray(S), w)
    return G.reshape(kh, Win * Cin, Wout * Cout)


def _convT_col_mix(w, Win, Wout, stride):
    """Q[i, xin*Cin+ci, x*Cout+co] = sum_j [x == stride*xin+j] * w[ci,co,i,j].

    w: PyTorch ConvTranspose2d weight (Cin, Cout, kh, kw)."""
    Cin, Cout, kh, kw = w.shape
    S = np.zeros((kw, Win, Wout), np.float32)
    for xin in range(Win):
        for j in range(kw):
            x = stride * xin + j
            if 0 <= x < Wout:
                S[j, xin, x] = 1.0
    Q = jnp.einsum("jnx,coij->incxo", jnp.asarray(S), w)
    return Q.reshape(kh, Win * Cin, Wout * Cout)


def _pool_row_sel(B, Hin, Hout, stride):
    """R[dy, b*Hout+y, b*Hin + stride*y+dy] = 1   (2x2 max-pool, row part)."""
    R = np.zeros((2, B * Hout, B * Hin), np.float32)
    for dy in range(2):
        for b in range(B):
            for y in range(Hout):
                R[dy, b * Hout + y, b * Hin + stride * y + dy] = 1.0
    return jnp.asarray(R)


def _pool_col_sel(Win, Wout, C, stride):
    """Cm[dx, (stride*x+dx)*C + c, x*C + c] = 1   (2x2 max-pool, column part)."""
    Cm = np.zeros((2, Win * C, Wout * C), np.float32)
    for dx in range(2):
        for x in range(Wout):
            xin = stride * x + dx
            for c in range(C):
                Cm[dx, xin * C + c, x * C + c] = 1.0
    return jnp.asarray(Cm)


def _bias_row(b, Wout):
    """Bias laid out over the (x, c) column axis: shape (1, Wout*Cout)."""
    return jnp.tile(b, Wout)[None, :]


# ---------------------------------------------------------------------------
# The single fused Pallas kernel (whole forward pass).
# ---------------------------------------------------------------------------
def _fused_forward_kernel(
    x_ref,
    e1p_ref, e1g_ref, e1b_ref,
    p1r_ref, p1c_ref,
    e2p_ref, e2g_ref, e2b_ref,
    p2r_ref, p2c_ref,
    d1p_ref, d1g_ref, d1b_ref,
    d2p_ref, d2g_ref, d2b_ref,
    d3p_ref, d3g_ref, d3b_ref,
    o_ref,
):
    f32 = jnp.float32

    def conv_like(a, p_ref, g_ref, b_ref, act):
        # Conv2d / ConvTranspose2d:  out = sum_i (P_i @ a) @ G_i + bias
        kh = p_ref.shape[0]
        acc = None
        for i in range(kh):                                   # unrolled (kh in {3,4})
            rows = jnp.dot(p_ref[i], a, preferred_element_type=f32)
            term = jnp.dot(rows, g_ref[i], preferred_element_type=f32)
            acc = term if acc is None else acc + term
        acc = acc + b_ref[...]
        if act == "relu":
            return jnp.maximum(acc, 0.0)
        return jnp.tanh(acc)                                  # act == "tanh"

    def maxpool(a, r_ref, c_ref):
        # 2x2 max pool fused in-kernel: row-select -> max -> col-select -> max
        rmax = jnp.maximum(jnp.dot(r_ref[0], a, preferred_element_type=f32),
                           jnp.dot(r_ref[1], a, preferred_element_type=f32))
        return jnp.maximum(jnp.dot(rmax, c_ref[0], preferred_element_type=f32),
                           jnp.dot(rmax, c_ref[1], preferred_element_type=f32))

    a = x_ref[...]                                            # (B*32, 32*1)
    a = conv_like(a, e1p_ref, e1g_ref, e1b_ref, "relu")       # (B*16, 16*16)
    a = maxpool(a, p1r_ref, p1c_ref)                          # (B*8,   8*16)
    a = conv_like(a, e2p_ref, e2g_ref, e2b_ref, "relu")       # (B*4,   4*32)
    a = maxpool(a, p2r_ref, p2c_ref)                          # (B*3,   3*32)
    a = conv_like(a, d1p_ref, d1g_ref, d1b_ref, "relu")       # (B*7,   7*16)
    a = conv_like(a, d2p_ref, d2g_ref, d2b_ref, "relu")       # (B*15, 15*8)
    a = conv_like(a, d3p_ref, d3g_ref, d3b_ref, "tanh")       # (B*32, 32*1)
    o_ref[...] = a.astype(o_ref.dtype)


# ---------------------------------------------------------------------------
# Wrapper: weight preprocessing + single pallas_call.
# ---------------------------------------------------------------------------
def prepare_fused_operands(params, B):
    """Build the constant selection / weight-mixing matrices (~1 MiB total)."""
    ops = []
    # encoder: Conv(1->16,k3,s2,p1)+ReLU, MaxPool(2,2), Conv(16->32,k3,s2,p1)+ReLU, MaxPool(2,1)
    ops += [_conv_row_sel(B, 32, 16, 3, 2, 1),
            _conv_col_mix(params["enc1_w"], 32, 16, 2, 1),
            _bias_row(params["enc1_b"], 16)]
    ops += [_pool_row_sel(B, 16, 8, 2), _pool_col_sel(16, 8, 16, 2)]
    ops += [_conv_row_sel(B, 8, 4, 3, 2, 1),
            _conv_col_mix(params["enc2_w"], 8, 4, 2, 1),
            _bias_row(params["enc2_b"], 4)]
    ops += [_pool_row_sel(B, 4, 3, 1), _pool_col_sel(4, 3, 32, 1)]
    # decoder: ConvT(32->16,k3,s2)+ReLU, ConvT(16->8,k3,s2)+ReLU, ConvT(8->1,k4,s2)+Tanh
    ops += [_convT_row_sel(B, 3, 7, 3, 2),
            _convT_col_mix(params["dec1_w"], 3, 7, 2),
            _bias_row(params["dec1_b"], 7)]
    ops += [_convT_row_sel(B, 7, 15, 3, 2),
            _convT_col_mix(params["dec2_w"], 7, 15, 2),
            _bias_row(params["dec2_b"], 15)]
    ops += [_convT_row_sel(B, 15, 32, 4, 2),
            _convT_col_mix(params["dec3_w"], 15, 32, 2),
            _bias_row(params["dec3_b"], 32)]
    return ops


def fused_forward(operands, x):
    """x: (B,1,32,32) NCHW -> (B,1,32,32).  Exactly one pallas_call."""
    B = x.shape[0]
    # NCHW -> internal (B*H, W*C) layout (boundary-only relayout).
    x2d = jnp.transpose(x, (0, 2, 3, 1)).reshape(B * 32, 32)
    args = [x2d] + list(operands)

    def _full_block(a):
        return pl.BlockSpec(a.shape, lambda i, nd=a.ndim: (0,) * nd)

    out2d = pl.pallas_call(
        _fused_forward_kernel,
        out_shape=jax.ShapeDtypeStruct((B * 32, 32), jnp.float32),
        grid=(1,),
        in_specs=[_full_block(a) for a in args],
        out_specs=pl.BlockSpec((B * 32, 32), lambda i: (0, 0)),
        compiler_params=pltpu.CompilerParams(
            dimension_semantics=("arbitrary",)),
    )(*args)
    return jnp.transpose(out2d.reshape(B, 32, 32, 1), (0, 3, 1, 2))


def conv_autoencoder_forward(params, x):
    return fused_forward(prepare_fused_operands(params, x.shape[0]), x)


# ---------------------------------------------------------------------------
# Pure-JAX reference (lax convs) used to tolerance-check the kernel.
# ---------------------------------------------------------------------------
def reference_forward(params, x):
    dn = ("NCHW", "OIHW", "NCHW")
    hi = lax.Precision.HIGHEST

    def conv(y, w, b, s, p):
        y = lax.conv_general_dilated(y, w, (s, s), ((p, p), (p, p)),
                                     dimension_numbers=dn, precision=hi)
        return y + b[None, :, None, None]

    def convT(y, w, b, s):
        kh, kw = w.shape[2], w.shape[3]
        wf = jnp.flip(w, (2, 3)).transpose(1, 0, 2, 3)        # (Cout,Cin,kh,kw)
        y = lax.conv_general_dilated(y, wf, (1, 1),
                                     ((kh - 1, kh - 1), (kw - 1, kw - 1)),
                                     lhs_dilation=(s, s),
                                     dimension_numbers=dn, precision=hi)
        return y + b[None, :, None, None]

    def pool(y, s):
        return lax.reduce_window(y, -jnp.inf, lax.max,
                                 (1, 1, 2, 2), (1, 1, s, s), "VALID")

    y = pool(jnp.maximum(conv(x, params["enc1_w"], params["enc1_b"], 2, 1), 0.0), 2)
    y = pool(jnp.maximum(conv(y, params["enc2_w"], params["enc2_b"], 2, 1), 0.0), 1)
    y = jnp.maximum(convT(y, params["dec1_w"], params["dec1_b"], 2), 0.0)
    y = jnp.maximum(convT(y, params["dec2_w"], params["dec2_b"], 2), 0.0)
    return jnp.tanh(convT(y, params["dec3_w"], params["dec3_b"], 2))


# ---------------------------------------------------------------------------
# Parameter init (PyTorch default-style uniform) + main.
# ---------------------------------------------------------------------------
def init_params(key):
    def uinit(k, shape, fan_in):
        bound = 1.0 / jnp.sqrt(jnp.float32(fan_in))
        return jax.random.uniform(k, shape, jnp.float32, -bound, bound)

    ks = jax.random.split(key, 10)
    p = {}
    # encoder (Conv2d weights are (Cout, Cin, kh, kw))
    p["enc1_w"] = uinit(ks[0], (16, 1, 3, 3), 1 * 3 * 3)
    p["enc1_b"] = uinit(ks[1], (16,), 1 * 3 * 3)
    p["enc2_w"] = uinit(ks[2], (32, 16, 3, 3), 16 * 3 * 3)
    p["enc2_b"] = uinit(ks[3], (32,), 16 * 3 * 3)
    # decoder (ConvTranspose2d weights are (Cin, Cout, kh, kw))
    p["dec1_w"] = uinit(ks[4], (32, 16, 3, 3), 32 * 3 * 3)
    p["dec1_b"] = uinit(ks[5], (16,), 32 * 3 * 3)
    p["dec2_w"] = uinit(ks[6], (16, 8, 3, 3), 16 * 3 * 3)
    p["dec2_b"] = uinit(ks[7], (8,), 16 * 3 * 3)
    p["dec3_w"] = uinit(ks[8], (8, 1, 4, 4), 8 * 4 * 4)
    p["dec3_b"] = uinit(ks[9], (1,), 8 * 4 * 4)
    return p


if __name__ == "__main__":
    key = jax.random.PRNGKey(0)
    k_param, k_data = jax.random.split(key)
    params = init_params(k_param)

    # Input implied by the module: 1 channel, 32x32 (flow 32->16->8->4->3->7->15->32).
    x = jax.random.normal(k_data, (2, 1, 32, 32), dtype=jnp.float32)

    fwd = jax.jit(conv_autoencoder_forward)
    y = jax.block_until_ready(fwd(params, x))

    assert y.shape == (2, 1, 32, 32), y.shape
    assert bool(jnp.all(jnp.isfinite(y)))
    assert bool(jnp.all(jnp.abs(y) <= 1.0 + 1e-6))            # tanh output range

    # Tolerance check against the pure-JAX reference of the PyTorch module.
    y_ref = jax.block_until_ready(jax.jit(reference_forward)(params, x))
    max_err = float(jnp.max(jnp.abs(y - y_ref)))
    assert max_err < 1e-2, f"max abs err vs reference = {max_err}"

    print("KERNEL_OK")
</pallas_src>

<mosaic_0001>
module attributes {stable_mosaic.version = 11 : i64} {
  func.func @_fused_forward_kernel(%arg0: i32, %arg1: memref<64x32xf32, #tpu.memory_space<vmem>>, %arg2: memref<3x32x64xf32, #tpu.memory_space<vmem>>, %arg3: memref<3x32x256xf32, #tpu.memory_space<vmem>>, %arg4: memref<1x256xf32, #tpu.memory_space<vmem>>, %arg5: memref<2x16x32xf32, #tpu.memory_space<vmem>>, %arg6: memref<2x256x128xf32, #tpu.memory_space<vmem>>, %arg7: memref<3x8x16xf32, #tpu.memory_space<vmem>>, %arg8: memref<3x128x128xf32, #tpu.memory_space<vmem>>, %arg9: memref<1x128xf32, #tpu.memory_space<vmem>>, %arg10: memref<2x6x8xf32, #tpu.memory_space<vmem>>, %arg11: memref<2x128x96xf32, #tpu.memory_space<vmem>>, %arg12: memref<3x14x6xf32, #tpu.memory_space<vmem>>, %arg13: memref<3x96x112xf32, #tpu.memory_space<vmem>>, %arg14: memref<1x112xf32, #tpu.memory_space<vmem>>, %arg15: memref<3x30x14xf32, #tpu.memory_space<vmem>>, %arg16: memref<3x112x120xf32, #tpu.memory_space<vmem>>, %arg17: memref<1x120xf32, #tpu.memory_space<vmem>>, %arg18: memref<4x64x30xf32, #tpu.memory_space<vmem>>, %arg19: memref<4x120x32xf32, #tpu.memory_space<vmem>>, %arg20: memref<1x32xf32, #tpu.memory_space<vmem>>, %arg21: memref<64x32xf32, #tpu.memory_space<vmem>>) attributes {dimension_semantics = [#tpu.dimension_semantics<arbitrary>], iteration_bounds = array<i64: 1>, scalar_prefetch = 0 : i64, scratch_operands = 0 : i64, tpu.core_type = #tpu.core_type<tc>, window_params = [{pipeline_mode = #tpu.pipeline_mode<synchronous>, transform_indices = @transform_0, window_bounds = array<i64: 64, 32>}, {pipeline_mode = #tpu.pipeline_mode<synchronous>, transform_indices = @transform_1, window_bounds = array<i64: 3, 32, 64>}, {pipeline_mode = #tpu.pipeline_mode<synchronous>, transform_indices = @transform_2, window_bounds = array<i64: 3, 32, 256>}, {pipeline_mode = #tpu.pipeline_mode<synchronous>, transform_indices = @transform_3, window_bounds = array<i64: 1, 256>}, {pipeline_mode = #tpu.pipeline_mode<synchronous>, transform_indices = @transform_4, window_bounds = array<i64: 2, 16, 32>}, {pipeline_mode = #tpu.pipeline_mode<synchronous>, transform_indices = @transform_5, window_bounds = array<i64: 2, 256, 128>}, {pipeline_mode = #tpu.pipeline_mode<synchronous>, transform_indices = @transform_6, window_bounds = array<i64: 3, 8, 16>}, {pipeline_mode = #tpu.pipeline_mode<synchronous>, transform_indices = @transform_7, window_bounds = array<i64: 3, 128, 128>}, {pipeline_mode = #tpu.pipeline_mode<synchronous>, transform_indices = @transform_8, window_bounds = array<i64: 1, 128>}, {pipeline_mode = #tpu.pipeline_mode<synchronous>, transform_indices = @transform_9, window_bounds = array<i64: 2, 6, 8>}, {pipeline_mode = #tpu.pipeline_mode<synchronous>, transform_indices = @transform_10, window_bounds = array<i64: 2, 128, 96>}, {pipeline_mode = #tpu.pipeline_mode<synchronous>, transform_indices = @transform_11, window_bounds = array<i64: 3, 14, 6>}, {pipeline_mode = #tpu.pipeline_mode<synchronous>, transform_indices = @transform_12, window_bounds = array<i64: 3, 96, 112>}, {pipeline_mode = #tpu.pipeline_mode<synchronous>, transform_indices = @transform_13, window_bounds = array<i64: 1, 112>}, {pipeline_mode = #tpu.pipeline_mode<synchronous>, transform_indices = @transform_14, window_bounds = array<i64: 3, 30, 14>}, {pipeline_mode = #tpu.pipeline_mode<synchronous>, transform_indices = @transform_15, window_bounds = array<i64: 3, 112, 120>}, {pipeline_mode = #tpu.pipeline_mode<synchronous>, transform_indices = @transform_16, window_bounds = array<i64: 1, 120>}, {pipeline_mode = #tpu.pipeline_mode<synchronous>, transform_indices = @transform_17, window_bounds = array<i64: 4, 64, 30>}, {pipeline_mode = #tpu.pipeline_mode<synchronous>, transform_indices = @transform_18, window_bounds = array<i64: 4, 120, 32>}, {pipeline_mode = #tpu.pipeline_mode<synchronous>, transform_indices = @transform_19, window_bounds = array<i64: 1, 32>}, {pipeline_mode = #tpu.pipeline_mode<synchronous>, transform_indices = @transform_20, window_bounds = array<i64: 64, 32>}]} {
    %c0 = arith.constant 0 : index
    %c0_0 = arith.constant 0 : index
    %0 = vector.load %arg1[%c0, %c0_0] : memref<64x32xf32, #tpu.memory_space<vmem>>, vector<64x32xf32>
    %c0_1 = arith.constant 0 : index
    %c0_2 = arith.constant 0 : index
    %c0_3 = arith.constant 0 : index
    %1 = vector.load %arg2[%c0_1, %c0_2, %c0_3] : memref<3x32x64xf32, #tpu.memory_space<vmem>>, vector<1x32x64xf32>
    %2 = vector.shape_cast %1 : vector<1x32x64xf32> to vector<32x64xf32>
    %cst = arith.constant dense<0.000000e+00> : vector<32x32xf32>
    %3 = tpu.matmul %2, %0, %cst {dimension_numbers = #tpu.dot_dimension_numbers<[1], [0], [0], [1], [0, 0, 1, 1], [], []>} : vector<32x64xf32>, vector<64x32xf32>, vector<32x32xf32> -> vector<32x32xf32>
    %c0_4 = arith.constant 0 : index
    %c0_5 = arith.constant 0 : index
    %c0_6 = arith.constant 0 : index
    %4 = vector.load %arg3[%c0_4, %c0_5, %c0_6] : memref<3x32x256xf32, #tpu.memory_space<vmem>>, vector<1x32x256xf32>
    %5 = vector.shape_cast %4 : vector<1x32x256xf32> to vector<32x256xf32>
    %cst_7 = arith.constant dense<0.000000e+00> : vector<32x256xf32>
    %6 = tpu.matmul %3, %5, %cst_7 {dimension_numbers = #tpu.dot_dimension_numbers<[1], [0], [0], [1], [0, 0, 1, 1], [], []>} : vector<32x32xf32>, vector<32x256xf32>, vector<32x256xf32> -> vector<32x256xf32>
    %c1 = arith.constant 1 : index
    %c0_8 = arith.constant 0 : index
    %c0_9 = arith.constant 0 : index
    %7 = vector.load %arg2[%c1, %c0_8, %c0_9] : memref<3x32x64xf32, #tpu.memory_space<vmem>>, vector<1x32x64xf32>
    %8 = vector.shape_cast %7 : vector<1x32x64xf32> to vector<32x64xf32>
    %cst_10 = arith.constant dense<0.000000e+00> : vector<32x32xf32>
    %9 = tpu.matmul %8, %0, %cst_10 {dimension_numbers = #tpu.dot_dimension_numbers<[1], [0], [0], [1], [0, 0, 1, 1], [], []>} : vector<32x64xf32>, vector<64x32xf32>, vector<32x32xf32> -> vector<32x32xf32>
    %c1_11 = arith.constant 1 : index
    %c0_12 = arith.constant 0 : index
    %c0_13 = arith.constant 0 : index
    %10 = vector.load %arg3[%c1_11, %c0_12, %c0_13] : memref<3x32x256xf32, #tpu.memory_space<vmem>>, vector<1x32x256xf32>
    %11 = vector.shape_cast %10 : vector<1x32x256xf32> to vector<32x256xf32>
    %cst_14 = arith.constant dense<0.000000e+00> : vector<32x256xf32>
    %12 = tpu.matmul %9, %11, %cst_14 {dimension_numbers = #tpu.dot_dimension_numbers<[1], [0], [0], [1], [0, 0, 1, 1], [], []>} : vector<32x32xf32>, vector<32x256xf32>, vector<32x256xf32> -> vector<32x256xf32>
    %13 = arith.addf %6, %12 : vector<32x256xf32>
    %c2 = arith.constant 2 : index
    %c0_15 = arith.constant 0 : index
    %c0_16 = arith.constant 0 : index
    %14 = vector.load %arg2[%c2, %c0_15, %c0_16] : memref<3x32x64xf32, #tpu.memory_space<vmem>>, vector<1x32x64xf32>
    %15 = vector.shape_cast %14 : vector<1x32x64xf32> to vector<32x64xf32>
    %cst_17 = arith.constant dense<0.000000e+00> : vector<32x32xf32>
    %16 = tpu.matmul %15, %0, %cst_17 {dimension_numbers = #tpu.dot_dimension_numbers<[1], [0], [0], [1], [0, 0, 1, 1], [], []>} : vector<32x64xf32>, vector<64x32xf32>, vector<32x32xf32> -> vector<32x32xf32>
    %c2_18 = arith.constant 2 : index
    %c0_19 = arith.constant 0 : index
    %c0_20 = arith.constant 0 : index
    %17 = vector.load %arg3[%c2_18, %c0_19, %c0_20] : memref<3x32x256xf32, #tpu.memory_space<vmem>>, vector<1x32x256xf32>
    %18 = vector.shape_cast %17 : vector<1x32x256xf32> to vector<32x256xf32>
    %cst_21 = arith.constant dense<0.000000e+00> : vector<32x256xf32>
    %19 = tpu.matmul %16, %18, %cst_21 {dimension_numbers = #tpu.dot_dimension_numbers<[1], [0], [0], [1], [0, 0, 1, 1], [], []>} : vector<32x32xf32>, vector<32x256xf32>, vector<32x256xf32> -> vector<32x256xf32>
    %20 = arith.addf %13, %19 : vector<32x256xf32>
    %c0_22 = arith.constant 0 : index
    %c0_23 = arith.constant 0 : index
    %21 = vector.load %arg4[%c0_22, %c0_23] : memref<1x256xf32, #tpu.memory_space<vmem>>, vector<1x256xf32>
    %22 = vector.broadcast %21 : vector<1x256xf32> to vector<32x256xf32>
    %23 = arith.addf %20, %22 : vector<32x256xf32>
    %cst_24 = arith.constant 0.000000e+00 : f32
    %24 = vector.broadcast %cst_24 : f32 to vector<32x256xf32>
    %25 = arith.maximumf %23, %24 : vector<32x256xf32>
    %c0_25 = arith.constant 0 : index
    %c0_26 = arith.constant 0 : index
    %c0_27 = arith.constant 0 : index
    %26 = vector.load %arg5[%c0_25, %c0_26, %c0_27] : memref<2x16x32xf32, #tpu.memory_space<vmem>>, vector<1x16x32xf32>
    %27 = vector.shape_cast %26 : vector<1x16x32xf32> to vector<16x32xf32>
    %cst_28 = arith.constant dense<0.000000e+00> : vector<16x256xf32>
    %28 = tpu.matmul %27, %25, %cst_28 {dimension_numbers = #tpu.dot_dimension_numbers<[1], [0], [0], [1], [0, 0, 1, 1], [], []>} : vector<16x32xf32>, vector<32x256xf32>, vector<16x256xf32> -> vector<16x256xf32>
    %c1_29 = arith.constant 1 : index
    %c0_30 = arith.constant 0 : index
    %c0_31 = arith.constant 0 : index
    %29 = vector.load %arg5[%c1_29, %c0_30, %c0_31] : memref<2x16x32xf32, #tpu.memory_space<vmem>>, vector<1x16x32xf32>
    %30 = vector.shape_cast %29 : vector<1x16x32xf32> to vector<16x32xf32>
    %cst_32 = arith.constant dense<0.000000e+00> : vector<16x256xf32>
    %31 = tpu.matmul %30, %25, %cst_32 {dimension_numbers = #tpu.dot_dimension_numbers<[1], [0], [0], [1], [0, 0, 1, 1], [], []>} : vector<16x32xf32>, vector<32x256xf32>, vector<16x256xf32> -> vector<16x256xf32>
    %32 = arith.maximumf %28, %31 : vector<16x256xf32>
    %c0_33 = arith.constant 0 : index
    %c0_34 = arith.constant 0 : index
    %c0_35 = arith.constant 0 : index
    %33 = vector.load %arg6[%c0_33, %c0_34, %c0_35] : memref<2x256x128xf32, #tpu.memory_space<vmem>>, vector<1x256x128xf32>
    %34 = vector.shape_cast %33 : vector<1x256x128xf32> to vector<256x128xf32>
    %cst_36 = arith.constant dense<0.000000e+00> : vector<16x128xf32>
    %35 = tpu.matmul %32, %34, %cst_36 {dimension_numbers = #tpu.dot_dimension_numbers<[1], [0], [0], [1], [0, 0, 1, 1], [], []>} : vector<16x256xf32>, vector<256x128xf32>, vector<16x128xf32> -> vector<16x128xf32>
    %c1_37 = arith.constant 1 : index
    %c0_38 = arith.constant 0 : index
    %c0_39 = arith.constant 0 : index
    %36 = vector.load %arg6[%c1_37, %c0_38, %c0_39] : memref<2x256x128xf32, #tpu.memory_space<vmem>>, vector<1x256x128xf32>
    %37 = vector.shape_cast %36 : vector<1x256x128xf32> to vector<256x128xf32>
    %cst_40 = arith.constant dense<0.000000e+00> : vector<16x128xf32>
    %38 = tpu.matmul %32, %37, %cst_40 {dimension_numbers = #tpu.dot_dimension_numbers<[1], [0], [0], [1], [0, 0, 1, 1], [], []>} : vector<16x256xf32>, vector<256x128xf32>, vector<16x128xf32> -> vector<16x128xf32>
    %39 = arith.maximumf %35, %38 : vector<16x128xf32>
    %c0_41 = arith.constant 0 : index
    %c0_42 = arith.constant 0 : index
    %c0_43 = arith.constant 0 : index
    %40 = vector.load %arg7[%c0_41, %c0_42, %c0_43] : memref<3x8x16xf32, #tpu.memory_space<vmem>>, vector<1x8x16xf32>
    %41 = vector.shape_cast %40 : vector<1x8x16xf32> to vector<8x16xf32>
    %cst_44 = arith.constant dense<0.000000e+00> : vector<8x128xf32>
    %42 = tpu.matmul %41, %39, %cst_44 {dimension_numbers = #tpu.dot_dimension_numbers<[1], [0], [0], [1], [0, 0, 1, 1], [], []>} : vector<8x16xf32>, vector<16x128xf32>, vector<8x128xf32> -> vector<8x128xf32>
    %c0_45 = arith.constant 0 : index
    %c0_46 = arith.constant 0 : index
    %c0_47 = arith.constant 0 : index
    %43 = vector.load %arg8[%c0_45, %c0_46, %c0_47] : memref<3x128x128xf32, #tpu.memory_space<vmem>>, vector<1x128x128xf32>
    %44 = vector.shape_cast %43 : vector<1x128x128xf32> to vector<128x128xf32>
    %cst_48 = arith.constant dense<0.000000e+00> : vector<8x128xf32>
    %45 = tpu.matmul %42, %44, %cst_48 {dimension_numbers = #tpu.dot_dimension_numbers<[1], [0], [0], [1], [0, 0, 1, 1], [], []>} : vector<8x128xf32>, vector<128x128xf32>, vector<8x128xf32> -> vector<8x128xf32>
    %c1_49 = arith.constant 1 : index
    %c0_50 = arith.constant 0 : index
    %c0_51 = arith.constant 0 : index
    %46 = vector.load %arg7[%c1_49, %c0_50, %c0_51] : memref<3x8x16xf32, #tpu.memory_space<vmem>>, vector<1x8x16xf32>
    %47 = vector.shape_cast %46 : vector<1x8x16xf32> to vector<8x16xf32>
    %cst_52 = arith.constant dense<0.000000e+00> : vector<8x128xf32>
    %48 = tpu.matmul %47, %39, %cst_52 {dimension_numbers = #tpu.dot_dimension_numbers<[1], [0], [0], [1], [0, 0, 1, 1], [], []>} : vector<8x16xf32>, vector<16x128xf32>, vector<8x128xf32> -> vector<8x128xf32>
    %c1_53 = arith.constant 1 : index
    %c0_54 = arith.constant 0 : index
    %c0_55 = arith.constant 0 : index
    %49 = vector.load %arg8[%c1_53, %c0_54, %c0_55] : memref<3x128x128xf32, #tpu.memory_space<vmem>>, vector<1x128x128xf32>
    %50 = vector.shape_cast %49 : vector<1x128x128xf32> to vector<128x128xf32>
    %cst_56 = arith.constant dense<0.000000e+00> : vector<8x128xf32>
    %51 = tpu.matmul %48, %50, %cst_56 {dimension_numbers = #tpu.dot_dimension_numbers<[1], [0], [0], [1], [0, 0, 1, 1], [], []>} : vector<8x128xf32>, vector<128x128xf32>, vector<8x128xf32> -> vector<8x128xf32>
    %52 = arith.addf %45, %51 : vector<8x128xf32>
    %c2_57 = arith.constant 2 : index
    %c0_58 = arith.constant 0 : index
    %c0_59 = arith.constant 0 : index
    %53 = vector.load %arg7[%c2_57, %c0_58, %c0_59] : memref<3x8x16xf32, #tpu.memory_space<vmem>>, vector<1x8x16xf32>
    %54 = vector.shape_cast %53 : vector<1x8x16xf32> to vector<8x16xf32>
    %cst_60 = arith.constant dense<0.000000e+00> : vector<8x128xf32>
    %55 = tpu.matmul %54, %39, %cst_60 {dimension_numbers = #tpu.dot_dimension_numbers<[1], [0], [0], [1], [0, 0, 1, 1], [], []>} : vector<8x16xf32>, vector<16x128xf32>, vector<8x128xf32> -> vector<8x128xf32>
    %c2_61 = arith.constant 2 : index
    %c0_62 = arith.constant 0 : index
    %c0_63 = arith.constant 0 : index
    %56 = vector.load %arg8[%c2_61, %c0_62, %c0_63] : memref<3x128x128xf32, #tpu.memory_space<vmem>>, vector<1x128x128xf32>
    %57 = vector.shape_cast %56 : vector<1x128x128xf32> to vector<128x128xf32>
    %cst_64 = arith.constant dense<0.000000e+00> : vector<8x128xf32>
    %58 = tpu.matmul %55, %57, %cst_64 {dimension_numbers = #tpu.dot_dimension_numbers<[1], [0], [0], [1], [0, 0, 1, 1], [], []>} : vector<8x128xf32>, vector<128x128xf32>, vector<8x128xf32> -> vector<8x128xf32>
    %59 = arith.addf %52, %58 : vector<8x128xf32>
    %c0_65 = arith.constant 0 : index
    %c0_66 = arith.constant 0 : index
    %60 = vector.load %arg9[%c0_65, %c0_66] : memref<1x128xf32, #tpu.memory_space<vmem>>, vector<1x128xf32>
    %61 = vector.broadcast %60 : vector<1x128xf32> to vector<8x128xf32>
    %62 = arith.addf %59, %61 : vector<8x128xf32>
    %cst_67 = arith.constant 0.000000e+00 : f32
    %63 = vector.broadcast %cst_67 : f32 to vector<8x128xf32>
    %64 = arith.maximumf %62, %63 : vector<8x128xf32>
    %c0_68 = arith.constant 0 : index
    %c0_69 = arith.constant 0 : index
    %c0_70 = arith.constant 0 : index
    %65 = vector.load %arg10[%c0_68, %c0_69, %c0_70] : memref<2x6x8xf32, #tpu.memory_space<vmem>>, vector<1x6x8xf32>
    %66 = vector.shape_cast %65 : vector<1x6x8xf32> to vector<6x8xf32>
    %cst_71 = arith.constant dense<0.000000e+00> : vector<6x128xf32>
    %67 = tpu.matmul %66, %64, %cst_71 {dimension_numbers = #tpu.dot_dimension_numbers<[1], [0], [0], [1], [0, 0, 1, 1], [], []>} : vector<6x8xf32>, vector<8x128xf32>, vector<6x128xf32> -> vector<6x128xf32>
    %c1_72 = arith.constant 1 : index
    %c0_73 = arith.constant 0 : index
    %c0_74 = arith.constant 0 : index
    %68 = vector.load %arg10[%c1_72, %c0_73, %c0_74] : memref<2x6x8xf32, #tpu.memory_space<vmem>>, vector<1x6x8xf32>
    %69 = vector.shape_cast %68 : vector<1x6x8xf32> to vector<6x8xf32>
    %cst_75 = arith.constant dense<0.000000e+00> : vector<6x128xf32>
    %70 = tpu.matmul %69, %64, %cst_75 {dimension_numbers = #tpu.dot_dimension_numbers<[1], [0], [0], [1], [0, 0, 1, 1], [], []>} : vector<6x8xf32>, vector<8x128xf32>, vector<6x128xf32> -> vector<6x128xf32>
    %71 = arith.maximumf %67, %70 : vector<6x128xf32>
    %c0_76 = arith.constant 0 : index
    %c0_77 = arith.constant 0 : index
    %c0_78 = arith.constant 0 : index
    %72 = vector.load %arg11[%c0_76, %c0_77, %c0_78] : memref<2x128x96xf32, #tpu.memory_space<vmem>>, vector<1x128x96xf32>
    %73 = vector.shape_cast %72 : vector<1x128x96xf32> to vector<128x96xf32>
    %cst_79 = arith.constant dense<0.000000e+00> : vector<6x96xf32>
    %74 = tpu.matmul %71, %73, %cst_79 {dimension_numbers = #tpu.dot_dimension_numbers<[1], [0], [0], [1], [0, 0, 1, 1], [], []>} : vector<6x128xf32>, vector<128x96xf32>, vector<6x96xf32> -> vector<6x96xf32>
    %c1_80 = arith.constant 1 : index
    %c0_81 = arith.constant 0 : index
    %c0_82 = arith.constant 0 : index
    %75 = vector.load %arg11[%c1_80, %c0_81, %c0_82] : memref<2x128x96xf32, #tpu.memory_space<vmem>>, vector<1x128x96xf32>
    %76 = vector.shape_cast %75 : vector<1x128x96xf32> to vector<128x96xf32>
    %cst_83 = arith.constant dense<0.000000e+00> : vector<6x96xf32>
    %77 = tpu.matmul %71, %76, %cst_83 {dimension_numbers = #tpu.dot_dimension_numbers<[1], [0], [0], [1], [0, 0, 1, 1], [], []>} : vector<6x128xf32>, vector<128x96xf32>, vector<6x96xf32> -> vector<6x96xf32>
    %78 = arith.maximumf %74, %77 : vector<6x96xf32>
    %c0_84 = arith.constant 0 : index
    %c0_85 = arith.constant 0 : index
    %c0_86 = arith.constant 0 : index
    %79 = vector.load %arg12[%c0_84, %c0_85, %c0_86] : memref<3x14x6xf32, #tpu.memory_space<vmem>>, vector<1x14x6xf32>
    %80 = vector.shape_cast %79 : vector<1x14x6xf32> to vector<14x6xf32>
    %cst_87 = arith.constant dense<0.000000e+00> : vector<14x96xf32>
    %81 = tpu.matmul %80, %78, %cst_87 {dimension_numbers = #tpu.dot_dimension_numbers<[1], [0], [0], [1], [0, 0, 1, 1], [], []>} : vector<14x6xf32>, vector<6x96xf32>, vector<14x96xf32> -> vector<14x96xf32>
    %c0_88 = arith.constant 0 : index
    %c0_89 = arith.constant 0 : index
    %c0_90 = arith.constant 0 : index
    %82 = vector.load %arg13[%c0_88, %c0_89, %c0_90] : memref<3x96x112xf32, #tpu.memory_space<vmem>>, vector<1x96x112xf32>
    %83 = vector.shape_cast %82 : vector<1x96x112xf32> to vector<96x112xf32>
    %cst_91 = arith.constant dense<0.000000e+00> : vector<14x112xf32>
    %84 = tpu.matmul %81, %83, %cst_91 {dimension_numbers = #tpu.dot_dimension_numbers<[1], [0], [0], [1], [0, 0, 1, 1], [], []>} : vector<14x96xf32>, vector<96x112xf32>, vector<14x112xf32> -> vector<14x112xf32>
    %c1_92 = arith.constant 1 : index
    %c0_93 = arith.constant 0 : index
    %c0_94 = arith.constant 0 : index
    %85 = vector.load %arg12[%c1_92, %c0_93, %c0_94] : memref<3x14x6xf32, #tpu.memory_space<vmem>>, vector<1x14x6xf32>
    %86 = vector.shape_cast %85 : vector<1x14x6xf32> to vector<14x6xf32>
    %cst_95 = arith.constant dense<0.000000e+00> : vector<14x96xf32>
    %87 = tpu.matmul %86, %78, %cst_95 {dimension_numbers = #tpu.dot_dimension_numbers<[1], [0], [0], [1], [0, 0, 1, 1], [], []>} : vector<14x6xf32>, vector<6x96xf32>, vector<14x96xf32> -> vector<14x96xf32>
    %c1_96 = arith.constant 1 : index
    %c0_97 = arith.constant 0 : index
    %c0_98 = arith.constant 0 : index
    %88 = vector.load %arg13[%c1_96, %c0_97, %c0_98] : memref<3x96x112xf32, #tpu.memory_space<vmem>>, vector<1x96x112xf32>
    %89 = vector.shape_cast %88 : vector<1x96x112xf32> to vector<96x112xf32>
    %cst_99 = arith.constant dense<0.000000e+00> : vector<14x112xf32>
    %90 = tpu.matmul %87, %89, %cst_99 {dimension_numbers = #tpu.dot_dimension_numbers<[1], [0], [0], [1], [0, 0, 1, 1], [], []>} : vector<14x96xf32>, vector<96x112xf32>, vector<14x112xf32> -> vector<14x112xf32>
    %91 = arith.addf %84, %90 : vector<14x112xf32>
    %c2_100 = arith.constant 2 : index
    %c0_101 = arith.constant 0 : index
    %c0_102 = arith.constant 0 : index
    %92 = vector.load %arg12[%c2_100, %c0_101, %c0_102] : memref<3x14x6xf32, #tpu.memory_space<vmem>>, vector<1x14x6xf32>
    %93 = vector.shape_cast %92 : vector<1x14x6xf32> to vector<14x6xf32>
    %cst_103 = arith.constant dense<0.000000e+00> : vector<14x96xf32>
    %94 = tpu.matmul %93, %78, %cst_103 {dimension_numbers = #tpu.dot_dimension_numbers<[1], [0], [0], [1], [0, 0, 1, 1], [], []>} : vector<14x6xf32>, vector<6x96xf32>, vector<14x96xf32> -> vector<14x96xf32>
    %c2_104 = arith.constant 2 : index
    %c0_105 = arith.constant 0 : index
    %c0_106 = arith.constant 0 : index
    %95 = vector.load %arg13[%c2_104, %c0_105, %c0_106] : memref<3x96x112xf32, #tpu.memory_space<vmem>>, vector<1x96x112xf32>
    %96 = vector.shape_cast %95 : vector<1x96x112xf32> to vector<96x112xf32>
    %cst_107 = arith.constant dense<0.000000e+00> : vector<14x112xf32>
    %97 = tpu.matmul %94, %96, %cst_107 {dimension_numbers = #tpu.dot_dimension_numbers<[1], [0], [0], [1], [0, 0, 1, 1], [], []>} : vector<14x96xf32>, vector<96x112xf32>, vector<14x112xf32> -> vector<14x112xf32>
    %98 = arith.addf %91, %97 : vector<14x112xf32>
    %c0_108 = arith.constant 0 : index
    %c0_109 = arith.constant 0 : index
    %99 = vector.load %arg14[%c0_108, %c0_109] : memref<1x112xf32, #tpu.memory_space<vmem>>, vector<1x112xf32>
    %100 = vector.broadcast %99 : vector<1x112xf32> to vector<14x112xf32>
    %101 = arith.addf %98, %100 : vector<14x112xf32>
    %cst_110 = arith.constant 0.000000e+00 : f32
    %102 = vector.broadcast %cst_110 : f32 to vector<14x112xf32>
    %103 = arith.maximumf %101, %102 : vector<14x112xf32>
    %c0_111 = arith.constant 0 : index
    %c0_112 = arith.constant 0 : index
    %c0_113 = arith.constant 0 : index
    %104 = vector.load %arg15[%c0_111, %c0_112, %c0_113] : memref<3x30x14xf32, #tpu.memory_space<vmem>>, vector<1x30x14xf32>
    %105 = vector.shape_cast %104 : vector<1x30x14xf32> to vector<30x14xf32>
    %cst_114 = arith.constant dense<0.000000e+00> : vector<30x112xf32>
    %106 = tpu.matmul %105, %103, %cst_114 {dimension_numbers = #tpu.dot_dimension_numbers<[1], [0], [0], [1], [0, 0, 1, 1], [], []>} : vector<30x14xf32>, vector<14x112xf32>, vector<30x112xf32> -> vector<30x112xf32>
    %c0_115 = arith.constant 0 : index
    %c0_116 = arith.constant 0 : index
    %c0_117 = arith.constant 0 : index
    %107 = vector.load %arg16[%c0_115, %c0_116, %c0_117] : memref<3x112x120xf32, #tpu.memory_space<vmem>>, vector<1x112x120xf32>
    %108 = vector.shape_cast %107 : vector<1x112x120xf32> to vector<112x120xf32>
    %cst_118 = arith.constant dense<0.000000e+00> : vector<30x120xf32>
    %109 = tpu.matmul %106, %108, %cst_118 {dimension_numbers = #tpu.dot_dimension_numbers<[1], [0], [0], [1], [0, 0, 1, 1], [], []>} : vector<30x112xf32>, vector<112x120xf32>, vector<30x120xf32> -> vector<30x120xf32>
    %c1_119 = arith.constant 1 : index
    %c0_120 = arith.constant 0 : index
    %c0_121 = arith.constant 0 : index
    %110 = vector.load %arg15[%c1_119, %c0_120, %c0_121] : memref<3x30x14xf32, #tpu.memory_space<vmem>>, vector<1x30x14xf32>
    %111 = vector.shape_cast %110 : vector<1x30x14xf32> to vector<30x14xf32>
    %cst_122 = arith.constant dense<0.000000e+00> : vector<30x112xf32>
    %112 = tpu.matmul %111, %103, %cst_122 {dimension_numbers = #tpu.dot_dimension_numbers<[1], [0], [0], [1], [0, 0, 1, 1], [], []>} : vector<30x14xf32>, vector<14x112xf32>, vector<30x112xf32> -> vector<30x112xf32>
    %c1_123 = arith.constant 1 : index
    %c0_124 = arith.constant 0 : index
    %c0_125 = arith.constant 0 : index
    %113 = vector.load %arg16[%c1_123, %c0_124, %c0_125] : memref<3x112x120xf32, #tpu.memory_space<vmem>>, vector<1x112x120xf32>
    %114 = vector.shape_cast %113 : vector<1x112x120xf32> to vector<112x120xf32>
    %cst_126 = arith.constant dense<0.000000e+00> : vector<30x120xf32>
    %115 = tpu.matmul %112, %114, %cst_126 {dimension_numbers = #tpu.dot_dimension_numbers<[1], [0], [0], [1], [0, 0, 1, 1], [], []>} : vector<30x112xf32>, vector<112x120xf32>, vector<30x120xf32> -> vector<30x120xf32>
    %116 = arith.addf %109, %115 : vector<30x120xf32>
    %c2_127 = arith.constant 2 : index
    %c0_128 = arith.constant 0 : index
    %c0_129 = arith.constant 0 : index
    %117 = vector.load %arg15[%c2_127, %c0_128, %c0_129] : memref<3x30x14xf32, #tpu.memory_space<vmem>>, vector<1x30x14xf32>
    %118 = vector.shape_cast %117 : vector<1x30x14xf32> to vector<30x14xf32>
    %cst_130 = arith.constant dense<0.000000e+00> : vector<30x112xf32>
    %119 = tpu.matmul %118, %103, %cst_130 {dimension_numbers = #tpu.dot_dimension_numbers<[1], [0], [0], [1], [0, 0, 1, 1], [], []>} : vector<30x14xf32>, vector<14x112xf32>, vector<30x112xf32> -> vector<30x112xf32>
    %c2_131 = arith.constant 2 : index
    %c0_132 = arith.constant 0 : index
    %c0_133 = arith.constant 0 : index
    %120 = vector.load %arg16[%c2_131, %c0_132, %c0_133] : memref<3x112x120xf32, #tpu.memory_space<vmem>>, vector<1x112x120xf32>
    %121 = vector.shape_cast %120 : vector<1x112x120xf32> to vector<112x120xf32>
    %cst_134 = arith.constant dense<0.000000e+00> : vector<30x120xf32>
    %122 = tpu.matmul %119, %121, %cst_134 {dimension_numbers = #tpu.dot_dimension_numbers<[1], [0], [0], [1], [0, 0, 1, 1], [], []>} : vector<30x112xf32>, vector<112x120xf32>, vector<30x120xf32> -> vector<30x120xf32>
    %123 = arith.addf %116, %122 : vector<30x120xf32>
    %c0_135 = arith.constant 0 : index
    %c0_136 = arith.constant 0 : index
    %124 = vector.load %arg17[%c0_135, %c0_136] : memref<1x120xf32, #tpu.memory_space<vmem>>, vector<1x120xf32>
    %125 = vector.broadcast %124 : vector<1x120xf32> to vector<30x120xf32>
    %126 = arith.addf %123, %125 : vector<30x120xf32>
    %cst_137 = arith.constant 0.000000e+00 : f32
    %127 = vector.broadcast %cst_137 : f32 to vector<30x120xf32>
    %128 = arith.maximumf %126, %127 : vector<30x120xf32>
    %c0_138 = arith.constant 0 : index
    %c0_139 = arith.constant 0 : index
    %c0_140 = arith.constant 0 : index
    %129 = vector.load %arg18[%c0_138, %c0_139, %c0_140] : memref<4x64x30xf32, #tpu.memory_space<vmem>>, vector<1x64x30xf32>
    %130 = vector.shape_cast %129 : vector<1x64x30xf32> to vector<64x30xf32>
    %cst_141 = arith.constant dense<0.000000e+00> : vector<64x120xf32>
    %131 = tpu.matmul %130, %128, %cst_141 {dimension_numbers = #tpu.dot_dimension_numbers<[1], [0], [0], [1], [0, 0, 1, 1], [], []>} : vector<64x30xf32>, vector<30x120xf32>, vector<64x120xf32> -> vector<64x120xf32>
    %c0_142 = arith.constant 0 : index
    %c0_143 = arith.constant 0 : index
    %c0_144 = arith.constant 0 : index
    %132 = vector.load %arg19[%c0_142, %c0_143, %c0_144] : memref<4x120x32xf32, #tpu.memory_space<vmem>>, vector<1x120x32xf32>
    %133 = vector.shape_cast %132 : vector<1x120x32xf32> to vector<120x32xf32>
    %cst_145 = arith.constant dense<0.000000e+00> : vector<64x32xf32>
    %134 = tpu.matmul %131, %133, %cst_145 {dimension_numbers = #tpu.dot_dimension_numbers<[1], [0], [0], [1], [0, 0, 1, 1], [], []>} : vector<64x120xf32>, vector<120x32xf32>, vector<64x32xf32> -> vector<64x32xf32>
    %c1_146 = arith.constant 1 : index
    %c0_147 = arith.constant 0 : index
    %c0_148 = arith.constant 0 : index
    %135 = vector.load %arg18[%c1_146, %c0_147, %c0_148] : memref<4x64x30xf32, #tpu.memory_space<vmem>>, vector<1x64x30xf32>
    %136 = vector.shape_cast %135 : vector<1x64x30xf32> to vector<64x30xf32>
    %cst_149 = arith.constant dense<0.000000e+00> : vector<64x120xf32>
    %137 = tpu.matmul %136, %128, %cst_149 {dimension_numbers = #tpu.dot_dimension_numbers<[1], [0], [0], [1], [0, 0, 1, 1], [], []>} : vector<64x30xf32>, vector<30x120xf32>, vector<64x120xf32> -> vector<64x120xf32>
    %c1_150 = arith.constant 1 : index
    %c0_151 = arith.constant 0 : index
    %c0_152 = arith.constant 0 : index
    %138 = vector.load %arg19[%c1_150, %c0_151, %c0_152] : memref<4x120x32xf32, #tpu.memory_space<vmem>>, vector<1x120x32xf32>
    %139 = vector.shape_cast %138 : vector<1x120x32xf32> to vector<120x32xf32>
    %cst_153 = arith.constant dense<0.000000e+00> : vector<64x32xf32>
    %140 = tpu.matmul %137, %139, %cst_153 {dimension_numbers = #tpu.dot_dimension_numbers<[1], [0], [0], [1], [0, 0, 1, 1], [], []>} : vector<64x120xf32>, vector<120x32xf32>, vector<64x32xf32> -> vector<64x32xf32>
    %141 = arith.addf %134, %140 : vector<64x32xf32>
    %c2_154 = arith.constant 2 : index
    %c0_155 = arith.constant 0 : index
    %c0_156 = arith.constant 0 : index
    %142 = vector.load %arg18[%c2_154, %c0_155, %c0_156] : memref<4x64x30xf32, #tpu.memory_space<vmem>>, vector<1x64x30xf32>
    %143 = vector.shape_cast %142 : vector<1x64x30xf32> to vector<64x30xf32>
    %cst_157 = arith.constant dense<0.000000e+00> : vector<64x120xf32>
    %144 = tpu.matmul %143, %128, %cst_157 {dimension_numbers = #tpu.dot_dimension_numbers<[1], [0], [0], [1], [0, 0, 1, 1], [], []>} : vector<64x30xf32>, vector<30x120xf32>, vector<64x120xf32> -> vector<64x120xf32>
    %c2_158 = arith.constant 2 : index
    %c0_159 = arith.constant 0 : index
    %c0_160 = arith.constant 0 : index
    %145 = vector.load %arg19[%c2_158, %c0_159, %c0_160] : memref<4x120x32xf32, #tpu.memory_space<vmem>>, vector<1x120x32xf32>
    %146 = vector.shape_cast %145 : vector<1x120x32xf32> to vector<120x32xf32>
    %cst_161 = arith.constant dense<0.000000e+00> : vector<64x32xf32>
    %147 = tpu.matmul %144, %146, %cst_161 {dimension_numbers = #tpu.dot_dimension_numbers<[1], [0], [0], [1], [0, 0, 1, 1], [], []>} : vector<64x120xf32>, vector<120x32xf32>, vector<64x32xf32> -> vector<64x32xf32>
    %148 = arith.addf %141, %147 : vector<64x32xf32>
    %c3 = arith.constant 3 : index
    %c0_162 = arith.constant 0 : index
    %c0_163 = arith.constant 0 : index
    %149 = vector.load %arg18[%c3, %c0_162, %c0_163] : memref<4x64x30xf32, #tpu.memory_space<vmem>>, vector<1x64x30xf32>
    %150 = vector.shape_cast %149 : vector<1x64x30xf32> to vector<64x30xf32>
    %cst_164 = arith.constant dense<0.000000e+00> : vector<64x120xf32>
    %151 = tpu.matmul %150, %128, %cst_164 {dimension_numbers = #tpu.dot_dimension_numbers<[1], [0], [0], [1], [0, 0, 1, 1], [], []>} : vector<64x30xf32>, vector<30x120xf32>, vector<64x120xf32> -> vector<64x120xf32>
    %c3_165 = arith.constant 3 : index
    %c0_166 = arith.constant 0 : index
    %c0_167 = arith.constant 0 : index
    %152 = vector.load %arg19[%c3_165, %c0_166, %c0_167] : memref<4x120x32xf32, #tpu.memory_space<vmem>>, vector<1x120x32xf32>
    %153 = vector.shape_cast %152 : vector<1x120x32xf32> to vector<120x32xf32>
    %cst_168 = arith.constant dense<0.000000e+00> : vector<64x32xf32>
    %154 = tpu.matmul %151, %153, %cst_168 {dimension_numbers = #tpu.dot_dimension_numbers<[1], [0], [0], [1], [0, 0, 1, 1], [], []>} : vector<64x120xf32>, vector<120x32xf32>, vector<64x32xf32> -> vector<64x32xf32>
    %155 = arith.addf %148, %154 : vector<64x32xf32>
    %c0_169 = arith.constant 0 : index
    %c0_170 = arith.constant 0 : index
    %156 = vector.load %arg20[%c0_169, %c0_170] : memref<1x32xf32, #tpu.memory_space<vmem>>, vector<1x32xf32>
    %157 = vector.broadcast %156 : vector<1x32xf32> to vector<64x32xf32>
    %158 = arith.addf %155, %157 : vector<64x32xf32>
    %159 = math.tanh %158 : vector<64x32xf32>
    %c0_171 = arith.constant 0 : index
    %c0_172 = arith.constant 0 : index
    %160 = vector.load %arg21[%c0_171, %c0_172] : memref<64x32xf32, #tpu.memory_space<vmem>>, vector<64x32xf32>
    tpu.vector_store %arg21[%c0_171, %c0_172], %159 {strides = array<i32>} : memref<64x32xf32, #tpu.memory_space<vmem>>, vector<64x32xf32>,
    return
  }
  func.func @transform_0(%arg0: i32) -> (i32, i32) {
    %c0_i32 = arith.constant 0 : i32
    %c0_i32_0 = arith.constant 0 : i32
    %c0_i32_1 = arith.constant 0 : i32
    return %c0_i32, %c0_i32_0 : i32, i32
  }
  func.func @transform_1(%arg0: i32) -> (i32, i32, i32) {
    %c0_i32 = arith.constant 0 : i32
    %c0_i32_0 = arith.constant 0 : i32
    %c0_i32_1 = arith.constant 0 : i32
    %c0_i32_2 = arith.constant 0 : i32
    return %c0_i32, %c0_i32_0, %c0_i32_1 : i32, i32, i32
  }
  func.func @transform_2(%arg0: i32) -> (i32, i32, i32) {
    %c0_i32 = arith.constant 0 : i32
    %c0_i32_0 = arith.constant 0 : i32
    %c0_i32_1 = arith.constant 0 : i32
    %c0_i32_2 = arith.constant 0 : i32
    return %c0_i32, %c0_i32_0, %c0_i32_1 : i32, i32, i32
  }
  func.func @transform_3(%arg0: i32) -> (i32, i32) {
    %c0_i32 = arith.constant 0 : i32
    %c0_i32_0 = arith.constant 0 : i32
    %c0_i32_1 = arith.constant 0 : i32
    return %c0_i32, %c0_i32_0 : i32, i32
  }
  func.func @transform_4(%arg0: i32) -> (i32, i32, i32) {
    %c0_i32 = arith.constant 0 : i32
    %c0_i32_0 = arith.constant 0 : i32
    %c0_i32_1 = arith.constant 0 : i32
    %c0_i32_2 = arith.constant 0 : i32
    return %c0_i32, %c0_i32_0, %c0_i32_1 : i32, i32, i32
  }
  func.func @transform_5(%arg0: i32) -> (i32, i32, i32) {
    %c0_i32 = arith.constant 0 : i32
    %c0_i32_0 = arith.constant 0 : i32
    %c0_i32_1 = arith.constant 0 : i32
    %c0_i32_2 = arith.constant 0 : i32
    return %c0_i32, %c0_i32_0, %c0_i32_1 : i32, i32, i32
  }
  func.func @transform_6(%arg0: i32) -> (i32, i32, i32) {
    %c0_i32 = arith.constant 0 : i32
    %c0_i32_0 = arith.constant 0 : i32
    %c0_i32_1 = arith.constant 0 : i32
    %c0_i32_2 = arith.constant 0 : i32
    return %c0_i32, %c0_i32_0, %c0_i32_1 : i32, i32, i32
  }
  func.func @transform_7(%arg0: i32) -> (i32, i32, i32) {
    %c0_i32 = arith.constant 0 : i32
    %c0_i32_0 = arith.constant 0 : i32
    %c0_i32_1 = arith.constant 0 : i32
    %c0_i32_2 = arith.constant 0 : i32
    return %c0_i32, %c0_i32_0, %c0_i32_1 : i32, i32, i32
  }
  func.func @transform_8(%arg0: i32) -> (i32, i32) {
    %c0_i32 = arith.constant 0 : i32
    %c0_i32_0 = arith.constant 0 : i32
    %c0_i32_1 = arith.constant 0 : i32
    return %c0_i32, %c0_i32_0 : i32, i32
  }
  func.func @transform_9(%arg0: i32) -> (i32, i32, i32) {
    %c0_i32 = arith.constant 0 : i32
    %c0_i32_0 = arith.constant 0 : i32
    %c0_i32_1 = arith.constant 0 : i32
    %c0_i32_2 = arith.constant 0 : i32
    return %c0_i32, %c0_i32_0, %c0_i32_1 : i32, i32, i32
  }
  func.func @transform_10(%arg0: i32) -> (i32, i32, i32) {
    %c0_i32 = arith.constant 0 : i32
    %c0_i32_0 = arith.constant 0 : i32
    %c0_i32_1 = arith.constant 0 : i32
    %c0_i32_2 = arith.constant 0 : i32
    return %c0_i32, %c0_i32_0, %c0_i32_1 : i32, i32, i32
  }
  func.func @transform_11(%arg0: i32) -> (i32, i32, i32) {
    %c0_i32 = arith.constant 0 : i32
    %c0_i32_0 = arith.constant 0 : i32
    %c0_i32_1 = arith.constant 0 : i32
    %c0_i32_2 = arith.constant 0 : i32
    return %c0_i32, %c0_i32_0, %c0_i32_1 : i32, i32, i32
  }
  func.func @transform_12(%arg0: i32) -> (i32, i32, i32) {
    %c0_i32 = arith.constant 0 : i32
    %c0_i32_0 = arith.constant 0 : i32
    %c0_i32_1 = arith.constant 0 : i32
    %c0_i32_2 = arith.constant 0 : i32
    return %c0_i32, %c0_i32_0, %c0_i32_1 : i32, i32, i32
  }
  func.func @transform_13(%arg0: i32) -> (i32, i32) {
    %c0_i32 = arith.constant 0 : i32
    %c0_i32_0 = arith.constant 0 : i32
    %c0_i32_1 = arith.constant 0 : i32
    return %c0_i32, %c0_i32_0 : i32, i32
  }
  func.func @transform_14(%arg0: i32) -> (i32, i32, i32) {
    %c0_i32 = arith.constant 0 : i32
    %c0_i32_0 = arith.constant 0 : i32
    %c0_i32_1 = arith.constant 0 : i32
    %c0_i32_2 = arith.constant 0 : i32
    return %c0_i32, %c0_i32_0, %c0_i32_1 : i32, i32, i32
  }
  func.func @transform_15(%arg0: i32) -> (i32, i32, i32) {
    %c0_i32 = arith.constant 0 : i32
    %c0_i32_0 = arith.constant 0 : i32
    %c0_i32_1 = arith.constant 0 : i32
    %c0_i32_2 = arith.constant 0 : i32
    return %c0_i32, %c0_i32_0, %c0_i32_1 : i32, i32, i32
  }
  func.func @transform_16(%arg0: i32) -> (i32, i32) {
    %c0_i32 = arith.constant 0 : i32
    %c0_i32_0 = arith.constant 0 : i32
    %c0_i32_1 = arith.constant 0 : i32
    return %c0_i32, %c0_i32_0 : i32, i32
  }
  func.func @transform_17(%arg0: i32) -> (i32, i32, i32) {
    %c0_i32 = arith.constant 0 : i32
    %c0_i32_0 = arith.constant 0 : i32
    %c0_i32_1 = arith.constant 0 : i32
    %c0_i32_2 = arith.constant 0 : i32
    return %c0_i32, %c0_i32_0, %c0_i32_1 : i32, i32, i32
  }
  func.func @transform_18(%arg0: i32) -> (i32, i32, i32) {
    %c0_i32 = arith.constant 0 : i32
    %c0_i32_0 = arith.constant 0 : i32
    %c0_i32_1 = arith.constant 0 : i32
    %c0_i32_2 = arith.constant 0 : i32
    return %c0_i32, %c0_i32_0, %c0_i32_1 : i32, i32, i32
  }
  func.func @transform_19(%arg0: i32) -> (i32, i32) {
    %c0_i32 = arith.constant 0 : i32
    %c0_i32_0 = arith.constant 0 : i32
    %c0_i32_1 = arith.constant 0 : i32
    return %c0_i32, %c0_i32_0 : i32, i32
  }
  func.func @transform_20(%arg0: i32) -> (i32, i32) {
    %c0_i32 = arith.constant 0 : i32
    %c0_i32_0 = arith.constant 0 : i32
    %c0_i32_1 = arith.constant 0 : i32
    return %c0_i32, %c0_i32_0 : i32, i32
  }
}

</mosaic_0001>

<bundles_post_ra>
// kernel: tile.28
= control target key start
LH: loop header
LB: loop body
LE: loop exit
PB: predicated region body
PF: predicated region fallthrough
CT: control target
= control target key end

     0   :  { %s28_s0 = inlined_call_operand.vmem [shape: f32[16], index: 0, kind: input, shape index: {}]   ;;  %s29_s1 = inlined_call_operand.vmem [shape: f32[16,16], index: 1, kind: output, shape index: {}]  }
   0x1   :  { %v4_v0 = vld [vmem:[%s28_s0] ss:$0 sm:$0xff] }
   0x2   :  { %5 = vst [vmem:[%s29_s1] sm:$0xff] %v4_v0 }
   0x3   :  { %8 = vst [vmem:[%s29_s1 + $0x8] sm:$0xff] %v4_v0 }

// kernel: tile.29
= control target key start
LH: loop header
LB: loop body
LE: loop exit
PB: predicated region body
PF: predicated region fallthrough
CT: control target
= control target key end

     0   :  { %s7_s6 = smov 3  ;;  %s21_s9 = smov 3  ;;  %vm4_vm0 = vcmask 130048   ;;  %vm11_vm1 = vcmask 1048448   ;;  %vm18_vm2 = vcmask 917248   ;;  %vm25_vm3 = vcmask 786048   ;;  %s129_s0 = inlined_call_operand.vmem [shape: f32[16,16], index: 0, kind: input, shape index: {}]   ;;  %s130_s1 = inlined_call_operand.vmem [shape: f32[1,256], index: 1, kind: output, shape index: {}]  }
   0x1   :  { %v67_v0 = vld [vmem:[%s129_s0 + $0x7] ss:$8 sm:%s7_s6]   ;;  %s82_s10 = smov 112   ;;  %v69_v1 = vld [vmem:[%s129_s0 + $0x5] ss:$8 sm:%s21_s9]   ;;  %s83_s13 = smov 80  }
   0x2   :  { %9 = vrot.lane.b32.xlu0 %v67_v0, %s82_s10  ;;  %23 = vrot.lane.b32.xlu1 %v69_v1, %s83_s13  ;;  %s14_s14 = smov 3  ;;  %s28_s15 = smov 3  ;;  %vm32_vm4 = vcmask 654848   ;;  %vm39_vm5 = vcmask 523648   ;;  %vm46_vm6 = vcmask 392448   ;;  %vm53_vm7 = vcmask 261248  }
   0x3   :  { %s35_s16 = smov 3  ;;  %v68_v3 = vld [vmem:[%s129_s0 + $0x6] ss:$8 sm:%s14_s14]   ;;  %s84_s21 = smov 48   ;;  %v70_v4 = vld [vmem:[%s129_s0 + $0x4] ss:$8 sm:%s28_s15]  }
   0x4   :  { %v71_v2 = vld [vmem:[%s129_s0 + $0x3] ss:$8 sm:%s35_s16]   ;;  %s42_s24 = smov 3  ;;  %s85_s25 = smov 96  }
   0x5   :  { %37 = vrot.lane.b32.xlu2 %v71_v2, %s84_s21  ;;  %s86_s26 = smov 64   ;;  %s49_s27 = smov 3  ;;  %v72_v5 = vld [vmem:[%s129_s0 + $0x2] ss:$8 sm:%s42_s24]  }
   0x6   :  { %v73_v6 = vld [vmem:[%s129_s0 + $0x1] ss:$8 sm:%s49_s27]   ;;  %s87_s3 = smov 32   ;;  %s88_s4 = smov 16  }
   0x7   :  { %s2_s5 = smov 3 }
   0x8   :  { %v3_v7 = vld [vmem:[%s129_s0] ss:$8 sm:%s2_s5]  }
   0x9   :  { %5 = vst.msk [vmem:[#allocation0] ss:$8 sm:$0x3] %vm4_vm0, %v3_v7  }
   0xa   :  { %16 = vrot.lane.b32.xlu0 %v68_v3, %s85_s25  ;;  %30 = vrot.lane.b32.xlu1 %v70_v4, %s86_s26 }
   0xd   :  { %44 = vrot.lane.b32.xlu2 %v72_v5, %s87_s3 }
  0x12   :  { %51 = vrot.lane.b32.xlu0 %v73_v6, %s88_s4 }
  0x5f   :  { %v38_v8 = vpop.permute.xlu2 %37  }
  0x67   :  { %v45_v9 = vpop.permute.xlu2 %44  }
  0x74   :  { %v10_v10 = vpop.permute.xlu0 %9   ;;  %v24_v11 = vpop.permute.xlu1 %23  }
  0x75   :  { %12 = vst.msk [vmem:[#allocation0] ss:$8 sm:$0x3] %vm11_vm1, %v10_v10  }
  0x7c   :  { %v17_v12 = vpop.permute.xlu0 %16   ;;  %v31_v13 = vpop.permute.xlu1 %30  }
  0x7d   :  { %19 = vst.msk [vmem:[#allocation0] ss:$8 sm:$0x3] %vm18_vm2, %v17_v12  }
  0x7e   :  { %26 = vst.msk [vmem:[#allocation0] ss:$8 sm:$0x3] %vm25_vm3, %v24_v11  }
  0x7f   :  { %33 = vst.msk [vmem:[#allocation0] ss:$8 sm:$0x3] %vm32_vm4, %v31_v13  }
  0x80   :  { %40 = vst.msk [vmem:[#allocation0] ss:$8 sm:$0x3] %vm39_vm5, %v38_v8  }
  0x81   :  { %47 = vst.msk [vmem:[#allocation0] ss:$8 sm:$0x3] %vm46_vm6, %v45_v9  }
  0x84   :  { %v52_v14 = vpop.permute.xlu0 %51  }
  0x85   :  { %54 = vst.msk [vmem:[#allocation0] ss:$8 sm:$0x3] %vm53_vm7, %v52_v14  }
  0x8c   :  { %v57_v15 = vld [vmem:[#allocation0] sm:$0x1]  ;;  %v62_v16 = vld [vmem:[#allocation0 + $0x8] sm:$0x1] }
  0x8d   :  { %60 = vst [vmem:[%s130_s1] sm:$0x1] %v57_v15 }
  0x8e   :  { %74 = vst [vmem:[%s130_s1 + $0x1] sm:$0x1] %v62_v16 }

// kernel: tile.43
= control target key start
LH: loop header
LB: loop body
LE: loop exit
PB: predicated region body
PF: predicated region fallthrough
CT: control target
= control target key end

     0   :  { %s28_s0 = inlined_call_operand.vmem [shape: f32[8], index: 0, kind: input, shape index: {}]   ;;  %s29_s1 = inlined_call_operand.vmem [shape: f32[15,8], index: 1, kind: output, shape index: {}]  }
   0x1   :  { %v4_v0 = vld [vmem:[%s28_s0] ss:$0 sm:$0xff] }
   0x2   :  { %5 = vst [vmem:[%s29_s1] sm:$0xff] %v4_v0 }
   0x3   :  { %8 = vst [vmem:[%s29_s1 + $0x8] sm:$0xff] %v4_v0 }

// kernel: tile.44
= control target key start
LH: loop header
LB: loop body
LE: loop exit
PB: predicated region body
PF: predicated region fallthrough
CT: control target
= control target key end

     0   :  { %s123_s10 = smov 112   ;;  %s124_s11 = smov 96   ;;  %vm3_vm0 = vcmask 64512   ;;  %vm9_vm1 = vcmask 982912   ;;  %vm15_vm2 = vcmask 917312   ;;  %vm21_vm3 = vcmask 851712   ;;  %s195_s0 = inlined_call_operand.vmem [shape: f32[15,8], index: 0, kind: input, shape index: {}]   ;;  %s196_s1 = inlined_call_operand.vmem [shape: f32[1,120], index: 1, kind: output, shape index: {}]  }
   0x1   :  { %v95_v0 = vld [vmem:[%s195_s0 + $0xe] sm:$0x1]   ;;  %v97_v1 = vld [vmem:[%s195_s0 + $0xc] sm:$0x1]   ;;  %v99_v2 = vld [vmem:[%s195_s0 + $0xa] sm:$0x1]  }
   0x2   :  { %7 = vrot.lane.b32.xlu0 %v95_v0, %s123_s10  ;;  %19 = vrot.lane.b32.xlu1 %v97_v1, %s124_s11  ;;  %s125_s14 = smov 80   ;;  %v96_v3 = vld [vmem:[%s195_s0 + $0xd] sm:$0x1]   ;;  %v98_v4 = vld [vmem:[%s195_s0 + $0xb] sm:$0x1]   ;;  %s126_s19 = smov 104  }
   0x3   :  { %31 = vrot.lane.b32.xlu2 %v99_v2, %s125_s14  ;;  %s127_s20 = smov 88   ;;  %v100_v5 = vld [vmem:[%s195_s0 + $0x9] sm:$0x1]   ;;  %s128_s23 = smov 72   ;;  %v101_v6 = vld [vmem:[%s195_s0 + $0x8] sm:$0x1]  }
   0x4   :  { %v102_v7 = vld [vmem:[%s195_s0 + $0x7] sm:$0x1]   ;;  %s129_s28 = smov 64   ;;  %s130_s29 = smov 56   ;;  %v103_v8 = vld [vmem:[%s195_s0 + $0x6] sm:$0x1]  }
   0x5   :  { %s131_s3 = smov 48   ;;  %v104_v9 = vld [vmem:[%s195_s0 + $0x5] sm:$0x1]   ;;  %v105_v10 = vld [vmem:[%s195_s0 + $0x4] sm:$0x1]   ;;  %s132_s8 = smov 40  }
   0x6   :  { %s133_s9 = smov 32   ;;  %v106_v11 = vld [vmem:[%s195_s0 + $0x3] sm:$0x1]   ;;  %s134_s12 = smov 24   ;;  %v107_v12 = vld [vmem:[%s195_s0 + $0x2] sm:$0x1]  }
   0x7   :  { %v108_v13 = vld [vmem:[%s195_s0 + $0x1] sm:$0x1]   ;;  %s135_s17 = smov 16   ;;  %s136_s18 = smov 8   ;;  %v2_v14 = vld [vmem:[%s195_s0] sm:$0x1]  }
   0x8   :  { %4 = vst.msk [vmem:[#allocation0] sm:$0x1] %vm3_vm0, %v2_v14   ;;  %vm27_vm4 = vcmask 786112   ;;  %vm33_vm5 = vcmask 720512   ;;  %vm39_vm6 = vcmask 654912   ;;  %vm45_vm7 = vcmask 589312  }
   0x9   :  { %vm51_vm8 = vcmask 523712   ;;  %vm57_vm9 = vcmask 458112   ;;  %vm63_vm10 = vcmask 392512   ;;  %vm69_vm11 = vcmask 326912  }
   0xa   :  { %13 = vrot.lane.b32.xlu0 %v96_v3, %s126_s19  ;;  %25 = vrot.lane.b32.xlu1 %v98_v4, %s127_s20  ;;  %vm75_vm12 = vcmask 261312   ;;  %vm81_vm13 = vcmask 195712   ;;  %vm87_vm14 = vcmask 130112  }
   0xb   :  { %37 = vrot.lane.b32.xlu2 %v100_v5, %s128_s23 }
  0x12   :  { %43 = vrot.lane.b32.xlu0 %v101_v6, %s129_s28  ;;  %49 = vrot.lane.b32.xlu1 %v102_v7, %s130_s29 }
  0x13   :  { %55 = vrot.lane.b32.xlu2 %v103_v8, %s131_s3 }
  0x1a   :  { %61 = vrot.lane.b32.xlu0 %v104_v9, %s132_s8  ;;  %67 = vrot.lane.b32.xlu1 %v105_v10, %s133_s9 }
  0x1b   :  { %73 = vrot.lane.b32.xlu2 %v106_v11, %s134_s12 }
  0x22   :  { %79 = vrot.lane.b32.xlu0 %v107_v12, %s135_s17  ;;  %85 = vrot.lane.b32.xlu1 %v108_v13, %s136_s18 }
  0x5d   :  { %v32_v15 = vpop.permute.xlu2 %31  }
  0x65   :  { %v38_v16 = vpop.permute.xlu2 %37  }
  0x6d   :  { %v56_v17 = vpop.permute.xlu2 %55  }
  0x74   :  { %v8_v18 = vpop.permute.xlu0 %7   ;;  %v20_v19 = vpop.permute.xlu1 %19  }
  0x75   :  { %10 = vst.msk [vmem:[#allocation0] sm:$0x1] %vm9_vm1, %v8_v18   ;;  %v74_v20 = vpop.permute.xlu2 %73  }
  0x7c   :  { %v14_v21 = vpop.permute.xlu0 %13   ;;  %v26_v22 = vpop.permute.xlu1 %25  }
  0x7d   :  { %16 = vst.msk [vmem:[#allocation0] sm:$0x1] %vm15_vm2, %v14_v21  }
  0x7e   :  { %22 = vst.msk [vmem:[#allocation0] sm:$0x1] %vm21_vm3, %v20_v19  }
  0x7f   :  { %28 = vst.msk [vmem:[#allocation0] sm:$0x1] %vm27_vm4, %v26_v22  }
  0x80   :  { %34 = vst.msk [vmem:[#allocation0] sm:$0x1] %vm33_vm5, %v32_v15  }
  0x81   :  { %40 = vst.msk [vmem:[#allocation0] sm:$0x1] %vm39_vm6, %v38_v16  }
  0x84   :  { %v44_v23 = vpop.permute.xlu0 %43   ;;  %v50_v24 = vpop.permute.xlu1 %49  }
  0x85   :  { %46 = vst.msk [vmem:[#allocation0] sm:$0x1] %vm45_vm7, %v44_v23  }
  0x86   :  { %52 = vst.msk [vmem:[#allocation0] sm:$0x1] %vm51_vm8, %v50_v24  }
  0x87   :  { %58 = vst.msk [vmem:[#allocation0] sm:$0x1] %vm57_vm9, %v56_v17  }
  0x8c   :  { %v62_v25 = vpop.permute.xlu0 %61   ;;  %v68_v26 = vpop.permute.xlu1 %67  }
  0x8d   :  { %64 = vst.msk [vmem:[#allocation0] sm:$0x1] %vm63_vm10, %v62_v25  }
  0x8e   :  { %70 = vst.msk [vmem:[#allocation0] sm:$0x1] %vm69_vm11, %v68_v26  }
  0x8f   :  { %76 = vst.msk [vmem:[#allocation0] sm:$0x1] %vm75_vm12, %v74_v20  }
  0x94   :  { %v80_v27 = vpop.permute.xlu0 %79   ;;  %v86_v28 = vpop.permute.xlu1 %85  }
  0x95   :  { %82 = vst.msk [vmem:[#allocation0] sm:$0x1] %vm81_vm13, %v80_v27  }
  0x96   :  { %88 = vst.msk [vmem:[#allocation0] sm:$0x1] %vm87_vm14, %v86_v28  }
  0x9d   :  { %v91_v29 = vld [vmem:[#allocation0] sm:$0x1] }
  0x9e   :  { %94 = vst [vmem:[%s196_s1] sm:$0x1] %v91_v29 }

// kernel: tile.38
= control target key start
LH: loop header
LB: loop body
LE: loop exit
PB: predicated region body
PF: predicated region fallthrough
CT: control target
= control target key end

     0   :  { %s22_s0 = inlined_call_operand.vmem [shape: f32[16], index: 0, kind: input, shape index: {}]   ;;  %s23_s1 = inlined_call_operand.vmem [shape: f32[7,16], index: 1, kind: output, shape index: {}]  }
   0x1   :  { %v4_v0 = vld [vmem:[%s22_s0] ss:$0 sm:$0xff] }
   0x2   :  { %5 = vst [vmem:[%s23_s1] sm:$0xff] %v4_v0 }

// kernel: tile.39
= control target key start
LH: loop header
LB: loop body
LE: loop exit
PB: predicated region body
PF: predicated region fallthrough
CT: control target
= control target key end

     0   :  { %s59_s10 = smov 96   ;;  %s60_s11 = smov 64   ;;  %vm3_vm0 = vcmask 130048   ;;  %vm9_vm1 = vcmask 917248   ;;  %vm15_vm2 = vcmask 786048   ;;  %vm21_vm3 = vcmask 654848   ;;  %s99_s0 = inlined_call_operand.vmem [shape: f32[7,16], index: 0, kind: input, shape index: {}]   ;;  %s100_s1 = inlined_call_operand.vmem [shape: f32[1,112], index: 1, kind: output, shape index: {}]  }
   0x1   :  { %v47_v0 = vld [vmem:[%s99_s0 + $0x6] sm:$0x1]   ;;  %v49_v1 = vld [vmem:[%s99_s0 + $0x4] sm:$0x1]   ;;  %v51_v2 = vld [vmem:[%s99_s0 + $0x2] sm:$0x1]  }
   0x2   :  { %7 = vrot.lane.b32.xlu0 %v47_v0, %s59_s10  ;;  %19 = vrot.lane.b32.xlu1 %v49_v1, %s60_s11  ;;  %s61_s14 = smov 32   ;;  %v48_v3 = vld [vmem:[%s99_s0 + $0x5] sm:$0x1]   ;;  %v50_v4 = vld [vmem:[%s99_s0 + $0x3] sm:$0x1]   ;;  %s62_s21 = smov 80  }
   0x3   :  { %31 = vrot.lane.b32.xlu2 %v51_v2, %s61_s14  ;;  %v52_v5 = vld [vmem:[%s99_s0 + $0x1] sm:$0x1]   ;;  %s63_s22 = smov 48   ;;  %s64_s23 = smov 16   ;;  %v2_v6 = vld [vmem:[%s99_s0] sm:$0x1]  }
   0x4   :  { %4 = vst.msk [vmem:[#allocation0] sm:$0x1] %vm3_vm0, %v2_v6   ;;  %vm27_vm4 = vcmask 523648   ;;  %vm33_vm5 = vcmask 392448   ;;  %vm39_vm6 = vcmask 261248  }
   0xa   :  { %13 = vrot.lane.b32.xlu0 %v48_v3, %s62_s21  ;;  %25 = vrot.lane.b32.xlu1 %v50_v4, %s63_s22 }
   0xb   :  { %37 = vrot.lane.b32.xlu2 %v52_v5, %s64_s23 }
  0x5d   :  { %v32_v7 = vpop.permute.xlu2 %31  }
  0x65   :  { %v38_v8 = vpop.permute.xlu2 %37  }
  0x74   :  { %v8_v9 = vpop.permute.xlu0 %7   ;;  %v20_v10 = vpop.permute.xlu1 %19  }
  0x75   :  { %10 = vst.msk [vmem:[#allocation0] sm:$0x1] %vm9_vm1, %v8_v9  }
  0x7c   :  { %v14_v11 = vpop.permute.xlu0 %13   ;;  %v26_v12 = vpop.permute.xlu1 %25  }
  0x7d   :  { %16 = vst.msk [vmem:[#allocation0] sm:$0x1] %vm15_vm2, %v14_v11  }
  0x7e   :  { %22 = vst.msk [vmem:[#allocation0] sm:$0x1] %vm21_vm3, %v20_v10  }
  0x7f   :  { %28 = vst.msk [vmem:[#allocation0] sm:$0x1] %vm27_vm4, %v26_v12  }
  0x80   :  { %34 = vst.msk [vmem:[#allocation0] sm:$0x1] %vm33_vm5, %v32_v7  }
  0x81   :  { %40 = vst.msk [vmem:[#allocation0] sm:$0x1] %vm39_vm6, %v38_v8  }
  0x88   :  { %v43_v13 = vld [vmem:[#allocation0] sm:$0x1] }
  0x89   :  { %46 = vst [vmem:[%s100_s1] sm:$0x1] %v43_v13 }

// kernel: tile.33
= control target key start
LH: loop header
LB: loop body
LE: loop exit
PB: predicated region body
PF: predicated region fallthrough
CT: control target
= control target key end

     0   :  { %s22_s0 = inlined_call_operand.vmem [shape: f32[32], index: 0, kind: input, shape index: {}]   ;;  %s23_s1 = inlined_call_operand.vmem [shape: f32[4,32], index: 1, kind: output, shape index: {}]  }
   0x1   :  { %v4_v0 = vld [vmem:[%s22_s0] ss:$0 sm:$0xff] }
   0x2   :  { %5 = vst [vmem:[%s23_s1] sm:$0xf] %v4_v0 }

// kernel: tile.34
= control target key start
LH: loop header
LB: loop body
LE: loop exit
PB: predicated region body
PF: predicated region fallthrough
CT: control target
= control target key end

     0   :  { %s37_s8 = smov 32   ;;  %s38_s9 = smov 64   ;;  %vm7_vm0 = vcmask 261120   ;;  %vm13_vm1 = vcmask 1048320   ;;  %vm19_vm2 = vcmask 785920   ;;  %vm25_vm3 = vcmask 523520   ;;  %s55_s0 = inlined_call_operand.vmem [shape: f32[4,32], index: 0, kind: input, shape index: {}]   ;;  %s56_s1 = inlined_call_operand.vmem [shape: f32[1,128], index: 1, kind: output, shape index: {}]  }
   0x1   :  { %v4_v0 = vld [vmem:[%s55_s0] sm:$0xf]  ;;  %s36_s0 = smov 96  }
   0x2   :  { %5 = vst [vmem:[#allocation1] sm:$0xf] %v4_v0 }
   0x9   :  { %v10_v1 = vld [vmem:[#allocation1 + $0x3] sm:$0x1]   ;;  %v22_v2 = vld [vmem:[#allocation1 + $0x1] sm:$0x1]   ;;  %v16_v3 = vld [vmem:[#allocation1 + $0x2] sm:$0x1]  }
   0xa   :  { %11 = vrot.lane.b32.xlu0 %v10_v1, %s36_s0  ;;  %23 = vrot.lane.b32.xlu1 %v22_v2, %s37_s8  ;;  %v6_v4 = vld [vmem:[#allocation1] sm:$0x1]  }
   0xb   :  { %8 = vst.msk [vmem:[#allocation0] sm:$0x1] %vm7_vm0, %v6_v4  }
  0x12   :  { %17 = vrot.lane.b32.xlu0 %v16_v3, %s38_s9 }
  0x7c   :  { %v12_v5 = vpop.permute.xlu0 %11   ;;  %v24_v6 = vpop.permute.xlu1 %23  }
  0x7d   :  { %14 = vst.msk [vmem:[#allocation0] sm:$0x1] %vm13_vm1, %v12_v5  }
  0x84   :  { %v18_v7 = vpop.permute.xlu0 %17  }
  0x85   :  { %20 = vst.msk [vmem:[#allocation0] sm:$0x1] %vm19_vm2, %v18_v7  }
  0x86   :  { %26 = vst.msk [vmem:[#allocation0] sm:$0x1] %vm25_vm3, %v24_v6  }
  0x8d   :  { %v29_v8 = vld [vmem:[#allocation0] sm:$0x1] }
  0x8e   :  { %32 = vst [vmem:[%s56_s1] sm:$0x1] %v29_v8 }

// kernel: conv_autoencoder_forward.1
= control target key start
LH: loop header
LB: loop body
LE: loop exit
PB: predicated region body
PF: predicated region fallthrough
CT: control target
= control target key end

     0   :  { %s4249_s0 = inlined_call_operand.vmem [shape: f32[64,32], index: 0, kind: input, shape index: {}]   ;;  %s4250_s1 = inlined_call_operand.vmem [shape: f32[3,32,64], index: 1, kind: input, shape index: {}]   ;;  %s4251_s2 = inlined_call_operand.vmem [shape: f32[3,32,256], index: 2, kind: input, shape index: {}]   ;;  %s4252_s3 = inlined_call_operand.vmem [shape: f32[1,256], index: 3, kind: input, shape index: {}]   ;;  %s4253_s4 = inlined_call_operand.vmem [shape: f32[2,16,32], index: 4, kind: input, shape index: {}]   ;;  %s4254_s5 = inlined_call_operand.vmem [shape: f32[2,256,128], index: 5, kind: input, shape index: {}]   ;;  %s4255_s6 = inlined_call_operand.vmem [shape: f32[3,8,16], index: 6, kind: input, shape index: {}]   ;;  %s4256_s7 = inlined_call_operand.vmem [shape: f32[3,128,128], index: 7, kind: input, shape index: {}]   ;;  %s4257_s8 = inlined_call_operand.vmem [shape: f32[1,128], index: 8, kind: input, shape index: {}]   ;;  %s4258_s9 = inlined_call_operand.vmem [shape: f32[2,6,8], index: 9, kind: input, shape index: {}]   ;;  %s4259_s10 = inlined_call_operand.vmem [shape: f32[2,128,96], index: 10, kind: input, shape index: {}]   ;;  %s4260_s11 = inlined_call_operand.vmem [shape: f32[3,14,6], index: 11, kind: input, shape index: {}]   ;;  %s4261_s12 = inlined_call_operand.vmem [shape: f32[3,96,112], index: 12, kind: input, shape index: {}]   ;;  %s4262_s13 = inlined_call_operand.vmem [shape: f32[1,112], index: 13, kind: input, shape index: {}]   ;;  %s4263_s14 = inlined_call_operand.vmem [shape: f32[3,30,14], index: 14, kind: input, shape index: {}]   ;;  %s4264_s15 = inlined_call_operand.vmem [shape: f32[3,112,120], index: 15, kind: input, shape index: {}]   ;;  %s4265_s16 = inlined_call_operand.vmem [shape: f32[1,120], index: 16, kind: input, shape index: {}]   ;;  %s4266_s17 = inlined_call_operand.vmem [shape: f32[4,64,30], index: 17, kind: input, shape index: {}]   ;;  %s4267_s18 = inlined_call_operand.vmem [shape: f32[4,120,32], index: 18, kind: input, shape index: {}]   ;;  %s4268_s19 = inlined_call_operand.vmem [shape: f32[1,32], index: 19, kind: input, shape index: {}]   ;;  %s4269_s20 = inlined_call_operand.hbm [shape: f32[64,32], index: 20, kind: output, shape index: {}]  }
   0x1   :  { %4274 = sst [smem:[#allocation5_spill]] %s4249_s0 }
   0x2   :  { %4275 = sst [smem:[#allocation6_spill]] %s4250_s1 }
   0x3   :  { %4276 = sst [smem:[#allocation7_spill]] %s4251_s2 }
   0x4   :  { %4277 = sst [smem:[#allocation8_spill]] %s4252_s3 }
   0x5   :  { %4278 = sst [smem:[#allocation9_spill]] %s4253_s4 }
   0x6   :  { %s4279_s23 = sld [smem:[#allocation5_spill]] }
   0xc   :  { %v73_v0 = vld [vmem:[%s4279_s23 + $0x38] sm:$0xff]  ;;  %v72_v1 = vld [vmem:[%s4279_s23 + $0x30] sm:$0xff]  ;;  %v71_v2 = vld [vmem:[%s4279_s23 + $0x28] sm:$0xff] }
   0xd   :  { %153 = vmatpush.msra.mxu1 %v73_v0  ;;  %99 = vmatpush.msra.mxu0 %v73_v0  ;;  %v70_v3 = vld [vmem:[%s4279_s23 + $0x20] sm:$0xff]  ;;  %v69_v4 = vld [vmem:[%s4279_s23 + $0x18] sm:$0xff] }
   0xf   :  { %154 = vmatpush.msra.mxu1 %v72_v1  ;;  %100 = vmatpush.msra.mxu0 %v72_v1 }
  0x11   :  { %155 = vmatpush.msra.mxu1 %v71_v2  ;;  %101 = vmatpush.msra.mxu0 %v71_v2 }
  0x12   :  { %25 = vsyncpa [#allocation3], 0  ;;  %v68_v5 = vld [vmem:[%s4279_s23 + $0x10] sm:$0xff]  ;;  %v67_v6 = vld [vmem:[%s4279_s23 + $0x8] sm:$0xff]  ;;  %vm78_vm0 = vcmask 523264   ;;  %s4280_s25 = sld [smem:[#allocation6_spill]] }
  0x13   :  { %156 = vmatpush.msra.mxu1 %v70_v3  ;;  %102 = vmatpush.msra.mxu0 %v70_v3  ;;  %v66_v7 = vld [vmem:[%s4279_s23] sm:$0xff]  ;;  %s4281_s23 = sld [smem:[#allocation7_spill]]  ;;  %vm183_vm1 = vcmask 261120   ;;  %vm752_vm2 = vcmask 130048   ;;  %vm944_vm3 = vcmask 64512   ;;  %vm1077_vm4 = vcmask 1045504  }
  0x14   :  { %s4282_s27 = sld [smem:[#allocation8_spill]]  ;;  %vm1070_vm5 = vcmask 48128   ;;  %vm1161_vm6 = vcmask 785408   ;;  %vm1308_vm7 = vcmask 113664   ;;  %vm1428_vm8 = vcmask 916480   ;;  %s2765_s1 = smov 128  }
  0x15   :  { %157 = vmatpush.msra.mxu1 %v69_v4  ;;  %103 = vmatpush.msra.mxu0 %v69_v4  ;;  %s4283_s29 = sld [smem:[#allocation9_spill]]  ;;  %vm1637_vm9 = vcmask 244736   ;;  %vm1811_vm10 = vcmask 982016   ;;  %s2766_s22 = smov 8  }
  0x17   :  { %158 = vmatpush.msra.mxu1 %v68_v5  ;;  %104 = vmatpush.msra.mxu0 %v68_v5 }
  0x18   :  { %v2318_v8 = vld [vmem:[%s4280_s25 + $0x20] sm:$0xff]  ;;  %v2319_v10 = vld [vmem:[%s4280_s25 + $0x28] sm:$0xff]  ;;  %v2320_v12 = vld [vmem:[%s4280_s25 + $0x30] sm:$0xff] }
  0x19   :  { %159 = vmatpush.msra.mxu1 %v67_v6  ;;  %105 = vmatpush.msra.mxu0 %v67_v6  ;;  %v74_v9 = vld [vmem:[%s4280_s25] sm:$0xff]  ;;  %v75_v11 = vld [vmem:[%s4280_s25 + $0x8] sm:$0xff]  ;;  %v76_v13 = vld [vmem:[%s4280_s25 + $0x10] sm:$0xff] }
  0x1a   :  { %v2321_v14 = vld [vmem:[%s4280_s25 + $0x38] sm:$0xff]  ;;  %v2332_v16 = vld [vmem:[%s4281_s23 + $0x70] sm:$0xff]  ;;  %v2330_v18 = vld [vmem:[%s4281_s23 + $0x60] sm:$0xff] }
  0x1b   :  { %160 = vmatpush.msra.mxu1 %v66_v7  ;;  %106 = vmatpush.msra.mxu0 %v66_v7  ;;  %v77_v15 = vld [vmem:[%s4280_s25 + $0x18] sm:$0xff]  ;;  %v2331_v19 = vld [vmem:[%s4281_s23 + $0x68] sm:$0xff]  ;;  %v2328_v20 = vld [vmem:[%s4281_s23 + $0x50] sm:$0xff] }
  0x1c   :  { %2322 = vmatmul.msk.f32.vlgmr.msra.gmra.mxu1 %vm78_vm0, %v2318_v8  ;;  %2314 = vmatmul.msk.f32.vlgmr.msra.gmra.mxu0 %vm78_vm0, %v74_v9  ;;  %v2333_v17 = vld [vmem:[%s4281_s23 + $0x78] sm:$0xff]  ;;  %v2350_v22 = vld [vmem:[%s4280_s25 + $0x40] sm:$0xff]  ;;  %v2351_v23 = vld [vmem:[%s4280_s25 + $0x48] sm:$0xff] }
  0x1d   :  { %349 = vmatpush.msrb.mxu0 %v73_v0  ;;  %208 = vmatpush.msra.mxu2 %v2332_v16  ;;  %v2329_v21 = vld [vmem:[%s4281_s23 + $0x58] sm:$0xff]  ;;  %v2352_v24 = vld [vmem:[%s4280_s25 + $0x50] sm:$0xff]  ;;  %v2326_v26 = vld [vmem:[%s4281_s23 + $0x40] sm:$0xff] }
  0x1e   :  { %237 = vmatpush.msra.mxu3 %v2333_v17  ;;  %v2353_v25 = vld [vmem:[%s4280_s25 + $0x58] sm:$0xff]  ;;  %v2327_v27 = vld [vmem:[%s4281_s23 + $0x48] sm:$0xff]  ;;  %v126_v28 = vld [vmem:[%s4281_s23 + $0x30] sm:$0xff] }
  0x1f   :  { %350 = vmatpush.msrb.mxu0 %v72_v1  ;;  %209 = vmatpush.msra.mxu2 %v2330_v18  ;;  %v127_v29 = vld [vmem:[%s4281_s23 + $0x38] sm:$0xff]  ;;  %v124_v30 = vld [vmem:[%s4281_s23 + $0x20] sm:$0xff]  ;;  %v125_v31 = vld [vmem:[%s4281_s23 + $0x28] sm:$0xff] }
  0x20   :  { %238 = vmatpush.msra.mxu3 %v2331_v19  ;;  %v122_v32 = vld [vmem:[%s4281_s23 + $0x10] sm:$0xff]  ;;  %v123_v33 = vld [vmem:[%s4281_s23 + $0x18] sm:$0xff]  ;;  %v120_v34 = vld [vmem:[%s4281_s23] sm:$0xff] }
  0x21   :  { %351 = vmatpush.msrb.mxu0 %v71_v2  ;;  %210 = vmatpush.msra.mxu2 %v2328_v20  ;;  %v121_v35 = vld [vmem:[%s4281_s23 + $0x8] sm:$0xff]  ;;  %v2364_v38 = vld [vmem:[%s4281_s23 + $0xb0] sm:$0xff]  ;;  %v2362_v39 = vld [vmem:[%s4281_s23 + $0xa0] sm:$0xff] }
  0x22   :  { %239 = vmatpush.msra.mxu3 %v2329_v21  ;;  %403 = vmatpush.msrb.mxu1 %v2364_v38  ;;  %v2360_v40 = vld [vmem:[%s4281_s23 + $0x90] sm:$0xff]  ;;  %v2358_v41 = vld [vmem:[%s4281_s23 + $0x80] sm:$0xff]  ;;  %v2365_v48 = vld [vmem:[%s4281_s23 + $0xb8] sm:$0xff] }
  0x23   :  { %352 = vmatpush.msrb.mxu0 %v70_v3  ;;  %211 = vmatpush.msra.mxu2 %v2326_v26  ;;  %v2363_v49 = vld [vmem:[%s4281_s23 + $0xa8] sm:$0xff]  ;;  %v2361_v50 = vld [vmem:[%s4281_s23 + $0x98] sm:$0xff]  ;;  %v3049_v9 = vld [vmem:[%s4282_s27] sm:$0x3] }
  0x24   :  { %2323 = vmatmul.msk.f32.gmra.mxu1 %vm78_vm0, %v2319_v10  ;;  %2315 = vmatmul.msk.f32.gmra.mxu0 %vm78_vm0, %v75_v11  ;;  %v2359_v51 = vld [vmem:[%s4281_s23 + $0x88] sm:$0xff] }
  0x25   :  { %353 = vmatpush.msrb.mxu0 %v69_v4  ;;  %240 = vmatpush.msra.mxu3 %v2327_v27  ;;  %v605_v38 = vld [vmem:[%s4254_s5 + $0x68] sm:$0xff] }
  0x26   :  { %278 = vmatpush.msrb.mxu2 %v126_v28  ;;  %404 = vmatpush.msrb.mxu1 %v2362_v39  ;;  %v2397_v39 = vld [vmem:[%s4254_s5 + $0x168] sm:$0xff] }
  0x27   :  { %354 = vmatpush.msrb.mxu0 %v68_v5  ;;  %307 = vmatpush.msrb.mxu3 %v127_v29  ;;  %v3055_v29 = vld [vmem:[%s4283_s29] sm:$0xff] }
  0x28   :  { %279 = vmatpush.msrb.mxu2 %v124_v30  ;;  %405 = vmatpush.msrb.mxu1 %v2360_v40 }
  0x29   :  { %355 = vmatpush.msrb.mxu0 %v67_v6  ;;  %308 = vmatpush.msrb.mxu3 %v125_v31 }
  0x2a   :  { %280 = vmatpush.msrb.mxu2 %v122_v32  ;;  %406 = vmatpush.msrb.mxu1 %v2358_v41  ;;  %v480_v32 = vld [vmem:[%s4283_s29 + $0x8] sm:$0xff]  ;;  %v604_v41 = vld [vmem:[%s4254_s5 + $0x60] sm:$0xff] }
  0x2b   :  { %356 = vmatpush.msrb.mxu0 %v66_v7  ;;  %309 = vmatpush.msrb.mxu3 %v123_v33 }
  0x2c   :  { %2324 = vmatmul.msk.f32.gmra.mxu1 %vm78_vm0, %v2320_v12  ;;  %2316 = vmatmul.msk.f32.gmra.mxu0 %vm78_vm0, %v76_v13 }
  0x2d   :  { %281 = vmatpush.msrb.mxu2 %v120_v34  ;;  %310 = vmatpush.msrb.mxu3 %v121_v35  ;;  %v607_v34 = vld [vmem:[%s4254_s5 + $0x78] sm:$0xff] }
  0x2e   :  { %v2399_v35 = vld [vmem:[%s4254_s5 + $0x178] sm:$0xff] }
  0x2f   :  { %703 = vmatpush.msra.mxu1 %v2399_v35  ;;  %v592_v35 = vld [vmem:[%s4254_s5] sm:$0xff] }
  0x34   :  { %2325 = vmatmul.msk.f32.gmra.mxu1 %vm78_vm0, %v2321_v14  ;;  %2317 = vmatmul.msk.f32.gmra.mxu0 %vm78_vm0, %v77_v15  ;;  %v459_v15 = vperm.slane %v3049_v9, 0 }
  0x3c   :  { %2354 = vmatmul.msk.f32.vlgmr.msrb.gmra.mxu0 %vm78_vm0, %v2350_v22 }
  0x44   :  { %2355 = vmatmul.msk.f32.gmra.mxu0 %vm78_vm0, %v2351_v23 }
  0x4c   :  { %2356 = vmatmul.msk.f32.gmra.mxu0 %vm78_vm0, %v2352_v24 }
  0x54   :  { %2357 = vmatmul.msk.f32.gmra.mxu0 %vm78_vm0, %v2353_v25 }
  0x99   :  { %v162_v36 = vpop.f32.mrf.mxu1  ;;  %v108_v37 = vpop.f32.mrf.mxu0 }
  0x9a   :  { %2334 = vmatmul.msk.f32.vlgmr.msra.gmra.mxu2 %vm183_vm1, %v162_v36  ;;  %2338 = vmatmul.msk.f32.vlgmr.msra.gmra.mxu3 %vm183_vm1, %v162_v36  ;;  %v606_v36 = vld [vmem:[%s4254_s5 + $0x70] sm:$0xff] }
  0x9b   :  { %432 = vmatpush.msra.mxu2 %v2365_v48 }
  0x9d   :  { %433 = vmatpush.msra.mxu2 %v2363_v49 }
  0x9f   :  { %434 = vmatpush.msra.mxu2 %v2361_v50 }
  0xa1   :  { %v165_v42 = vpop.f32.mrf.mxu1  ;;  %v111_v43 = vpop.f32.mrf.mxu0  ;;  %435 = vmatpush.msra.mxu2 %v2359_v51  ;;  %v602_v51 = vld [vmem:[%s4254_s5 + $0x50] sm:$0xff] }
  0xa2   :  { %2335 = vmatmul.msk.f32.gmra.mxu2 %vm183_vm1, %v165_v42  ;;  %2339 = vmatmul.msk.f32.gmra.mxu3 %vm183_vm1, %v165_v42  ;;  %v2396_v42 = vld [vmem:[%s4254_s5 + $0x160] sm:$0xff] }
  0xa9   :  { %v168_v44 = vpop.f32.mrf.mxu1  ;;  %v114_v45 = vpop.f32.mrf.mxu0 }
  0xaa   :  { %2336 = vmatmul.msk.f32.gmra.mxu2 %vm183_vm1, %v168_v44  ;;  %2340 = vmatmul.msk.f32.gmra.mxu3 %vm183_vm1, %v168_v44  ;;  %v2378_v44 = vld [vmem:[%s4283_s29 + $0x10] sm:$0xff] }
  0xb1   :  { %v171_v46 = vpop.f32.mrf.mxu1  ;;  %v117_v47 = vpop.f32.mrf.mxu0 }
  0xb2   :  { %2337 = vmatmul.msk.f32.gmra.mxu2 %vm183_vm1, %v171_v46  ;;  %2341 = vmatmul.msk.f32.gmra.mxu3 %vm183_vm1, %v171_v46  ;;  %v2395_v46 = vld [vmem:[%s4254_s5 + $0x158] sm:$0xff] }
  0xb9   :  { %v358_v52 = vpop.f32.mrf.mxu0 }
  0xba   :  { %2342 = vmatmul.msk.f32.vlgmr.msrb.gmra.mxu2 %vm183_vm1, %v108_v37  ;;  %2346 = vmatmul.msk.f32.vlgmr.msrb.gmra.mxu3 %vm183_vm1, %v108_v37  ;;  %v2398_v37 = vld [vmem:[%s4254_s5 + $0x170] sm:$0xff] }
  0xbb   :  { %2366 = vmatmul.msk.f32.vlgmr.msrb.gmra.mxu1 %vm183_vm1, %v358_v52  ;;  %624 = vmatpush.msrb.mxu2 %v607_v34  ;;  %v2409_v34 = vld [vmem:[%s4254_s5 + $0x1c8] sm:$0xff] }
  0xbc   :  { %704 = vmatpush.msra.mxu1 %v2398_v37  ;;  %v2384_v37 = vld [vmem:[%s4254_s5 + $0x100] sm:$0xff] }
  0xbd   :  { %625 = vmatpush.msrb.mxu2 %v606_v36  ;;  %v616_v36 = vld [vmem:[%s4254_s5 + $0xc0] sm:$0xff] }
  0xbe   :  { %705 = vmatpush.msra.mxu1 %v2397_v39  ;;  %v615_v39 = vld [vmem:[%s4254_s5 + $0xb8] sm:$0xff] }
  0xbf   :  { %626 = vmatpush.msrb.mxu2 %v605_v38  ;;  %v2408_v38 = vld [vmem:[%s4254_s5 + $0x1c0] sm:$0xff] }
  0xc0   :  { %706 = vmatpush.msra.mxu1 %v2396_v42  ;;  %v2406_v42 = vld [vmem:[%s4254_s5 + $0x1b0] sm:$0xff] }
  0xc1   :  { %v361_v53 = vpop.f32.mrf.mxu0  ;;  %627 = vmatpush.msrb.mxu2 %v604_v41  ;;  %v614_v41 = vld [vmem:[%s4254_s5 + $0xb0] sm:$0xff] }
  0xc2   :  { %2343 = vmatmul.msk.f32.gmra.mxu2 %vm183_vm1, %v111_v43  ;;  %2347 = vmatmul.msk.f32.gmra.mxu3 %vm183_vm1, %v111_v43 }
  0xc3   :  { %2367 = vmatmul.msk.f32.gmra.mxu1 %vm183_vm1, %v361_v53 }
  0xc4   :  { %707 = vmatpush.msra.mxu1 %v2395_v46  ;;  %v2404_v46 = vld [vmem:[%s4254_s5 + $0x1a0] sm:$0xff] }
  0xc9   :  { %v364_v54 = vpop.f32.mrf.mxu0 }
  0xca   :  { %2344 = vmatmul.msk.f32.gmra.mxu2 %vm183_vm1, %v114_v45  ;;  %2348 = vmatmul.msk.f32.gmra.mxu3 %vm183_vm1, %v114_v45  ;;  %v603_v45 = vld [vmem:[%s4254_s5 + $0x58] sm:$0xff] }
  0xcb   :  { %2368 = vmatmul.msk.f32.gmra.mxu1 %vm183_vm1, %v364_v54  ;;  %628 = vmatpush.msrb.mxu2 %v603_v45  ;;  %v612_v45 = vld [vmem:[%s4254_s5 + $0xa0] sm:$0xff] }
  0xcd   :  { %629 = vmatpush.msrb.mxu2 %v602_v51 }
  0xd1   :  { %v367_v55 = vpop.f32.mrf.mxu0 }
  0xd2   :  { %2345 = vmatmul.msk.f32.gmra.mxu2 %vm183_vm1, %v117_v47  ;;  %2349 = vmatmul.msk.f32.gmra.mxu3 %vm183_vm1, %v117_v47 }
  0xd3   :  { %2369 = vmatmul.msk.f32.gmra.mxu1 %vm183_vm1, %v367_v55 }
  0xda   :  { %2370 = vmatmul.msk.f32.vlgmr.msra.gmra.mxu2 %vm183_vm1, %v358_v52  ;;  %v2394_v52 = vld [vmem:[%s4254_s5 + $0x150] sm:$0xff] }
  0xdb   :  { %708 = vmatpush.msra.mxu1 %v2394_v52  ;;  %v609_v52 = vld [vmem:[%s4254_s5 + $0x88] sm:$0xff] }
  0xe2   :  { %2371 = vmatmul.msk.f32.gmra.mxu2 %vm183_vm1, %v361_v53 }
  0xea   :  { %2372 = vmatmul.msk.f32.gmra.mxu2 %vm183_vm1, %v364_v54  ;;  %v460_v54 = vperm.slane %v3049_v9, 1  ;;  %v2391_v9 = vld [vmem:[%s4254_s5 + $0x138] sm:$0xff] }
  0xf2   :  { %2373 = vmatmul.msk.f32.gmra.mxu2 %vm183_vm1, %v367_v55 }
 0x11d   :  { %v213_v56 = vpop.f32.mrf.mxu2  ;;  %v3040_v58 = vpop.f32.mrf.mxu3 }
 0x125   :  { %v216_v57 = vpop.f32.mrf.mxu2  ;;  %v3042_v60 = vpop.f32.mrf.mxu3 }
 0x12d   :  { %v219_v59 = vpop.f32.mrf.mxu2  ;;  %v248_v0 = vpop.f32.mrf.mxu3 }
 0x135   :  { %v222_v61 = vpop.f32.mrf.mxu2  ;;  %v251_v3 = vpop.f32.mrf.mxu3 }
 0x138   :  { %v408_v62 = vpop.f32.mrf.mxu1 }
 0x13d   :  { %v283_v63 = vpop.f32.mrf.mxu2  ;;  %v3044_v7 = vpop.f32.mrf.mxu3 }
 0x13e   :  { %v284_v12 = vadd.f32 %v283_v63, %v213_v56  ;;  %v313_v53 = vadd.f32 %v3044_v7, %v3040_v58  ;;  %v2379_v63 = vld [vmem:[%s4283_s29 + $0x18] sm:$0xff] }
 0x13f   :  { %v623_v7 = vld [vmem:[%s4254_s5 + $0xf8] sm:$0xff] }
 0x140   :  { %v411_v1 = vpop.f32.mrf.mxu1  ;;  %v449_v18 = vadd.f32 %v408_v62, %v284_v12  ;;  %v2414_v12 = vld [vmem:[%s4254_s5 + $0x1f0] sm:$0xff] }
 0x142   :  { %v463_v25 = vadd.f32 %v459_v15, %v449_v18  ;;  %v2413_v18 = vld [vmem:[%s4254_s5 + $0x1e8] sm:$0xff] }
 0x144   :  { %v471_v28 = vmax.f32 %v463_v25, 0.0  ;;  %v2387_v25 = vld [vmem:[%s4254_s5 + $0x118] sm:$0xff] }
 0x145   :  { %v286_v2 = vpop.f32.mrf.mxu2  ;;  %v315_v23 = vpop.f32.mrf.mxu3 }
 0x146   :  { %v287_v8 = vadd.f32 %v286_v2, %v216_v57  ;;  %v316_v47 = vadd.f32 %v315_v23, %v3042_v60  ;;  %v595_v23 = vld [vmem:[%s4254_s5 + $0x18] sm:$0xff] }
 0x148   :  { %v414_v4 = vpop.f32.mrf.mxu1  ;;  %v451_v16 = vadd.f32 %v411_v1, %v287_v8  ;;  %v599_v8 = vld [vmem:[%s4254_s5 + $0x38] sm:$0xff] }
 0x14a   :  { %v465_v21 = vadd.f32 %v459_v15, %v451_v16  ;;  %v621_v16 = vld [vmem:[%s4254_s5 + $0xe8] sm:$0xff] }
 0x14c   :  { %v473_v27 = vmax.f32 %v465_v21, 0.0  ;;  %v2388_v21 = vld [vmem:[%s4254_s5 + $0x120] sm:$0xff] }
 0x14d   :  { %v289_v5 = vpop.f32.mrf.mxu2  ;;  %v318_v31 = vpop.f32.mrf.mxu3 }
 0x14e   :  { %v290_v6 = vadd.f32 %v289_v5, %v219_v59  ;;  %v319_v43 = vadd.f32 %v318_v31, %v248_v0  ;;  %v600_v5 = vld [vmem:[%s4254_s5 + $0x40] sm:$0xff]  ;;  %v593_v31 = vld [vmem:[%s4254_s5 + $0x8] sm:$0xff] }
 0x150   :  { %v417_v11 = vpop.f32.mrf.mxu1  ;;  %v453_v13 = vadd.f32 %v414_v4, %v290_v6  ;;  %v2393_v4 = vld [vmem:[%s4254_s5 + $0x148] sm:$0xff]  ;;  %v2392_v6 = vld [vmem:[%s4254_s5 + $0x140] sm:$0xff] }
 0x151   :  { %709 = vmatpush.msra.mxu1 %v2393_v4  ;;  %v790_v4 = vld [vmem:[%s4256_s7 + $0x70] sm:$0xff] }
 0x152   :  { %v467_v19 = vadd.f32 %v459_v15, %v453_v13  ;;  %v598_v13 = vld [vmem:[%s4254_s5 + $0x30] sm:$0xff] }
 0x153   :  { %710 = vmatpush.msra.mxu1 %v2392_v6  ;;  %v2452_v6 = vld [vmem:[%s4256_s7 + $0x178] sm:$0xff] }
 0x154   :  { %v475_v26 = vmax.f32 %v467_v19, 0.0  ;;  %v596_v19 = vld [vmem:[%s4254_s5 + $0x20] sm:$0xff] }
 0x155   :  { %v292_v10 = vpop.f32.mrf.mxu2  ;;  %v321_v40 = vpop.f32.mrf.mxu3  ;;  %711 = vmatpush.msra.mxu1 %v2391_v9  ;;  %v2451_v9 = vld [vmem:[%s4256_s7 + $0x170] sm:$0xff] }
 0x156   :  { %v293_v14 = vadd.f32 %v292_v10, %v222_v61  ;;  %v322_v48 = vadd.f32 %v321_v40, %v251_v3  ;;  %v601_v3 = vld [vmem:[%s4254_s5 + $0x48] sm:$0xff]  ;;  %v2415_v10 = vld [vmem:[%s4254_s5 + $0x1f8] sm:$0xff] }
 0x157   :  { %630 = vmatpush.msrb.mxu2 %v601_v3  ;;  %v2407_v40 = vld [vmem:[%s4254_s5 + $0x1b8] sm:$0xff] }
 0x158   :  { %v455_v17 = vadd.f32 %v417_v11, %v293_v14  ;;  %v622_v11 = vld [vmem:[%s4254_s5 + $0xf0] sm:$0xff]  ;;  %v791_v3 = vld [vmem:[%s4256_s7 + $0x78] sm:$0xff] }
 0x159   :  { %631 = vmatpush.msrb.mxu2 %v600_v5  ;;  %v2390_v14 = vld [vmem:[%s4254_s5 + $0x130] sm:$0xff]  ;;  %v789_v5 = vld [vmem:[%s4256_s7 + $0x68] sm:$0xff] }
 0x15a   :  { %v469_v20 = vadd.f32 %v459_v15, %v455_v17  ;;  %712 = vmatpush.msra.mxu1 %v2390_v14  ;;  %v597_v15 = vld [vmem:[%s4254_s5 + $0x28] sm:$0xff]  ;;  %v2449_v14 = vld [vmem:[%s4256_s7 + $0x160] sm:$0xff] }
 0x15b   :  { %632 = vmatpush.msrb.mxu2 %v599_v8  ;;  %v2389_v17 = vld [vmem:[%s4254_s5 + $0x128] sm:$0xff]  ;;  %v788_v8 = vld [vmem:[%s4256_s7 + $0x60] sm:$0xff] }
 0x15c   :  { %v477_v22 = vmax.f32 %v469_v20, 0.0  ;;  %v620_v20 = vld [vmem:[%s4254_s5 + $0xe0] sm:$0xff]  ;;  %713 = vmatpush.msra.mxu1 %v2389_v17  ;;  %v2448_v17 = vld [vmem:[%s4256_s7 + $0x158] sm:$0xff] }
 0x15d   :  { %v437_v24 = vpop.f32.mrf.mxu2  ;;  %633 = vmatpush.msrb.mxu2 %v598_v13  ;;  %v787_v13 = vld [vmem:[%s4256_s7 + $0x58] sm:$0xff] }
 0x15e   :  { %499 = vmatpush.msra.mxu3 %v477_v22  ;;  %v450_v57 = vadd.f32 %v437_v24, %v313_v53  ;;  %v619_v24 = vld [vmem:[%s4254_s5 + $0xd8] sm:$0xff]  ;;  %714 = vmatpush.msra.mxu1 %v2388_v21  ;;  %v2401_v53 = vld [vmem:[%s4254_s5 + $0x188] sm:$0xff] }
 0x15f   :  { %634 = vmatpush.msrb.mxu2 %v597_v15  ;;  %v2446_v21 = vld [vmem:[%s4256_s7 + $0x148] sm:$0xff] }
 0x160   :  { %500 = vmatpush.msra.mxu3 %v475_v26  ;;  %v464_v0 = vadd.f32 %v460_v54, %v450_v57  ;;  %715 = vmatpush.msra.mxu1 %v2387_v25  ;;  %v2445_v25 = vld [vmem:[%s4256_s7 + $0x140] sm:$0xff] }
 0x161   :  { %635 = vmatpush.msrb.mxu2 %v596_v19  ;;  %v2447_v19 = vld [vmem:[%s4256_s7 + $0x150] sm:$0xff] }
 0x162   :  { %501 = vmatpush.msra.mxu3 %v473_v27  ;;  %v472_v2 = vmax.f32 %v464_v0, 0.0 }
 0x163   :  { %636 = vmatpush.msrb.mxu2 %v595_v23  ;;  %v783_v23 = vld [vmem:[%s4256_s7 + $0x38] sm:$0xff] }
 0x164   :  { %502 = vmatpush.msra.mxu3 %v471_v28 }
 0x165   :  { %v440_v30 = vpop.f32.mrf.mxu2  ;;  %2374 = vmatmul.msk.f32.vlgmr.msra.gmra.mxu3 %vm183_vm1, %v3055_v29 }
 0x166   :  { %554 = vmatpush.msrb.mxu3 %v477_v22  ;;  %v452_v55 = vadd.f32 %v440_v30, %v316_v47  ;;  %v2412_v22 = vld [vmem:[%s4254_s5 + $0x1e0] sm:$0xff]  ;;  %v2410_v30 = vld [vmem:[%s4254_s5 + $0x1d0] sm:$0xff]  ;;  %v611_v47 = vld [vmem:[%s4254_s5 + $0x98] sm:$0xff] }
 0x168   :  { %555 = vmatpush.msrb.mxu3 %v475_v26  ;;  %v466_v61 = vadd.f32 %v460_v54, %v452_v55  ;;  %v2411_v26 = vld [vmem:[%s4254_s5 + $0x1d8] sm:$0xff]  ;;  %v2400_v55 = vld [vmem:[%s4254_s5 + $0x180] sm:$0xff] }
 0x16a   :  { %556 = vmatpush.msrb.mxu3 %v473_v27  ;;  %v474_v1 = vmax.f32 %v466_v61, 0.0  ;;  %v594_v27 = vld [vmem:[%s4254_s5 + $0x10] sm:$0xff] }
 0x16b   :  { %637 = vmatpush.msrb.mxu2 %v594_v27 }
 0x16c   :  { %557 = vmatpush.msrb.mxu3 %v471_v28  ;;  %v618_v28 = vld [vmem:[%s4254_s5 + $0xd0] sm:$0xff] }
 0x16d   :  { %v443_v33 = vpop.f32.mrf.mxu2  ;;  %2375 = vmatmul.msk.f32.gmra.mxu3 %vm183_vm1, %v480_v32  ;;  %638 = vmatpush.msrb.mxu2 %v593_v31 }
 0x16e   :  { %v454_v49 = vadd.f32 %v443_v33, %v319_v43  ;;  %v2385_v33 = vld [vmem:[%s4254_s5 + $0x108] sm:$0xff] }
 0x16f   :  { %639 = vmatpush.msrb.mxu2 %v592_v35  ;;  %v613_v43 = vld [vmem:[%s4254_s5 + $0xa8] sm:$0xff] }
 0x170   :  { %v468_v59 = vadd.f32 %v460_v54, %v454_v49  ;;  %v610_v49 = vld [vmem:[%s4254_s5 + $0x90] sm:$0xff]  ;;  %v781_v35 = vld [vmem:[%s4256_s7 + $0x28] sm:$0xff] }
 0x171   :  { %854 = vmatpush.msra.mxu2 %v791_v3  ;;  %v2437_v3 = vld [vmem:[%s4256_s7 + $0x100] sm:$0xff] }
 0x172   :  { %v476_v58 = vmax.f32 %v468_v59, 0.0 }
 0x173   :  { %855 = vmatpush.msra.mxu2 %v790_v4 }
 0x175   :  { %v446_v50 = vpop.f32.mrf.mxu2  ;;  %2380 = vmatmul.msk.f32.vlgmr.msrb.gmra.mxu3 %vm183_vm1, %v2378_v44  ;;  %856 = vmatpush.msra.mxu2 %v789_v5 }
 0x176   :  { %v456_v56 = vadd.f32 %v446_v50, %v322_v48  ;;  %v2403_v48 = vld [vmem:[%s4254_s5 + $0x198] sm:$0xff]  ;;  %v2402_v50 = vld [vmem:[%s4254_s5 + $0x190] sm:$0xff] }
 0x177   :  { %857 = vmatpush.msra.mxu2 %v788_v8  ;;  %v1008_v8 = vld [vmem:[%s4259_s10 + $0x70] sm:$0xff] }
 0x178   :  { %v470_v60 = vadd.f32 %v460_v54, %v456_v56  ;;  %v608_v54 = vld [vmem:[%s4254_s5 + $0x80] sm:$0xff] }
 0x179   :  { %858 = vmatpush.msra.mxu2 %v787_v13  ;;  %v1003_v13 = vld [vmem:[%s4259_s10 + $0x48] sm:$0xff] }
 0x17a   :  { %v478_v62 = vmax.f32 %v470_v60, 0.0 }
 0x17c   :  { %522 = vmatpush.msra.mxu0 %v478_v62  ;;  %577 = vmatpush.msra.mxu3 %v478_v62 }
 0x17d   :  { %2381 = vmatmul.msk.f32.gmra.mxu3 %vm183_vm1, %v2379_v63 }
 0x17e   :  { %523 = vmatpush.msra.mxu0 %v476_v58  ;;  %578 = vmatpush.msra.mxu3 %v476_v58 }
 0x180   :  { %524 = vmatpush.msra.mxu0 %v474_v1  ;;  %579 = vmatpush.msra.mxu3 %v474_v1 }
 0x182   :  { %525 = vmatpush.msra.mxu0 %v472_v2  ;;  %580 = vmatpush.msra.mxu3 %v472_v2 }
 0x183   :  { %2376 = vmatmul.msk.f32.vlgmr.msra.gmra.mxu0 %vm183_vm1, %v3055_v29  ;;  %v2386_v29 = vld [vmem:[%s4254_s5 + $0x110] sm:$0xff] }
 0x184   :  { %647 = vmatpush.msrb.mxu0 %v623_v7  ;;  %726 = vmatpush.msrb.mxu3 %v2415_v10 }
 0x185   :  { %2382 = vmatmul.msk.f32.vlgmr.msra.gmra.mxu3 %vm183_vm1, %v2378_v44  ;;  %716 = vmatpush.msra.mxu1 %v2386_v29  ;;  %v2405_v44 = vld [vmem:[%s4254_s5 + $0x1a8] sm:$0xff] }
 0x186   :  { %648 = vmatpush.msrb.mxu0 %v622_v11  ;;  %727 = vmatpush.msrb.mxu3 %v2414_v12  ;;  %v2450_v11 = vld [vmem:[%s4256_s7 + $0x168] sm:$0xff] }
 0x187   :  { %717 = vmatpush.msra.mxu1 %v2385_v33 }
 0x188   :  { %649 = vmatpush.msrb.mxu0 %v621_v16  ;;  %728 = vmatpush.msrb.mxu3 %v2413_v18  ;;  %v786_v16 = vld [vmem:[%s4256_s7 + $0x50] sm:$0xff]  ;;  %v785_v18 = vld [vmem:[%s4256_s7 + $0x48] sm:$0xff] }
 0x189   :  { %718 = vmatpush.msra.mxu1 %v2384_v37  ;;  %859 = vmatpush.msra.mxu2 %v786_v16 }
 0x18a   :  { %650 = vmatpush.msrb.mxu0 %v620_v20  ;;  %729 = vmatpush.msrb.mxu3 %v2412_v22  ;;  %v784_v20 = vld [vmem:[%s4256_s7 + $0x40] sm:$0xff] }
 0x18b   :  { %2377 = vmatmul.msk.f32.gmra.mxu0 %vm183_vm1, %v480_v32  ;;  %v617_v32 = vld [vmem:[%s4254_s5 + $0xc8] sm:$0xff]  ;;  %860 = vmatpush.msra.mxu2 %v785_v18 }
 0x18c   :  { %651 = vmatpush.msrb.mxu0 %v619_v24  ;;  %730 = vmatpush.msrb.mxu3 %v2411_v26 }
 0x18d   :  { %2383 = vmatmul.msk.f32.gmra.mxu3 %vm183_vm1, %v2379_v63  ;;  %861 = vmatpush.msra.mxu2 %v784_v20 }
 0x18e   :  { %652 = vmatpush.msrb.mxu0 %v618_v28  ;;  %731 = vmatpush.msrb.mxu3 %v2410_v30  ;;  %v782_v28 = vld [vmem:[%s4256_s7 + $0x30] sm:$0xff] }
 0x18f   :  { %862 = vmatpush.msra.mxu2 %v783_v23 }
 0x190   :  { %653 = vmatpush.msrb.mxu0 %v617_v32  ;;  %732 = vmatpush.msrb.mxu3 %v2409_v34  ;;  %v2444_v32 = vld [vmem:[%s4256_s7 + $0x138] sm:$0xff] }
 0x191   :  { %863 = vmatpush.msra.mxu2 %v782_v28  ;;  %v2469_v28 = vld [vmem:[%s4259_s10 + $0xe8] sm:$0xff] }
 0x192   :  { %654 = vmatpush.msrb.mxu0 %v616_v36  ;;  %733 = vmatpush.msrb.mxu3 %v2408_v38  ;;  %v2443_v36 = vld [vmem:[%s4256_s7 + $0x130] sm:$0xff]  ;;  %v751_v38 = vld [vmem:[%s4255_s6] sm:$0xff] }
 0x193   :  { %864 = vmatpush.msra.mxu2 %v781_v35  ;;  %v2463_v35 = vld [vmem:[%s4259_s10 + $0xb8] sm:$0xff] }
 0x194   :  { %655 = vmatpush.msrb.mxu0 %v615_v39  ;;  %734 = vmatpush.msrb.mxu3 %v2407_v40  ;;  %v2417_v39 = vld [vmem:[%s4255_s6 + $0x8] sm:$0xff]  ;;  %v2434_v40 = vld [vmem:[%s4256_s7 + $0xf8] sm:$0xff] }
 0x196   :  { %656 = vmatpush.msrb.mxu0 %v614_v41  ;;  %735 = vmatpush.msrb.mxu3 %v2406_v42  ;;  %v780_v41 = vld [vmem:[%s4256_s7 + $0x20] sm:$0xff]  ;;  %v2442_v42 = vld [vmem:[%s4256_s7 + $0x128] sm:$0xff] }
 0x197   :  { %865 = vmatpush.msra.mxu2 %v780_v41  ;;  %v997_v41 = vld [vmem:[%s4259_s10 + $0x18] sm:$0xff] }
 0x198   :  { %657 = vmatpush.msrb.mxu0 %v613_v43  ;;  %736 = vmatpush.msrb.mxu3 %v2405_v44  ;;  %v2433_v43 = vld [vmem:[%s4256_s7 + $0xf0] sm:$0xff]  ;;  %v779_v44 = vld [vmem:[%s4256_s7 + $0x18] sm:$0xff] }
 0x199   :  { %866 = vmatpush.msra.mxu2 %v779_v44  ;;  %v2458_v44 = vld [vmem:[%s4259_s10 + $0x90] sm:$0xff] }
 0x19a   :  { %658 = vmatpush.msrb.mxu0 %v612_v45  ;;  %737 = vmatpush.msrb.mxu3 %v2404_v46  ;;  %v2432_v45 = vld [vmem:[%s4256_s7 + $0xe8] sm:$0xff]  ;;  %v778_v46 = vld [vmem:[%s4256_s7 + $0x10] sm:$0xff] }
 0x19b   :  { %867 = vmatpush.msra.mxu2 %v778_v46  ;;  %v2457_v46 = vld [vmem:[%s4259_s10 + $0x88] sm:$0xff] }
 0x19c   :  { %659 = vmatpush.msrb.mxu0 %v611_v47  ;;  %738 = vmatpush.msrb.mxu3 %v2403_v48  ;;  %v2431_v47 = vld [vmem:[%s4256_s7 + $0xe0] sm:$0xff]  ;;  %v2435_v48 = vld [vmem:[%s4255_s6 + $0x10] sm:$0xff] }
 0x19e   :  { %660 = vmatpush.msrb.mxu0 %v610_v49  ;;  %739 = vmatpush.msrb.mxu3 %v2402_v50  ;;  %v777_v49 = vld [vmem:[%s4256_s7 + $0x8] sm:$0xff]  ;;  %v2430_v50 = vld [vmem:[%s4256_s7 + $0xd8] sm:$0xff] }
 0x19f   :  { %868 = vmatpush.msra.mxu2 %v777_v49 }
 0x1a0   :  { %661 = vmatpush.msrb.mxu0 %v609_v52  ;;  %740 = vmatpush.msrb.mxu3 %v2401_v53  ;;  %v2428_v52 = vld [vmem:[%s4256_s7 + $0xc8] sm:$0xff]  ;;  %v2427_v53 = vld [vmem:[%s4256_s7 + $0xc0] sm:$0xff] }
 0x1a2   :  { %662 = vmatpush.msrb.mxu0 %v608_v54  ;;  %741 = vmatpush.msrb.mxu3 %v2400_v55  ;;  %v2426_v54 = vld [vmem:[%s4256_s7 + $0xb8] sm:$0xff]  ;;  %v2425_v55 = vld [vmem:[%s4256_s7 + $0xb0] sm:$0xff] }
 0x1a4   :  { %916 = vmatpush.msra.mxu3 %v2452_v6 }
 0x1a6   :  { %917 = vmatpush.msra.mxu3 %v2451_v9  ;;  %v1007_v9 = vld [vmem:[%s4259_s10 + $0x68] sm:$0xff] }
 0x1a8   :  { %918 = vmatpush.msra.mxu3 %v2450_v11  ;;  %v1005_v11 = vld [vmem:[%s4259_s10 + $0x58] sm:$0xff] }
 0x1aa   :  { %919 = vmatpush.msra.mxu3 %v2449_v14 }
 0x1ac   :  { %920 = vmatpush.msra.mxu3 %v2448_v17  ;;  %v1001_v17 = vld [vmem:[%s4259_s10 + $0x38] sm:$0xff] }
 0x1ae   :  { %921 = vmatpush.msra.mxu3 %v2447_v19  ;;  %v2718_v19 = vld [vmem:[%s4257_s8] ss:$0 sm:$0xff] }
 0x1b0   :  { %922 = vmatpush.msra.mxu3 %v2446_v21  ;;  %v1000_v21 = vld [vmem:[%s4259_s10 + $0x30] sm:$0xff] }
 0x1b2   :  { %923 = vmatpush.msra.mxu3 %v2445_v25  ;;  %v943_v25 = vld [vmem:[%s4258_s9] sm:$0x3f] }
 0x1b4   :  { %924 = vmatpush.msra.mxu3 %v2444_v32  ;;  %v2466_v32 = vld [vmem:[%s4259_s10 + $0xd0] sm:$0xff] }
 0x1b6   :  { %925 = vmatpush.msra.mxu3 %v2443_v36  ;;  %v2462_v36 = vld [vmem:[%s4259_s10 + $0xb0] sm:$0xff] }
 0x1b8   :  { %926 = vmatpush.msra.mxu3 %v2442_v42  ;;  %v2459_v42 = vld [vmem:[%s4259_s10 + $0x98] sm:$0xff] }
 0x1e8   :  { %v504_v51 = vpop.f32.mrf.mxu3 }
 0x1f0   :  { %v507_v56 = vpop.f32.mrf.mxu3 }
 0x1f8   :  { %v559_v57 = vpop.f32.mrf.mxu3 }
 0x1f9   :  { %v588_v59 = vmax.f32 %v504_v51, %v559_v57  ;;  %v2429_v51 = vld [vmem:[%s4256_s7 + $0xd0] sm:$0xff]  ;;  %v2423_v57 = vld [vmem:[%s4256_s7 + $0xa0] sm:$0xff] }
 0x1fb   :  { %640 = vmatmul.f32.vlgmr.msrb.gmra.mxu2 %v588_v59  ;;  %719 = vmatmul.f32.vlgmr.msra.gmra.mxu1 %v588_v59  ;;  %v2422_v59 = vld [vmem:[%s4256_s7 + $0x98] sm:$0xff] }
 0x200   :  { %v562_v60 = vpop.f32.mrf.mxu3  ;;  %v527_v62 = vpop.f32.mrf.mxu0 }
 0x201   :  { %v590_v61 = vmax.f32 %v507_v56, %v562_v60  ;;  %v2424_v56 = vld [vmem:[%s4256_s7 + $0xa8] sm:$0xff]  ;;  %v2421_v60 = vld [vmem:[%s4256_s7 + $0x90] sm:$0xff] }
 0x203   :  { %643 = vmatmul.f32.gmra.mxu2 %v590_v61  ;;  %722 = vmatmul.f32.gmra.mxu1 %v590_v61  ;;  %v2420_v61 = vld [vmem:[%s4256_s7 + $0x88] sm:$0xff] }
 0x208   :  { %v582_v63 = vpop.f32.mrf.mxu3  ;;  %v530_v58 = vpop.f32.mrf.mxu0 }
 0x209   :  { %v589_v0 = vmax.f32 %v527_v62, %v582_v63  ;;  %v2419_v62 = vld [vmem:[%s4256_s7 + $0x80] sm:$0xff] }
 0x20a   :  { %v776_v63 = vld [vmem:[%s4256_s7] sm:$0xff] }
 0x20b   :  { %663 = vmatmul.f32.vlgmr.msrb.gmra.mxu0 %v589_v0  ;;  %742 = vmatmul.f32.vlgmr.msrb.gmra.mxu3 %v589_v0  ;;  %v2441_v0 = vld [vmem:[%s4256_s7 + $0x120] sm:$0xff] }
 0x20c   :  { %869 = vmatpush.msra.mxu2 %v776_v63  ;;  %927 = vmatpush.msra.mxu3 %v2441_v0  ;;  %v1068_v63 = vld [vmem:[%s4260_s11] sm:$0xff]  ;;  %v2475_v0 = vld [vmem:[%s4260_s11 + $0x10] sm:$0xff] }
 0x210   :  { %v585_v1 = vpop.f32.mrf.mxu3 }
 0x211   :  { %v591_v2 = vmax.f32 %v530_v58, %v585_v1  ;;  %v2440_v58 = vld [vmem:[%s4256_s7 + $0x118] sm:$0xff]  ;;  %v2439_v1 = vld [vmem:[%s4256_s7 + $0x110] sm:$0xff] }
 0x212   :  { %928 = vmatpush.msra.mxu3 %v2440_v58  ;;  %v2496_v58 = vld [vmem:[%s4260_s11 + $0x20] sm:$0xff] }
 0x213   :  { %666 = vmatmul.f32.gmra.mxu0 %v591_v2  ;;  %745 = vmatmul.f32.gmra.mxu3 %v591_v2  ;;  %v2438_v2 = vld [vmem:[%s4256_s7 + $0x108] sm:$0xff] }
 0x214   :  { %929 = vmatpush.msra.mxu3 %v2439_v1  ;;  %v2491_v1 = vld [vmem:[%s4261_s12 + $0xb8] sm:$0xff] }
 0x216   :  { %930 = vmatpush.msra.mxu3 %v2438_v2  ;;  %v1115_v2 = vld [vmem:[%s4261_s12 + $0x58] sm:$0xff] }
 0x218   :  { %931 = vmatpush.msra.mxu3 %v2437_v3  ;;  %v2490_v3 = vld [vmem:[%s4261_s12 + $0xb0] sm:$0xff] }
 0x278   :  { %v720_v10 = vpop.f32.mrf.mxu1 }
 0x27e   :  { %v641_v12 = vpop.f32.mrf.mxu2 }
 0x280   :  { %v723_v24 = vpop.f32.mrf.mxu1 }
 0x286   :  { %v644_v26 = vpop.f32.mrf.mxu2 }
 0x288   :  { %v664_v7 = vpop.f32.mrf.mxu0 }
 0x289   :  { %v665_v33 = vadd.f32 %v664_v7, %v641_v12  ;;  %v1009_v7 = vld [vmem:[%s4259_s10 + $0x78] sm:$0xff]  ;;  %v1004_v12 = vld [vmem:[%s4259_s10 + $0x50] sm:$0xff] }
 0x28e   :  { %v743_v15 = vpop.f32.mrf.mxu3 }
 0x28f   :  { %v744_v29 = vadd.f32 %v743_v15, %v720_v10  ;;  %v1006_v10 = vld [vmem:[%s4259_s10 + $0x60] sm:$0xff] }
 0x290   :  { %v667_v22 = vpop.f32.mrf.mxu0  ;;  %v1002_v15 = vld [vmem:[%s4259_s10 + $0x40] sm:$0xff] }
 0x291   :  { %v668_v30 = vadd.f32 %v667_v22, %v644_v26  ;;  %v749_v37 = vmax.f32 %v665_v33, %v744_v29  ;;  %v2471_v26 = vld [vmem:[%s4259_s10 + $0xf8] sm:$0xff]  ;;  %v2454_v29 = vld [vmem:[%s4258_s9 + $0x8] sm:$0x3f] }
 0x292   :  { %v2465_v33 = vld [vmem:[%s4259_s10 + $0xc8] sm:$0xff] }
 0x296   :  { %v746_v27 = vpop.f32.mrf.mxu3 }
 0x297   :  { %v747_v31 = vadd.f32 %v746_v27, %v723_v24  ;;  %v2470_v27 = vld [vmem:[%s4259_s10 + $0xf0] sm:$0xff] }
 0x299   :  { %v750_v34 = vmax.f32 %v668_v30, %v747_v31  ;;  %v2468_v30 = vld [vmem:[%s4259_s10 + $0xe0] sm:$0xff]  ;;  %v2467_v31 = vld [vmem:[%s4259_s10 + $0xd8] sm:$0xff] }
 0x29b   :  { %770 = vmatpush.msrb.mxu1 %v750_v34  ;;  %811 = vmatpush.msra.mxu0 %v750_v34 }
 0x29d   :  { %771 = vmatpush.msrb.mxu1 %v749_v37  ;;  %812 = vmatpush.msra.mxu0 %v749_v37 }
 0x29e   :  { %2416 = vmatmul.msk.f32.vlgmr.msrb.gmra.mxu1 %vm752_vm2, %v751_v38  ;;  %2418 = vmatmul.msk.f32.vlgmr.msra.gmra.mxu0 %vm752_vm2, %v2417_v39  ;;  %v2461_v38 = vld [vmem:[%s4259_s10 + $0xa8] sm:$0xff]  ;;  %v998_v39 = vld [vmem:[%s4259_s10 + $0x20] sm:$0xff] }
 0x29f   :  { %893 = vmatpush.msrb.mxu0 %v750_v34  ;;  %834 = vmatpush.msra.mxu1 %v2434_v40  ;;  %v2464_v34 = vld [vmem:[%s4259_s10 + $0xc0] sm:$0xff] }
 0x2a0   :  { %v2460_v40 = vld [vmem:[%s4259_s10 + $0xa0] sm:$0xff] }
 0x2a1   :  { %894 = vmatpush.msrb.mxu0 %v749_v37  ;;  %835 = vmatpush.msra.mxu1 %v2433_v43  ;;  %v999_v37 = vld [vmem:[%s4259_s10 + $0x28] sm:$0xff]  ;;  %v996_v43 = vld [vmem:[%s4259_s10 + $0x10] sm:$0xff] }
 0x2a3   :  { %836 = vmatpush.msra.mxu1 %v2432_v45  ;;  %v995_v45 = vld [vmem:[%s4259_s10 + $0x8] sm:$0xff] }
 0x2a5   :  { %837 = vmatpush.msra.mxu1 %v2431_v47  ;;  %v994_v47 = vld [vmem:[%s4259_s10] sm:$0xff] }
 0x2a6   :  { %2436 = vmatmul.msk.f32.vlgmr.msrb.gmra.mxu0 %vm752_vm2, %v2435_v48  ;;  %v2456_v48 = vld [vmem:[%s4259_s10 + $0x80] sm:$0xff] }
 0x2a7   :  { %838 = vmatpush.msra.mxu1 %v2430_v50 }
 0x2a9   :  { %839 = vmatpush.msra.mxu1 %v2429_v51 }
 0x2ab   :  { %840 = vmatpush.msra.mxu1 %v2428_v52  ;;  %v2512_v52 = vld [vmem:[%s4261_s12 + $0x118] sm:$0xff] }
 0x2ad   :  { %841 = vmatpush.msra.mxu1 %v2427_v53  ;;  %v2511_v53 = vld [vmem:[%s4261_s12 + $0x110] sm:$0xff] }
 0x2af   :  { %842 = vmatpush.msra.mxu1 %v2426_v54  ;;  %v2510_v54 = vld [vmem:[%s4261_s12 + $0x108] sm:$0xff] }
 0x2b1   :  { %843 = vmatpush.msra.mxu1 %v2425_v55  ;;  %v2509_v55 = vld [vmem:[%s4261_s12 + $0x100] sm:$0xff] }
 0x2b3   :  { %844 = vmatpush.msra.mxu1 %v2424_v56  ;;  %v2508_v56 = vld [vmem:[%s4261_s12 + $0xf8] sm:$0xff] }
 0x2b5   :  { %845 = vmatpush.msra.mxu1 %v2423_v57  ;;  %v2507_v57 = vld [vmem:[%s4261_s12 + $0xf0] sm:$0xff] }
 0x2b7   :  { %846 = vmatpush.msra.mxu1 %v2422_v59  ;;  %v2506_v59 = vld [vmem:[%s4261_s12 + $0xe8] sm:$0xff] }
 0x2b9   :  { %847 = vmatpush.msra.mxu1 %v2421_v60 }
 0x2bb   :  { %848 = vmatpush.msra.mxu1 %v2420_v61 }
 0x2bd   :  { %849 = vmatpush.msra.mxu1 %v2419_v62 }
 0x2bf   :  { %1010 = vmatpush.msrb.mxu1 %v1009_v7  ;;  %v1069_v7 = vld [vmem:[%s4260_s11 + $0x8] sm:$0x3f] }
 0x2c1   :  { %1011 = vmatpush.msrb.mxu1 %v1008_v8  ;;  %v1112_v8 = vld [vmem:[%s4261_s12 + $0x40] sm:$0xff] }
 0x2c3   :  { %1012 = vmatpush.msrb.mxu1 %v1007_v9  ;;  %v2476_v9 = vld [vmem:[%s4260_s11 + $0x18] sm:$0x3f] }
 0x2c5   :  { %1013 = vmatpush.msrb.mxu1 %v1006_v10  ;;  %v2497_v10 = vld [vmem:[%s4260_s11 + $0x28] sm:$0x3f] }
 0x2c7   :  { %1014 = vmatpush.msrb.mxu1 %v1005_v11  ;;  %v2488_v11 = vld [vmem:[%s4261_s12 + $0xa0] sm:$0xff] }
 0x2c9   :  { %1015 = vmatpush.msrb.mxu1 %v1004_v12  ;;  %v1111_v12 = vld [vmem:[%s4261_s12 + $0x38] sm:$0xff] }
 0x2cb   :  { %1016 = vmatpush.msrb.mxu1 %v1003_v13  ;;  %v2487_v13 = vld [vmem:[%s4261_s12 + $0x98] sm:$0xff] }
 0x2cd   :  { %1017 = vmatpush.msrb.mxu1 %v1002_v15  ;;  %v2486_v15 = vld [vmem:[%s4261_s12 + $0x90] sm:$0xff] }
 0x2cf   :  { %1018 = vmatpush.msrb.mxu1 %v1001_v17  ;;  %v2485_v17 = vld [vmem:[%s4261_s12 + $0x88] sm:$0xff] }
 0x2d1   :  { %1019 = vmatpush.msrb.mxu1 %v1000_v21  ;;  %v2483_v21 = vld [vmem:[%s4261_s12 + $0x78] sm:$0xff] }
 0x2d3   :  { %1020 = vmatpush.msrb.mxu1 %v999_v37 }
 0x2d5   :  { %1021 = vmatpush.msrb.mxu1 %v998_v39 }
 0x2d7   :  { %1022 = vmatpush.msrb.mxu1 %v997_v41 }
 0x2d9   :  { %1023 = vmatpush.msrb.mxu1 %v996_v43 }
 0x2db   :  { %1024 = vmatpush.msrb.mxu1 %v995_v45 }
 0x2dd   :  { %1025 = vmatpush.msrb.mxu1 %v994_v47  ;;  %v2719_v47 = vld [vmem:[%s4262_s13] ss:$0 sm:$0xff] }
 0x31b   :  { %v773_v4 = vpop.f32.mrf.mxu1  ;;  %v814_v5 = vpop.f32.mrf.mxu0 }
 0x31c   :  { %850 = vmatmul.f32.vlgmr.msra.gmra.mxu1 %v814_v5  ;;  %870 = vmatmul.f32.vlgmr.msra.gmra.mxu2 %v773_v4  ;;  %v1114_v4 = vld [vmem:[%s4261_s12 + $0x50] sm:$0xff]  ;;  %v2489_v5 = vld [vmem:[%s4261_s12 + $0xa8] sm:$0xff] }
 0x323   :  { %v896_v6 = vpop.f32.mrf.mxu0 }
 0x324   :  { %932 = vmatmul.f32.vlgmr.msra.gmra.mxu3 %v896_v6  ;;  %v1113_v6 = vld [vmem:[%s4261_s12 + $0x48] sm:$0xff] }
 0x399   :  { %v851_v16 = vpop.f32.mrf.mxu1 }
 0x39f   :  { %v871_v14 = vpop.f32.mrf.mxu2 }
 0x3a0   :  { %v872_v18 = vadd.f32 %v871_v14, %v851_v16  ;;  %v1110_v14 = vld [vmem:[%s4261_s12 + $0x30] sm:$0xff]  ;;  %v1109_v16 = vld [vmem:[%s4261_s12 + $0x28] sm:$0xff] }
 0x3a7   :  { %v933_v20 = vpop.f32.mrf.mxu3 }
 0x3a8   :  { %v936_v22 = vadd.f32 %v933_v20, %v872_v18  ;;  %v1108_v18 = vld [vmem:[%s4261_s12 + $0x20] sm:$0xff]  ;;  %v1107_v20 = vld [vmem:[%s4261_s12 + $0x18] sm:$0xff] }
 0x3aa   :  { %v941_v23 = vadd.f32 %v2718_v19, %v936_v22  ;;  %v2484_v19 = vld [vmem:[%s4261_s12 + $0x80] sm:$0xff]  ;;  %v1106_v22 = vld [vmem:[%s4261_s12 + $0x10] sm:$0xff] }
 0x3ac   :  { %v942_v24 = vmax.f32 %v941_v23, 0.0  ;;  %v2482_v23 = vld [vmem:[%s4261_s12 + $0x70] sm:$0xff] }
 0x3ae   :  { %963 = vmatpush.msra.mxu0 %v942_v24 }
 0x3af   :  { %2453 = vmatmul.msk.f32.vlgmr.msra.gmra.mxu0 %vm944_vm3, %v943_v25  ;;  %v2481_v25 = vld [vmem:[%s4261_s12 + $0x68] sm:$0xff] }
 0x3b0   :  { %988 = vmatpush.msrb.mxu0 %v942_v24  ;;  %v1105_v24 = vld [vmem:[%s4261_s12 + $0x8] sm:$0xff] }
 0x3b2   :  { %1047 = vmatpush.msra.mxu0 %v2471_v26  ;;  %v2480_v26 = vld [vmem:[%s4261_s12 + $0x60] sm:$0xff] }
 0x3b4   :  { %1048 = vmatpush.msra.mxu0 %v2470_v27  ;;  %v1104_v27 = vld [vmem:[%s4261_s12] sm:$0xff] }
 0x3b6   :  { %1049 = vmatpush.msra.mxu0 %v2469_v28  ;;  %v2505_v28 = vld [vmem:[%s4261_s12 + $0xe0] sm:$0xff] }
 0x3b7   :  { %2455 = vmatmul.msk.f32.vlgmr.msrb.gmra.mxu0 %vm944_vm3, %v2454_v29  ;;  %v2504_v29 = vld [vmem:[%s4261_s12 + $0xd8] sm:$0xff] }
 0x3b8   :  { %1050 = vmatpush.msra.mxu0 %v2468_v30  ;;  %v2503_v30 = vld [vmem:[%s4261_s12 + $0xd0] sm:$0xff] }
 0x3ba   :  { %1051 = vmatpush.msra.mxu0 %v2467_v31  ;;  %v2502_v31 = vld [vmem:[%s4261_s12 + $0xc8] sm:$0xff] }
 0x3bc   :  { %1052 = vmatpush.msra.mxu0 %v2466_v32  ;;  %v2501_v32 = vld [vmem:[%s4261_s12 + $0xc0] sm:$0xff] }
 0x3be   :  { %1053 = vmatpush.msra.mxu0 %v2465_v33 }
 0x3c0   :  { %1054 = vmatpush.msra.mxu0 %v2464_v34 }
 0x3c2   :  { %1055 = vmatpush.msra.mxu0 %v2463_v35 }
 0x3c4   :  { %1056 = vmatpush.msra.mxu0 %v2462_v36 }
 0x3c6   :  { %1057 = vmatpush.msra.mxu0 %v2461_v38 }
 0x3c8   :  { %1058 = vmatpush.msra.mxu0 %v2460_v40 }
 0x3ca   :  { %1059 = vmatpush.msra.mxu0 %v2459_v42 }
 0x3cc   :  { %1060 = vmatpush.msra.mxu0 %v2458_v44 }
 0x3ce   :  { %1061 = vmatpush.msra.mxu0 %v2457_v46 }
 0x3d0   :  { %1062 = vmatpush.msra.mxu0 %v2456_v48 }
 0x3d2   :  { %1275 = vmatpush.msrb.mxu0 %v2512_v52  ;;  %v2542_v52 = vld [vmem:[%s4264_s15 + $0xd8] sm:$0xff] }
 0x3d4   :  { %1276 = vmatpush.msrb.mxu0 %v2511_v53  ;;  %v2541_v53 = vld [vmem:[%s4264_s15 + $0xd0] sm:$0xff] }
 0x3d6   :  { %1277 = vmatpush.msrb.mxu0 %v2510_v54 }
 0x3d8   :  { %1278 = vmatpush.msrb.mxu0 %v2509_v55  ;;  %v2540_v55 = vld [vmem:[%s4264_s15 + $0xc8] sm:$0xff] }
 0x3da   :  { %1279 = vmatpush.msrb.mxu0 %v2508_v56 }
 0x3dc   :  { %1280 = vmatpush.msrb.mxu0 %v2507_v57  ;;  %v2520_v57 = vld [vmem:[%s4263_s14 + $0x20] sm:$0xff] }
 0x3de   :  { %1281 = vmatpush.msrb.mxu0 %v2506_v59  ;;  %v2551_v59 = vld [vmem:[%s4263_s14 + $0x40] sm:$0xff] }
 0x3e0   :  { %1282 = vmatpush.msrb.mxu0 %v2505_v28  ;;  %v2565_v28 = vld [vmem:[%s4264_s15 + $0x108] sm:$0xff] }
 0x3e2   :  { %1283 = vmatpush.msrb.mxu0 %v2504_v29  ;;  %v2530_v29 = vld [vmem:[%s4264_s15 + $0x78] sm:$0xff] }
 0x3e4   :  { %1284 = vmatpush.msrb.mxu0 %v2503_v30  ;;  %v1357_v30 = vld [vmem:[%s4264_s15 + $0x20] sm:$0xff] }
 0x3e6   :  { %1285 = vmatpush.msrb.mxu0 %v2502_v31  ;;  %v2523_v31 = vld [vmem:[%s4263_s14 + $0x38] sm:$0x3f] }
 0x3e8   :  { %1286 = vmatpush.msrb.mxu0 %v2501_v32  ;;  %v2554_v32 = vld [vmem:[%s4263_s14 + $0x58] sm:$0x3f] }
 0x42c   :  { %v965_v49 = vpop.f32.mrf.mxu0 }
 0x434   :  { %v990_v50 = vpop.f32.mrf.mxu0 }
 0x435   :  { %v993_v51 = vmax.f32 %v965_v49, %v990_v50 }
 0x437   :  { %1026 = vmatmul.f32.vlgmr.msrb.gmra.mxu1 %v993_v51  ;;  %1063 = vmatmul.f32.vlgmr.msra.gmra.mxu0 %v993_v51 }
 0x4b4   :  { %v1027_v60 = vpop.f32.mrf.mxu1  ;;  %v1064_v61 = vpop.f32.mrf.mxu0 }
 0x4b5   :  { %v1067_v62 = vmax.f32 %v1027_v60, %v1064_v61  ;;  %v1304_v60 = vld [vmem:[%s4263_s14] sm:$0xff]  ;;  %v2573_v61 = vld [vmem:[%s4264_s15 + $0x148] sm:$0xff] }
 0x4b7   :  { %2472 = vmatpush.msk.msrb.mxu2 %vm1077_vm4, %v1067_v62  ;;  %2477 = vmatpush.msk.msrb.mxu3 %vm1077_vm4, %v1067_v62 }
 0x4b8   :  { %2498 = vmatpush.msk.msra.mxu1 %vm1077_vm4, %v1067_v62  ;;  %2473 = vmatmul.msk.f32.vlgmr.msrb.gmra.mxu2 %vm1070_vm5, %v1068_v63  ;;  %v2539_v62 = vld [vmem:[%s4264_s15 + $0xc0] sm:$0xff]  ;;  %v1366_v63 = vld [vmem:[%s4264_s15 + $0x68] sm:$0xff] }
 0x4b9   :  { %2478 = vmatmul.msk.f32.vlgmr.msrb.gmra.mxu3 %vm1070_vm5, %v2475_v0  ;;  %2499 = vmatmul.msk.f32.vlgmr.msra.gmra.mxu1 %vm1070_vm5, %v2496_v58  ;;  %v2572_v0 = vld [vmem:[%s4264_s15 + $0x140] sm:$0xff]  ;;  %v2538_v58 = vld [vmem:[%s4264_s15 + $0xb8] sm:$0xff] }
 0x4ba   :  { %1172 = vmatpush.msra.mxu2 %v2491_v1  ;;  %1201 = vmatpush.msra.mxu3 %v1115_v2  ;;  %v1365_v1 = vld [vmem:[%s4264_s15 + $0x60] sm:$0xff]  ;;  %v2571_v2 = vld [vmem:[%s4264_s15 + $0x138] sm:$0xff] }
 0x4bc   :  { %1173 = vmatpush.msra.mxu2 %v2490_v3  ;;  %1202 = vmatpush.msra.mxu3 %v1114_v4  ;;  %v2537_v3 = vld [vmem:[%s4264_s15 + $0xb0] sm:$0xff]  ;;  %v1364_v4 = vld [vmem:[%s4264_s15 + $0x58] sm:$0xff] }
 0x4be   :  { %1174 = vmatpush.msra.mxu2 %v2489_v5  ;;  %1203 = vmatpush.msra.mxu3 %v1113_v6  ;;  %v2521_v5 = vld [vmem:[%s4263_s14 + $0x28] sm:$0xff] }
 0x4bf   :  { %v2536_v6 = vld [vmem:[%s4264_s15 + $0xa8] sm:$0xff] }
 0x4c0   :  { %2474 = vmatmul.msk.f32.gmra.mxu2 %vm1070_vm5, %v1069_v7  ;;  %1204 = vmatpush.msra.mxu3 %v1112_v8  ;;  %v2552_v7 = vld [vmem:[%s4263_s14 + $0x48] sm:$0xff] }
 0x4c1   :  { %2479 = vmatmul.msk.f32.gmra.mxu3 %vm1070_vm5, %v2476_v9  ;;  %2500 = vmatmul.msk.f32.gmra.mxu1 %vm1070_vm5, %v2497_v10  ;;  %v1305_v8 = vld [vmem:[%s4263_s14 + $0x8] sm:$0xff]  ;;  %v2570_v9 = vld [vmem:[%s4264_s15 + $0x130] sm:$0xff] }
 0x4c2   :  { %1175 = vmatpush.msra.mxu2 %v2488_v11  ;;  %1205 = vmatpush.msra.mxu3 %v1111_v12  ;;  %v1363_v10 = vld [vmem:[%s4264_s15 + $0x50] sm:$0xff]  ;;  %v2535_v11 = vld [vmem:[%s4264_s15 + $0xa0] sm:$0xff]  ;;  %v2569_v12 = vld [vmem:[%s4264_s15 + $0x128] sm:$0xff] }
 0x4c4   :  { %1176 = vmatpush.msra.mxu2 %v2487_v13  ;;  %1206 = vmatpush.msra.mxu3 %v1110_v14  ;;  %v1362_v13 = vld [vmem:[%s4264_s15 + $0x48] sm:$0xff]  ;;  %v2534_v14 = vld [vmem:[%s4264_s15 + $0x98] sm:$0xff] }
 0x4c6   :  { %1177 = vmatpush.msra.mxu2 %v2486_v15  ;;  %1207 = vmatpush.msra.mxu3 %v1109_v16  ;;  %v2568_v15 = vld [vmem:[%s4264_s15 + $0x120] sm:$0xff] }
 0x4c7   :  { %v1361_v16 = vld [vmem:[%s4264_s15 + $0x40] sm:$0xff] }
 0x4c8   :  { %1178 = vmatpush.msra.mxu2 %v2485_v17  ;;  %1208 = vmatpush.msra.mxu3 %v1108_v18  ;;  %v2533_v17 = vld [vmem:[%s4264_s15 + $0x90] sm:$0xff] }
 0x4c9   :  { %v2522_v18 = vld [vmem:[%s4263_s14 + $0x30] sm:$0xff] }
 0x4ca   :  { %1179 = vmatpush.msra.mxu2 %v2484_v19  ;;  %1209 = vmatpush.msra.mxu3 %v1107_v20  ;;  %v1360_v19 = vld [vmem:[%s4264_s15 + $0x38] sm:$0xff]  ;;  %v2553_v20 = vld [vmem:[%s4263_s14 + $0x50] sm:$0xff] }
 0x4cc   :  { %1180 = vmatpush.msra.mxu2 %v2483_v21  ;;  %1210 = vmatpush.msra.mxu3 %v1106_v22  ;;  %v1306_v21 = vld [vmem:[%s4263_s14 + $0x10] sm:$0xff]  ;;  %v2567_v22 = vld [vmem:[%s4264_s15 + $0x118] sm:$0xff] }
 0x4ce   :  { %1181 = vmatpush.msra.mxu2 %v2482_v23  ;;  %1211 = vmatpush.msra.mxu3 %v1105_v24  ;;  %v2532_v23 = vld [vmem:[%s4264_s15 + $0x88] sm:$0xff]  ;;  %v1359_v24 = vld [vmem:[%s4264_s15 + $0x30] sm:$0xff] }
 0x4d0   :  { %1182 = vmatpush.msra.mxu2 %v2481_v25  ;;  %1212 = vmatpush.msra.mxu3 %v1104_v27  ;;  %v2566_v25 = vld [vmem:[%s4264_s15 + $0x110] sm:$0xff]  ;;  %v1358_v27 = vld [vmem:[%s4264_s15 + $0x28] sm:$0xff] }
 0x4d2   :  { %1183 = vmatpush.msra.mxu2 %v2480_v26  ;;  %1443 = vmatpush.msrb.mxu3 %v2542_v52  ;;  %v2531_v26 = vld [vmem:[%s4264_s15 + $0x80] sm:$0xff] }
 0x4d4   :  { %1444 = vmatpush.msrb.mxu3 %v2541_v53 }
 0x4d6   :  { %1445 = vmatpush.msrb.mxu3 %v2540_v55 }
 0x4d8   :  { %1446 = vmatpush.msrb.mxu3 %v2539_v62  ;;  %v2613_v62 = vld [vmem:[%s4267_s18 + $0xc0] sm:$0xff] }
 0x4da   :  { %1447 = vmatpush.msrb.mxu3 %v2538_v58  ;;  %v2610_v58 = vld [vmem:[%s4267_s18 + $0xa8] sm:$0xff] }
 0x4dc   :  { %1448 = vmatpush.msrb.mxu3 %v2537_v3  ;;  %v2608_v3 = vld [vmem:[%s4267_s18 + $0x98] sm:$0xff] }
 0x4de   :  { %1449 = vmatpush.msrb.mxu3 %v2536_v6  ;;  %v2606_v6 = vld [vmem:[%s4267_s18 + $0x88] sm:$0xff] }
 0x4e0   :  { %1450 = vmatpush.msrb.mxu3 %v2535_v11 }
 0x4e2   :  { %1451 = vmatpush.msrb.mxu3 %v2534_v14 }
 0x4e4   :  { %1452 = vmatpush.msrb.mxu3 %v2533_v17 }
 0x4e6   :  { %1453 = vmatpush.msrb.mxu3 %v2532_v23 }
 0x4e8   :  { %1454 = vmatpush.msrb.mxu3 %v2531_v26 }
 0x4ea   :  { %1455 = vmatpush.msrb.mxu3 %v2530_v29 }
 0x536   :  { %v1246_v33 = vpop.f32.mrf.mxu1 }
 0x537   :  { %2513 = vmatmul.msk.f32.vlgmr.msrb.gmra.mxu0 %vm1161_vm6, %v1246_v33  ;;  %v1307_v33 = vld [vmem:[%s4263_s14 + $0x18] sm:$0x3f] }
 0x53b   :  { %v1098_v34 = vpop.f32.mrf.mxu2 }
 0x53c   :  { %v1142_v35 = vpop.f32.mrf.mxu3  ;;  %2494 = vmatmul.msk.f32.vlgmr.msra.gmra.mxu3 %vm1161_vm6, %v1098_v34  ;;  %v2564_v34 = vld [vmem:[%s4264_s15 + $0x100] sm:$0xff] }
 0x53d   :  { %2492 = vmatmul.msk.f32.vlgmr.msra.gmra.mxu2 %vm1161_vm6, %v1142_v35  ;;  %v2563_v35 = vld [vmem:[%s4264_s15 + $0xf8] sm:$0xff] }
 0x53e   :  { %v1249_v36 = vpop.f32.mrf.mxu1 }
 0x53f   :  { %2514 = vmatmul.msk.f32.gmra.mxu0 %vm1161_vm6, %v1249_v36  ;;  %v2562_v36 = vld [vmem:[%s4264_s15 + $0xf0] sm:$0xff] }
 0x543   :  { %v1101_v37 = vpop.f32.mrf.mxu2 }
 0x544   :  { %v1145_v38 = vpop.f32.mrf.mxu3  ;;  %2495 = vmatmul.msk.f32.gmra.mxu3 %vm1161_vm6, %v1101_v37  ;;  %v2529_v37 = vld [vmem:[%s4264_s15 + $0x70] sm:$0xff] }
 0x545   :  { %2493 = vmatmul.msk.f32.gmra.mxu2 %vm1161_vm6, %v1145_v38  ;;  %v1356_v38 = vld [vmem:[%s4264_s15 + $0x18] sm:$0xff]  ;;  %1456 = vmatpush.msrb.mxu3 %v2529_v37  ;;  %v2587_v37 = vld [vmem:[%s4266_s17 + $0x40] sm:$0xff] }
 0x5b4   :  { %v1288_v39 = vpop.f32.mrf.mxu0 }
 0x5bc   :  { %v1291_v45 = vpop.f32.mrf.mxu0 }
 0x5bf   :  { %v1214_v40 = vpop.f32.mrf.mxu3 }
 0x5c0   :  { %v1185_v41 = vpop.f32.mrf.mxu2 }
 0x5c1   :  { %v1215_v42 = vadd.f32 %v1214_v40, %v1185_v41  ;;  %v1355_v40 = vld [vmem:[%s4264_s15 + $0x10] sm:$0xff]  ;;  %v2560_v41 = vld [vmem:[%s4264_s15 + $0xe0] sm:$0xff] }
 0x5c3   :  { %v1294_v46 = vadd.f32 %v1288_v39, %v1215_v42  ;;  %v2561_v39 = vld [vmem:[%s4264_s15 + $0xe8] sm:$0xff] }
 0x5c4   :  { %v1354_v42 = vld [vmem:[%s4264_s15 + $0x8] sm:$0xff] }
 0x5c5   :  { %v1300_v50 = vadd.f32 %v2719_v47, %v1294_v46 }
 0x5c7   :  { %v1217_v43 = vpop.f32.mrf.mxu3  ;;  %v1302_v56 = vmax.f32 %v1300_v50, 0.0 }
 0x5c8   :  { %v1188_v44 = vpop.f32.mrf.mxu2 }
 0x5c9   :  { %v1218_v48 = vadd.f32 %v1217_v43, %v1188_v44  ;;  %v1353_v43 = vld [vmem:[%s4264_s15] sm:$0xff] }
 0x5cb   :  { %v1295_v49 = vadd.f32 %v1291_v45, %v1218_v48 }
 0x5cd   :  { %v1301_v51 = vadd.f32 %v2719_v47, %v1295_v49 }
 0x5cf   :  { %v1303_v54 = vmax.f32 %v1301_v51, 0.0 }
 0x5d1   :  { %2515 = vmatpush.msk.msrb.mxu1 %vm1077_vm4, %v1303_v54  ;;  %2524 = vmatpush.msk.msrb.mxu2 %vm1077_vm4, %v1303_v54 }
 0x5d2   :  { %2555 = vmatpush.msk.msra.mxu0 %vm1077_vm4, %v1303_v54 }
 0x5d3   :  { %1339 = vmatpush.msrb.mxu1 %v1302_v56  ;;  %1399 = vmatpush.msrb.mxu2 %v1302_v56 }
 0x5d4   :  { %1543 = vmatpush.msra.mxu0 %v1302_v56  ;;  %2525 = vmatmul.msk.f32.vlgmr.msrb.gmra.mxu2 %vm1308_vm7, %v2520_v57  ;;  %v2618_v56 = vld [vmem:[%s4267_s18 + $0xe8] sm:$0xff]  ;;  %v2617_v57 = vld [vmem:[%s4267_s18 + $0xe0] sm:$0xff] }
 0x5d5   :  { %2556 = vmatmul.msk.f32.vlgmr.msra.gmra.mxu0 %vm1308_vm7, %v2551_v59  ;;  %2516 = vmatmul.msk.f32.vlgmr.msrb.gmra.mxu1 %vm1308_vm7, %v1304_v60  ;;  %v2616_v59 = vld [vmem:[%s4267_s18 + $0xd8] sm:$0xff]  ;;  %v2615_v60 = vld [vmem:[%s4267_s18 + $0xd0] sm:$0xff] }
 0x5d6   :  { %1586 = vmatpush.msra.mxu2 %v2573_v61  ;;  %1484 = vmatpush.msra.mxu1 %v1366_v63  ;;  %v2614_v61 = vld [vmem:[%s4267_s18 + $0xc8] sm:$0xff]  ;;  %v2612_v63 = vld [vmem:[%s4267_s18 + $0xb8] sm:$0xff] }
 0x5d8   :  { %1587 = vmatpush.msra.mxu2 %v2572_v0  ;;  %1485 = vmatpush.msra.mxu1 %v1365_v1  ;;  %v2611_v0 = vld [vmem:[%s4267_s18 + $0xb0] sm:$0xff]  ;;  %v2609_v1 = vld [vmem:[%s4267_s18 + $0xa0] sm:$0xff] }
 0x5da   :  { %1588 = vmatpush.msra.mxu2 %v2571_v2  ;;  %1486 = vmatpush.msra.mxu1 %v1364_v4  ;;  %v2607_v4 = vld [vmem:[%s4267_s18 + $0x90] sm:$0xff] }
 0x5dc   :  { %2526 = vmatmul.msk.f32.gmra.mxu2 %vm1308_vm7, %v2521_v5  ;;  %1487 = vmatpush.msra.mxu1 %v1363_v10 }
 0x5dd   :  { %2557 = vmatmul.msk.f32.gmra.mxu0 %vm1308_vm7, %v2552_v7  ;;  %2517 = vmatmul.msk.f32.gmra.mxu1 %vm1308_vm7, %v1305_v8  ;;  %v2605_v7 = vld [vmem:[%s4267_s18 + $0x80] sm:$0xff]  ;;  %v2604_v8 = vld [vmem:[%s4267_s18 + $0x78] sm:$0xff] }
 0x5de   :  { %1589 = vmatpush.msra.mxu2 %v2570_v9  ;;  %1488 = vmatpush.msra.mxu1 %v1362_v13 }
 0x5e0   :  { %1590 = vmatpush.msra.mxu2 %v2569_v12  ;;  %1489 = vmatpush.msra.mxu1 %v1361_v16 }
 0x5e2   :  { %1591 = vmatpush.msra.mxu2 %v2568_v15  ;;  %1490 = vmatpush.msra.mxu1 %v1360_v19 }
 0x5e4   :  { %2527 = vmatmul.msk.f32.gmra.mxu2 %vm1308_vm7, %v2522_v18  ;;  %1491 = vmatpush.msra.mxu1 %v1359_v24  ;;  %v2720_v24 = vld [vmem:[%s4265_s16] ss:$0 sm:$0xff] }
 0x5e5   :  { %2558 = vmatmul.msk.f32.gmra.mxu0 %vm1308_vm7, %v2553_v20  ;;  %2518 = vmatmul.msk.f32.gmra.mxu1 %vm1308_vm7, %v1306_v21 }
 0x5e6   :  { %1592 = vmatpush.msra.mxu2 %v2567_v22  ;;  %1492 = vmatpush.msra.mxu1 %v1358_v27 }
 0x5e8   :  { %1593 = vmatpush.msra.mxu2 %v2566_v25  ;;  %1493 = vmatpush.msra.mxu1 %v1357_v30 }
 0x5ea   :  { %1594 = vmatpush.msra.mxu2 %v2565_v28  ;;  %1494 = vmatpush.msra.mxu1 %v1356_v38  ;;  %v1630_v38 = vld [vmem:[%s4266_s17 + $0x8] sm:$0xff] }
 0x5ec   :  { %2528 = vmatmul.msk.f32.gmra.mxu2 %vm1308_vm7, %v2523_v31  ;;  %1495 = vmatpush.msra.mxu1 %v1355_v40  ;;  %v1631_v40 = vld [vmem:[%s4266_s17 + $0x10] sm:$0xff] }
 0x5ed   :  { %2559 = vmatmul.msk.f32.gmra.mxu0 %vm1308_vm7, %v2554_v32  ;;  %2519 = vmatmul.msk.f32.gmra.mxu1 %vm1308_vm7, %v1307_v33 }
 0x5ee   :  { %1595 = vmatpush.msra.mxu2 %v2564_v34  ;;  %1496 = vmatpush.msra.mxu1 %v1354_v42  ;;  %v1632_v42 = vld [vmem:[%s4266_s17 + $0x18] sm:$0xff] }
 0x5f0   :  { %1596 = vmatpush.msra.mxu2 %v2563_v35  ;;  %1497 = vmatpush.msra.mxu1 %v1353_v43  ;;  %v2590_v43 = vld [vmem:[%s4266_s17 + $0x58] sm:$0xff] }
 0x5f2   :  { %1597 = vmatpush.msra.mxu2 %v2562_v36  ;;  %1837 = vmatpush.msrb.mxu1 %v2618_v56  ;;  %v1629_v36 = vld [vmem:[%s4266_s17] sm:$0xff] }
 0x5f3   :  { %v1718_v56 = vld [vmem:[%s4267_s18 + $0x60] sm:$0xff] }
 0x5f4   :  { %1598 = vmatpush.msra.mxu2 %v2561_v39  ;;  %1838 = vmatpush.msrb.mxu1 %v2617_v57  ;;  %v2588_v39 = vld [vmem:[%s4266_s17 + $0x48] sm:$0xff]  ;;  %v2637_v57 = vld [vmem:[%s4266_s17 + $0x90] sm:$0xff] }
 0x5f6   :  { %1599 = vmatpush.msra.mxu2 %v2560_v41  ;;  %1839 = vmatpush.msrb.mxu1 %v2616_v59  ;;  %v2589_v41 = vld [vmem:[%s4266_s17 + $0x50] sm:$0xff]  ;;  %v1717_v59 = vld [vmem:[%s4267_s18 + $0x58] sm:$0xff] }
 0x5f8   :  { %1840 = vmatpush.msrb.mxu1 %v2615_v60  ;;  %v1716_v60 = vld [vmem:[%s4267_s18 + $0x50] sm:$0xff] }
 0x5fa   :  { %1841 = vmatpush.msrb.mxu1 %v2614_v61  ;;  %v1715_v61 = vld [vmem:[%s4267_s18 + $0x48] sm:$0xff] }
 0x5fc   :  { %1842 = vmatpush.msrb.mxu1 %v2613_v62  ;;  %v1714_v62 = vld [vmem:[%s4267_s18 + $0x40] sm:$0xff] }
 0x5fe   :  { %1843 = vmatpush.msrb.mxu1 %v2612_v63  ;;  %v2638_v63 = vld [vmem:[%s4266_s17 + $0x98] sm:$0xff] }
 0x600   :  { %1844 = vmatpush.msrb.mxu1 %v2611_v0  ;;  %v1713_v0 = vld [vmem:[%s4267_s18 + $0x38] sm:$0xff] }
 0x602   :  { %1845 = vmatpush.msrb.mxu1 %v2610_v58  ;;  %v1712_v58 = vld [vmem:[%s4267_s18 + $0x30] sm:$0xff] }
 0x604   :  { %1846 = vmatpush.msrb.mxu1 %v2609_v1  ;;  %v1711_v1 = vld [vmem:[%s4267_s18 + $0x28] sm:$0xff] }
 0x606   :  { %1847 = vmatpush.msrb.mxu1 %v2608_v3  ;;  %v2639_v3 = vld [vmem:[%s4266_s17 + $0xa0] sm:$0xff] }
 0x608   :  { %1848 = vmatpush.msrb.mxu1 %v2607_v4  ;;  %v1709_v4 = vld [vmem:[%s4267_s18 + $0x18] sm:$0xff] }
 0x60a   :  { %1849 = vmatpush.msrb.mxu1 %v2606_v6  ;;  %v1707_v6 = vld [vmem:[%s4267_s18 + $0x8] sm:$0xff] }
 0x60c   :  { %1850 = vmatpush.msrb.mxu1 %v2605_v7  ;;  %v1706_v7 = vld [vmem:[%s4267_s18] sm:$0xff] }
 0x60e   :  { %1851 = vmatpush.msrb.mxu1 %v2604_v8  ;;  %v2640_v8 = vld [vmem:[%s4266_s17 + $0xa8] sm:$0xff] }
 0x652   :  { %v1545_v44 = vpop.f32.mrf.mxu0  ;;  %v1341_v45 = vpop.f32.mrf.mxu1 }
 0x653   :  { %2574 = vmatmul.msk.f32.vlgmr.msra.gmra.mxu2 %vm1428_vm8, %v1545_v44  ;;  %2547 = vmatmul.msk.f32.vlgmr.msra.gmra.mxu1 %vm1428_vm8, %v1341_v45  ;;  %v1633_v44 = vld [vmem:[%s4266_s17 + $0x20] sm:$0xff] }
 0x654   :  { %v2591_v45 = vld [vmem:[%s4266_s17 + $0x60] sm:$0xff] }
 0x657   :  { %v1401_v46 = vpop.f32.mrf.mxu2 }
 0x658   :  { %2543 = vmatmul.msk.f32.vlgmr.msrb.gmra.mxu3 %vm1428_vm8, %v1401_v46  ;;  %v1634_v46 = vld [vmem:[%s4266_s17 + $0x28] sm:$0xff] }
 0x65a   :  { %v1548_v47 = vpop.f32.mrf.mxu0  ;;  %v1344_v48 = vpop.f32.mrf.mxu1 }
 0x65b   :  { %2575 = vmatmul.msk.f32.gmra.mxu2 %vm1428_vm8, %v1548_v47  ;;  %2548 = vmatmul.msk.f32.gmra.mxu1 %vm1428_vm8, %v1344_v48  ;;  %v2592_v47 = vld [vmem:[%s4266_s17 + $0x68] sm:$0xff]  ;;  %v1635_v48 = vld [vmem:[%s4266_s17 + $0x30] sm:$0xff] }
 0x65f   :  { %v1404_v49 = vpop.f32.mrf.mxu2 }
 0x660   :  { %2544 = vmatmul.msk.f32.gmra.mxu3 %vm1428_vm8, %v1404_v49  ;;  %v2593_v49 = vld [vmem:[%s4266_s17 + $0x70] sm:$0xff] }
 0x662   :  { %v1551_v50 = vpop.f32.mrf.mxu0  ;;  %v1347_v51 = vpop.f32.mrf.mxu1 }
 0x663   :  { %2576 = vmatmul.msk.f32.gmra.mxu2 %vm1428_vm8, %v1551_v50  ;;  %2549 = vmatmul.msk.f32.gmra.mxu1 %vm1428_vm8, %v1347_v51  ;;  %v1636_v50 = vld [vmem:[%s4266_s17 + $0x38] sm:$0xff] }
 0x664   :  { %v2594_v51 = vld [vmem:[%s4266_s17 + $0x78] sm:$0xff] }
 0x667   :  { %v1407_v52 = vpop.f32.mrf.mxu2 }
 0x668   :  { %2545 = vmatmul.msk.f32.gmra.mxu3 %vm1428_vm8, %v1407_v52  ;;  %v2635_v52 = vld [vmem:[%s4266_s17 + $0x80] sm:$0xff] }
 0x66a   :  { %v1554_v53 = vpop.f32.mrf.mxu0  ;;  %v1350_v54 = vpop.f32.mrf.mxu1 }
 0x66b   :  { %2577 = vmatmul.msk.f32.gmra.mxu2 %vm1428_vm8, %v1554_v53  ;;  %2550 = vmatmul.msk.f32.gmra.mxu1 %vm1428_vm8, %v1350_v54  ;;  %v2636_v53 = vld [vmem:[%s4266_s17 + $0x88] sm:$0xff]  ;;  %v1720_v54 = vld [vmem:[%s4267_s18 + $0x70] sm:$0xff] }
 0x66c   :  { %1902 = vmatpush.msrb.mxu2 %v1720_v54  ;;  %v2681_v54 = vld [vmem:[%s4266_s17 + $0xf0] sm:$0xff] }
 0x66f   :  { %v1410_v55 = vpop.f32.mrf.mxu2 }
 0x670   :  { %2546 = vmatmul.msk.f32.gmra.mxu3 %vm1428_vm8, %v1410_v55  ;;  %v1719_v55 = vld [vmem:[%s4267_s18 + $0x68] sm:$0xff] }
 0x671   :  { %1903 = vmatpush.msrb.mxu2 %v1719_v55 }
 0x673   :  { %1904 = vmatpush.msrb.mxu2 %v1718_v56  ;;  %v2682_v56 = vld [vmem:[%s4266_s17 + $0xf8] sm:$0xff] }
 0x675   :  { %1905 = vmatpush.msrb.mxu2 %v1717_v59  ;;  %v2705_v59 = vld [vmem:[%s4267_s18 + $0x1d0] sm:$0xff] }
 0x677   :  { %1906 = vmatpush.msrb.mxu2 %v1716_v60 }
 0x679   :  { %1907 = vmatpush.msrb.mxu2 %v1715_v61 }
 0x67b   :  { %1908 = vmatpush.msrb.mxu2 %v1714_v62  ;;  %v2704_v62 = vld [vmem:[%s4267_s18 + $0x1c8] sm:$0xff] }
 0x67d   :  { %1909 = vmatpush.msrb.mxu2 %v1713_v0 }
 0x67f   :  { %1910 = vmatpush.msrb.mxu2 %v1712_v58  ;;  %v2702_v58 = vld [vmem:[%s4267_s18 + $0x1b8] sm:$0xff] }
 0x681   :  { %1911 = vmatpush.msrb.mxu2 %v1711_v1  ;;  %v2701_v1 = vld [vmem:[%s4267_s18 + $0x1b0] sm:$0xff] }
 0x6d0   :  { %v1499_v2 = vpop.f32.mrf.mxu1 }
 0x6d6   :  { %v1601_v5 = vpop.f32.mrf.mxu2 }
 0x6d8   :  { %v1502_v10 = vpop.f32.mrf.mxu1 }
 0x6db   :  { %v1458_v9 = vpop.f32.mrf.mxu3 }
 0x6dc   :  { %v1500_v21 = vadd.f32 %v1499_v2, %v1458_v9  ;;  %v1710_v2 = vld [vmem:[%s4267_s18 + $0x20] sm:$0xff]  ;;  %v2641_v9 = vld [vmem:[%s4266_s17 + $0xb0] sm:$0xff] }
 0x6dd   :  { %1912 = vmatpush.msrb.mxu2 %v1710_v2  ;;  %v2700_v2 = vld [vmem:[%s4267_s18 + $0x1a8] sm:$0xff] }
 0x6de   :  { %v1604_v11 = vpop.f32.mrf.mxu2  ;;  %v1613_v27 = vadd.f32 %v1601_v5, %v1500_v21  ;;  %v1708_v5 = vld [vmem:[%s4267_s18 + $0x10] sm:$0xff]  ;;  %v2661_v21 = vld [vmem:[%s4267_s18 + $0x138] sm:$0xff] }
 0x6df   :  { %1913 = vmatpush.msrb.mxu2 %v1709_v4  ;;  %v2699_v4 = vld [vmem:[%s4267_s18 + $0x1a0] sm:$0xff] }
 0x6e0   :  { %v1505_v13 = vpop.f32.mrf.mxu1  ;;  %v1621_v32 = vadd.f32 %v2720_v24, %v1613_v27  ;;  %v2657_v27 = vld [vmem:[%s4267_s18 + $0x118] sm:$0xff] }
 0x6e1   :  { %1914 = vmatpush.msrb.mxu2 %v1708_v5  ;;  %v2698_v5 = vld [vmem:[%s4267_s18 + $0x198] sm:$0xff] }
 0x6e2   :  { %v1625_v35 = vmax.f32 %v1621_v32, 0.0  ;;  %v2654_v32 = vld [vmem:[%s4267_s18 + $0x100] sm:$0xff] }
 0x6e3   :  { %v1461_v12 = vpop.f32.mrf.mxu3  ;;  %1915 = vmatpush.msrb.mxu2 %v1707_v6  ;;  %v2697_v6 = vld [vmem:[%s4267_s18 + $0x190] sm:$0xff] }
 0x6e4   :  { %v1503_v18 = vadd.f32 %v1502_v10, %v1461_v12  ;;  %v2642_v10 = vld [vmem:[%s4266_s17 + $0xb8] sm:$0xff] }
 0x6e5   :  { %1916 = vmatpush.msrb.mxu2 %v1706_v7  ;;  %v2696_v7 = vld [vmem:[%s4267_s18 + $0x188] sm:$0xff] }
 0x6e6   :  { %v1607_v14 = vpop.f32.mrf.mxu2  ;;  %v1614_v25 = vadd.f32 %v1604_v11, %v1503_v18  ;;  %v2663_v18 = vld [vmem:[%s4267_s18 + $0x148] sm:$0xff] }
 0x6e8   :  { %v1508_v17 = vpop.f32.mrf.mxu1  ;;  %v1622_v30 = vadd.f32 %v2720_v24, %v1614_v25 }
 0x6ea   :  { %v1626_v34 = vmax.f32 %v1622_v30, 0.0  ;;  %v2655_v30 = vld [vmem:[%s4267_s18 + $0x108] sm:$0xff] }
 0x6eb   :  { %v1464_v15 = vpop.f32.mrf.mxu3 }
 0x6ec   :  { %v1506_v16 = vadd.f32 %v1505_v13, %v1464_v15  ;;  %v2665_v15 = vld [vmem:[%s4267_s18 + $0x158] sm:$0xff] }
 0x6ee   :  { %v1610_v20 = vpop.f32.mrf.mxu2  ;;  %v1615_v22 = vadd.f32 %v1607_v14, %v1506_v16  ;;  %v2666_v14 = vld [vmem:[%s4267_s18 + $0x160] sm:$0xff] }
 0x6f0   :  { %v1623_v28 = vadd.f32 %v2720_v24, %v1615_v22 }
 0x6f2   :  { %v1627_v33 = vmax.f32 %v1623_v28, 0.0 }
 0x6f3   :  { %v1467_v19 = vpop.f32.mrf.mxu3 }
 0x6f4   :  { %v1509_v23 = vadd.f32 %v1508_v17, %v1467_v19  ;;  %v2664_v17 = vld [vmem:[%s4267_s18 + $0x150] sm:$0xff] }
 0x6f6   :  { %v1616_v26 = vadd.f32 %v1610_v20, %v1509_v23  ;;  %v2662_v20 = vld [vmem:[%s4267_s18 + $0x140] sm:$0xff]  ;;  %v2660_v23 = vld [vmem:[%s4267_s18 + $0x130] sm:$0xff] }
 0x6f8   :  { %v1624_v29 = vadd.f32 %v2720_v24, %v1616_v26  ;;  %v2659_v24 = vld [vmem:[%s4267_s18 + $0x128] sm:$0xff]  ;;  %v2658_v26 = vld [vmem:[%s4267_s18 + $0x120] sm:$0xff] }
 0x6fa   :  { %v1628_v31 = vmax.f32 %v1624_v29, 0.0  ;;  %v2656_v29 = vld [vmem:[%s4267_s18 + $0x110] sm:$0xff] }
 0x6fc   :  { %2578 = vmatpush.msk.msra.mxu3 %vm1077_vm4, %v1628_v31  ;;  %2595 = vmatpush.msk.msrb.mxu0 %vm1077_vm4, %v1628_v31 }
 0x6fd   :  { %2683 = vmatpush.msk.msra.mxu1 %vm1077_vm4, %v1628_v31 }
 0x6fe   :  { %1678 = vmatpush.msra.mxu3 %v1627_v33  ;;  %1767 = vmatpush.msrb.mxu0 %v1627_v33 }
 0x6ff   :  { %2151 = vmatpush.msra.mxu1 %v1627_v33 }
 0x700   :  { %1679 = vmatpush.msra.mxu3 %v1626_v34  ;;  %1768 = vmatpush.msrb.mxu0 %v1626_v34 }
 0x701   :  { %2152 = vmatpush.msra.mxu1 %v1626_v34 }
 0x702   :  { %1680 = vmatpush.msra.mxu3 %v1625_v35  ;;  %1769 = vmatpush.msrb.mxu0 %v1625_v35 }
 0x703   :  { %2153 = vmatpush.msra.mxu1 %v1625_v35  ;;  %2579 = vmatmul.msk.f32.vlgmr.msra.gmra.mxu3 %vm1637_vm9, %v1629_v36 }
 0x704   :  { %2596 = vmatmul.msk.f32.vlgmr.msrb.gmra.mxu0 %vm1637_vm9, %v2587_v37  ;;  %2643 = vmatpush.msk.msrb.mxu3 %vm1077_vm4, %v1628_v31 }
 0x705   :  { %2057 = vmatpush.msra.mxu0 %v2666_v14 }
 0x706   :  { %1988 = vmatpush.msrb.mxu3 %v1627_v33  ;;  %v2653_v33 = vld [vmem:[%s4267_s18 + $0xf8] sm:$0xff] }
 0x707   :  { %2058 = vmatpush.msra.mxu0 %v2665_v15 }
 0x708   :  { %1989 = vmatpush.msrb.mxu3 %v1626_v34 }
 0x709   :  { %2059 = vmatpush.msra.mxu0 %v2664_v17 }
 0x70a   :  { %1990 = vmatpush.msrb.mxu3 %v1625_v35  ;;  %v2652_v35 = vld [vmem:[%s4267_s18 + $0xf0] sm:$0xff] }
 0x70b   :  { %2580 = vmatmul.msk.f32.gmra.mxu3 %vm1637_vm9, %v1630_v38  ;;  %2060 = vmatpush.msra.mxu0 %v2663_v18 }
 0x70c   :  { %2597 = vmatmul.msk.f32.gmra.mxu0 %vm1637_vm9, %v2588_v39 }
 0x70d   :  { %2061 = vmatpush.msra.mxu0 %v2662_v20 }
 0x70f   :  { %2062 = vmatpush.msra.mxu0 %v2661_v21 }
 0x711   :  { %2063 = vmatpush.msra.mxu0 %v2660_v23 }
 0x713   :  { %2581 = vmatmul.msk.f32.gmra.mxu3 %vm1637_vm9, %v1631_v40  ;;  %2064 = vmatpush.msra.mxu0 %v2659_v24 }
 0x714   :  { %2598 = vmatmul.msk.f32.gmra.mxu0 %vm1637_vm9, %v2589_v41 }
 0x715   :  { %2065 = vmatpush.msra.mxu0 %v2658_v26 }
 0x717   :  { %2066 = vmatpush.msra.mxu0 %v2657_v27 }
 0x719   :  { %2067 = vmatpush.msra.mxu0 %v2656_v29 }
 0x71b   :  { %2582 = vmatmul.msk.f32.gmra.mxu3 %vm1637_vm9, %v1632_v42  ;;  %2068 = vmatpush.msra.mxu0 %v2655_v30  ;;  %v2675_v42 = vld [vmem:[%s4266_s17 + $0xc0] sm:$0xff] }
 0x71c   :  { %2599 = vmatmul.msk.f32.gmra.mxu0 %vm1637_vm9, %v2590_v43 }
 0x71d   :  { %2069 = vmatpush.msra.mxu0 %v2654_v32 }
 0x71f   :  { %2070 = vmatpush.msra.mxu0 %v2653_v33 }
 0x721   :  { %2071 = vmatpush.msra.mxu0 %v2652_v35 }
 0x723   :  { %2583 = vmatmul.msk.f32.gmra.mxu3 %vm1637_vm9, %v1633_v44  ;;  %v2676_v44 = vld [vmem:[%s4266_s17 + $0xc8] sm:$0xff] }
 0x724   :  { %2600 = vmatmul.msk.f32.gmra.mxu0 %vm1637_vm9, %v2591_v45 }
 0x72b   :  { %2584 = vmatmul.msk.f32.gmra.mxu3 %vm1637_vm9, %v1634_v46  ;;  %v2677_v46 = vld [vmem:[%s4266_s17 + $0xd0] sm:$0xff] }
 0x72c   :  { %2601 = vmatmul.msk.f32.gmra.mxu0 %vm1637_vm9, %v2592_v47 }
 0x733   :  { %2585 = vmatmul.msk.f32.gmra.mxu3 %vm1637_vm9, %v1635_v48  ;;  %v2678_v48 = vld [vmem:[%s4266_s17 + $0xd8] sm:$0xff] }
 0x734   :  { %2602 = vmatmul.msk.f32.gmra.mxu0 %vm1637_vm9, %v2593_v49 }
 0x73b   :  { %2586 = vmatmul.msk.f32.gmra.mxu3 %vm1637_vm9, %v1636_v50  ;;  %v2679_v50 = vld [vmem:[%s4266_s17 + $0xe0] sm:$0xff] }
 0x73c   :  { %2603 = vmatmul.msk.f32.gmra.mxu0 %vm1637_vm9, %v2594_v51 }
 0x743   :  { %2644 = vmatmul.msk.f32.vlgmr.msrb.gmra.mxu3 %vm1637_vm9, %v2635_v52  ;;  %v2680_v52 = vld [vmem:[%s4266_s17 + $0xe8] sm:$0xff]  ;;  %s2302_s17 = sshll.u32 %s4269_s20, 4  ;;  %s2303_s17 = int_to_ptr.hbm [resolvable:$true] %s2302_s17 }
 0x74b   :  { %2645 = vmatmul.msk.f32.gmra.mxu3 %vm1637_vm9, %v2636_v53 }
 0x753   :  { %2646 = vmatmul.msk.f32.gmra.mxu3 %vm1637_vm9, %v2637_v57  ;;  %v2706_v57 = vld [vmem:[%s4267_s18 + $0x1d8] sm:$0xff] }
 0x754   :  { %2220 = vmatpush.msra.mxu2 %v2706_v57 }
 0x756   :  { %2221 = vmatpush.msra.mxu2 %v2705_v59 }
 0x758   :  { %2222 = vmatpush.msra.mxu2 %v2704_v62 }
 0x75b   :  { %2647 = vmatmul.msk.f32.gmra.mxu3 %vm1637_vm9, %v2638_v63  ;;  %v2703_v63 = vld [vmem:[%s4267_s18 + $0x1c0] sm:$0xff] }
 0x75c   :  { %2223 = vmatpush.msra.mxu2 %v2703_v63 }
 0x75e   :  { %2224 = vmatpush.msra.mxu2 %v2702_v58 }
 0x760   :  { %2225 = vmatpush.msra.mxu2 %v2701_v1 }
 0x762   :  { %2226 = vmatpush.msra.mxu2 %v2700_v2 }
 0x763   :  { %2648 = vmatmul.msk.f32.gmra.mxu3 %vm1637_vm9, %v2639_v3 }
 0x764   :  { %2227 = vmatpush.msra.mxu2 %v2699_v4 }
 0x766   :  { %2228 = vmatpush.msra.mxu2 %v2698_v5 }
 0x768   :  { %2229 = vmatpush.msra.mxu2 %v2697_v6 }
 0x76a   :  { %2230 = vmatpush.msra.mxu2 %v2696_v7 }
 0x76b   :  { %2649 = vmatmul.msk.f32.gmra.mxu3 %vm1637_vm9, %v2640_v8 }
 0x773   :  { %2650 = vmatmul.msk.f32.gmra.mxu3 %vm1637_vm9, %v2641_v9  ;;  %v2695_v9 = vld [vmem:[%s4267_s18 + $0x180] sm:$0xff] }
 0x774   :  { %2231 = vmatpush.msra.mxu2 %v2695_v9 }
 0x77b   :  { %2651 = vmatmul.msk.f32.gmra.mxu3 %vm1637_vm9, %v2642_v10  ;;  %v2694_v10 = vld [vmem:[%s4267_s18 + $0x178] sm:$0xff] }
 0x77c   :  { %2232 = vmatpush.msra.mxu2 %v2694_v10 }
 0x781   :  { %v1771_v11 = vpop.f32.mrf.mxu0 }
 0x782   :  { %2619 = vmatmul.msk.f32.vlgmr.msrb.gmra.mxu1 %vm1811_vm10, %v1771_v11  ;;  %v2693_v11 = vld [vmem:[%s4267_s18 + $0x170] sm:$0xff] }
 0x783   :  { %2233 = vmatpush.msra.mxu2 %v2693_v11 }
 0x786   :  { %v1682_v12 = vpop.f32.mrf.mxu3 }
 0x787   :  { %2627 = vmatmul.msk.f32.vlgmr.msrb.gmra.mxu2 %vm1811_vm10, %v1682_v12  ;;  %v2692_v12 = vld [vmem:[%s4267_s18 + $0x168] sm:$0xff] }
 0x788   :  { %2234 = vmatpush.msra.mxu2 %v2692_v12 }
 0x789   :  { %v1774_v13 = vpop.f32.mrf.mxu0 }
 0x78a   :  { %2620 = vmatmul.msk.f32.gmra.mxu1 %vm1811_vm10, %v1774_v13 }
 0x78e   :  { %v1685_v16 = vpop.f32.mrf.mxu3 }
 0x78f   :  { %2628 = vmatmul.msk.f32.gmra.mxu2 %vm1811_vm10, %v1685_v16 }
 0x791   :  { %v1777_v19 = vpop.f32.mrf.mxu0 }
 0x792   :  { %2621 = vmatmul.msk.f32.gmra.mxu1 %vm1811_vm10, %v1777_v19 }
 0x796   :  { %v1688_v22 = vpop.f32.mrf.mxu3 }
 0x797   :  { %2629 = vmatmul.msk.f32.gmra.mxu2 %vm1811_vm10, %v1688_v22 }
 0x799   :  { %v1780_v25 = vpop.f32.mrf.mxu0 }
 0x79a   :  { %2622 = vmatmul.msk.f32.gmra.mxu1 %vm1811_vm10, %v1780_v25 }
 0x79e   :  { %v1691_v28 = vpop.f32.mrf.mxu3 }
 0x79f   :  { %2630 = vmatmul.msk.f32.gmra.mxu2 %vm1811_vm10, %v1691_v28 }
 0x7a1   :  { %v1783_v31 = vpop.f32.mrf.mxu0 }
 0x7a2   :  { %2623 = vmatmul.msk.f32.gmra.mxu1 %vm1811_vm10, %v1783_v31 }
 0x7a6   :  { %v1694_v34 = vpop.f32.mrf.mxu3 }
 0x7a7   :  { %2631 = vmatmul.msk.f32.gmra.mxu2 %vm1811_vm10, %v1694_v34 }
 0x7a9   :  { %v1786_v36 = vpop.f32.mrf.mxu0 }
 0x7aa   :  { %2624 = vmatmul.msk.f32.gmra.mxu1 %vm1811_vm10, %v1786_v36 }
 0x7ae   :  { %v1697_v37 = vpop.f32.mrf.mxu3 }
 0x7af   :  { %2632 = vmatmul.msk.f32.gmra.mxu2 %vm1811_vm10, %v1697_v37  ;;  %v4222_v37 = vld [vmem:[%s4268_s19] ss:$0 sm:$0xff]  ;;  %s2764_s19 = smov [#allocation2]  }
 0x7b0   :  { %s2300_s10 = sshll.u32 %s2764_s19, 4  ;;  %s2301_s10 = int_to_ptr.vmem [resolvable:$true] %s2300_s10 }
 0x7b1   :  { %v1789_v38 = vpop.f32.mrf.mxu0 }
 0x7b2   :  { %2625 = vmatmul.msk.f32.gmra.mxu1 %vm1811_vm10, %v1789_v38 }
 0x7b6   :  { %v1700_v39 = vpop.f32.mrf.mxu3 }
 0x7b7   :  { %2633 = vmatmul.msk.f32.gmra.mxu2 %vm1811_vm10, %v1700_v39 }
 0x7b9   :  { %v1792_v40 = vpop.f32.mrf.mxu0 }
 0x7ba   :  { %2626 = vmatmul.msk.f32.gmra.mxu1 %vm1811_vm10, %v1792_v40 }
 0x7be   :  { %v1703_v41 = vpop.f32.mrf.mxu3 }
 0x7bf   :  { %2634 = vmatmul.msk.f32.gmra.mxu2 %vm1811_vm10, %v1703_v41 }
 0x7c2   :  { %2684 = vmatmul.msk.f32.vlgmr.msra.gmra.mxu1 %vm1637_vm9, %v2675_v42 }
 0x7c6   :  { %v1992_v43 = vpop.f32.mrf.mxu3 }
 0x7c7   :  { %2667 = vmatmul.msk.f32.vlgmr.msra.gmra.mxu0 %vm1811_vm10, %v1992_v43 }
 0x7ca   :  { %2685 = vmatmul.msk.f32.gmra.mxu1 %vm1637_vm9, %v2676_v44 }
 0x7ce   :  { %v1995_v45 = vpop.f32.mrf.mxu3 }
 0x7cf   :  { %2668 = vmatmul.msk.f32.gmra.mxu0 %vm1811_vm10, %v1995_v45 }
 0x7d2   :  { %2686 = vmatmul.msk.f32.gmra.mxu1 %vm1637_vm9, %v2677_v46 }
 0x7d6   :  { %v1998_v47 = vpop.f32.mrf.mxu3 }
 0x7d7   :  { %2669 = vmatmul.msk.f32.gmra.mxu0 %vm1811_vm10, %v1998_v47 }
 0x7da   :  { %2687 = vmatmul.msk.f32.gmra.mxu1 %vm1637_vm9, %v2678_v48 }
 0x7de   :  { %v2001_v49 = vpop.f32.mrf.mxu3 }
 0x7df   :  { %2670 = vmatmul.msk.f32.gmra.mxu0 %vm1811_vm10, %v2001_v49 }
 0x7e2   :  { %2688 = vmatmul.msk.f32.gmra.mxu1 %vm1637_vm9, %v2679_v50 }
 0x7e6   :  { %v2004_v51 = vpop.f32.mrf.mxu3 }
 0x7e7   :  { %2671 = vmatmul.msk.f32.gmra.mxu0 %vm1811_vm10, %v2004_v51 }
 0x7ea   :  { %2689 = vmatmul.msk.f32.gmra.mxu1 %vm1637_vm9, %v2680_v52 }
 0x7ee   :  { %v2007_v53 = vpop.f32.mrf.mxu3 }
 0x7ef   :  { %2672 = vmatmul.msk.f32.gmra.mxu0 %vm1811_vm10, %v2007_v53 }
 0x7f2   :  { %2690 = vmatmul.msk.f32.gmra.mxu1 %vm1637_vm9, %v2681_v54 }
 0x7f6   :  { %v2010_v55 = vpop.f32.mrf.mxu3 }
 0x7f7   :  { %2673 = vmatmul.msk.f32.gmra.mxu0 %vm1811_vm10, %v2010_v55 }
 0x7fa   :  { %2691 = vmatmul.msk.f32.gmra.mxu1 %vm1637_vm9, %v2682_v56 }
 0x7fe   :  { %v2013_v60 = vpop.f32.mrf.mxu3 }
 0x7ff   :  { %v1853_v61 = vpop.f32.mrf.mxu1  ;;  %2674 = vmatmul.msk.f32.gmra.mxu0 %vm1811_vm10, %v2013_v60 }
 0x807   :  { %v1856_v0 = vpop.f32.mrf.mxu1 }
 0x80a   :  { %v1918_v24 = vpop.f32.mrf.mxu2 }
 0x80b   :  { %v1919_v35 = vadd.f32 %v1918_v24, %v1853_v61 }
 0x80f   :  { %v4175_v3 = vpop.f32.mrf.mxu1 }
 0x812   :  { %v1921_v26 = vpop.f32.mrf.mxu2 }
 0x813   :  { %v1922_v42 = vadd.f32 %v1921_v26, %v1856_v0 }
 0x817   :  { %v4189_v8 = vpop.f32.mrf.mxu1 }
 0x81a   :  { %v1924_v27 = vpop.f32.mrf.mxu2 }
 0x81b   :  { %v1925_v49 = vadd.f32 %v1924_v27, %v4175_v3 }
 0x81f   :  { %v4203_v13 = vpop.f32.mrf.mxu1 }
 0x822   :  { %v1927_v28 = vpop.f32.mrf.mxu2 }
 0x823   :  { %v1928_v55 = vadd.f32 %v1927_v28, %v4189_v8 }
 0x827   :  { %v4205_v14 = vpop.f32.mrf.mxu1 }
 0x82a   :  { %v1930_v29 = vpop.f32.mrf.mxu2 }
 0x82b   :  { %v1931_v63 = vadd.f32 %v1930_v29, %v4203_v13 }
 0x82f   :  { %v4207_v15 = vpop.f32.mrf.mxu1 }
 0x832   :  { %v1933_v30 = vpop.f32.mrf.mxu2 }
 0x833   :  { %v1934_v5 = vadd.f32 %v1933_v30, %v4205_v14 }
 0x837   :  { %v4209_v16 = vpop.f32.mrf.mxu1 }
 0x83a   :  { %v1936_v32 = vpop.f32.mrf.mxu2 }
 0x83b   :  { %v1937_v12 = vadd.f32 %v1936_v32, %v4207_v15 }
 0x83f   :  { %v2155_v17 = vpop.f32.mrf.mxu1 }
 0x840   :  { %2707 = vmatmul.msk.f32.vlgmr.msra.gmra.mxu2 %vm1811_vm10, %v2155_v17 }
 0x842   :  { %v1939_v34 = vpop.f32.mrf.mxu2 }
 0x844   :  { %v2073_v31 = vpop.f32.mrf.mxu0 }
 0x845   :  { %v2097_v36 = vadd.f32 %v2073_v31, %v1919_v35 }
 0x847   :  { %v2158_v18 = vpop.f32.mrf.mxu1 }
 0x848   :  { %2708 = vmatmul.msk.f32.gmra.mxu2 %vm1811_vm10, %v2158_v18 }
 0x84c   :  { %v2076_v33 = vpop.f32.mrf.mxu0 }
 0x84d   :  { %v2098_v43 = vadd.f32 %v2076_v33, %v1922_v42 }
 0x84f   :  { %v2161_v19 = vpop.f32.mrf.mxu1 }
 0x850   :  { %2709 = vmatmul.msk.f32.gmra.mxu2 %vm1811_vm10, %v2161_v19 }
 0x854   :  { %v2079_v40 = vpop.f32.mrf.mxu0 }
 0x855   :  { %v2099_v50 = vadd.f32 %v2079_v40, %v1925_v49 }
 0x857   :  { %v2164_v20 = vpop.f32.mrf.mxu1 }
 0x858   :  { %2710 = vmatmul.msk.f32.gmra.mxu2 %vm1811_vm10, %v2164_v20 }
 0x85c   :  { %v2082_v48 = vpop.f32.mrf.mxu0 }
 0x85d   :  { %v2100_v57 = vadd.f32 %v2082_v48, %v1928_v55 }
 0x85f   :  { %v2167_v21 = vpop.f32.mrf.mxu1 }
 0x860   :  { %2711 = vmatmul.msk.f32.gmra.mxu2 %vm1811_vm10, %v2167_v21  ;;  %v1940_v21 = vadd.f32 %v1939_v34, %v4209_v16 }
 0x864   :  { %v2085_v56 = vpop.f32.mrf.mxu0 }
 0x865   :  { %v2101_v0 = vadd.f32 %v2085_v56, %v1931_v63 }
 0x867   :  { %v2170_v22 = vpop.f32.mrf.mxu1 }
 0x868   :  { %2712 = vmatmul.msk.f32.gmra.mxu2 %vm1811_vm10, %v2170_v22 }
 0x86c   :  { %v2088_v58 = vpop.f32.mrf.mxu0 }
 0x86d   :  { %v2102_v6 = vadd.f32 %v2088_v58, %v1934_v5 }
 0x86f   :  { %v2173_v23 = vpop.f32.mrf.mxu1 }
 0x870   :  { %2713 = vmatmul.msk.f32.gmra.mxu2 %vm1811_vm10, %v2173_v23 }
 0x874   :  { %v2091_v9 = vpop.f32.mrf.mxu0 }
 0x875   :  { %v2103_v13 = vadd.f32 %v2091_v9, %v1937_v12 }
 0x877   :  { %v2176_v25 = vpop.f32.mrf.mxu1 }
 0x878   :  { %2714 = vmatmul.msk.f32.gmra.mxu2 %vm1811_vm10, %v2176_v25 }
 0x87c   :  { %v2094_v14 = vpop.f32.mrf.mxu0 }
 0x87d   :  { %v2104_v22 = vadd.f32 %v2094_v14, %v1940_v21 }
 0x8c3   :  { %v2236_v38 = vpop.f32.mrf.mxu2 }
 0x8c4   :  { %v2260_v39 = vadd.f32 %v2236_v38, %v2097_v36 }
 0x8c6   :  { %v2272_v41 = vadd.f32 %v4222_v37, %v2260_v39 }
 0x8c8   :  { %2722 = vtanh.f32 %v2272_v41 }
 0x8cb   :  { %v2239_v44 = vpop.f32.mrf.mxu2 }
 0x8cc   :  { %v2261_v45 = vadd.f32 %v2239_v44, %v2098_v43 }
 0x8ce   :  { %v2723_v46 = vpop.eup %2722  ;;  %v2273_v47 = vadd.f32 %v4222_v37, %v2261_v45 }
 0x8cf   :  { %2288 = vst.msk [vmem:[#allocation2] sm:$0xff] %vm183_vm1, %v2723_v46 }
 0x8d0   :  { %2724 = vtanh.f32 %v2273_v47 }
 0x8d3   :  { %v2242_v51 = vpop.f32.mrf.mxu2 }
 0x8d4   :  { %v2262_v52 = vadd.f32 %v2242_v51, %v2099_v50 }
 0x8d6   :  { %v2725_v53 = vpop.eup %2724  ;;  %v2274_v54 = vadd.f32 %v4222_v37, %v2262_v52 }
 0x8d7   :  { %2289 = vst.msk [vmem:[#allocation2 + $0x8] sm:$0xff] %vm183_vm1, %v2725_v53 }
 0x8d8   :  { %2726 = vtanh.f32 %v2274_v54 }
 0x8db   :  { %v2245_v59 = vpop.f32.mrf.mxu2 }
 0x8dc   :  { %v2263_v60 = vadd.f32 %v2245_v59, %v2100_v57 }
 0x8de   :  { %v2727_v61 = vpop.eup %2726  ;;  %v2275_v62 = vadd.f32 %v4222_v37, %v2263_v60 }
 0x8df   :  { %2290 = vst.msk [vmem:[#allocation2 + $0x10] sm:$0xff] %vm183_vm1, %v2727_v61 }
 0x8e0   :  { %2728 = vtanh.f32 %v2275_v62 }
 0x8e3   :  { %v2248_v1 = vpop.f32.mrf.mxu2 }
 0x8e4   :  { %v2264_v2 = vadd.f32 %v2248_v1, %v2101_v0 }
 0x8e6   :  { %v2729_v3 = vpop.eup %2728  ;;  %v2276_v4 = vadd.f32 %v4222_v37, %v2264_v2 }
 0x8e7   :  { %2291 = vst.msk [vmem:[#allocation2 + $0x18] sm:$0xff] %vm183_vm1, %v2729_v3 }
 0x8e8   :  { %2730 = vtanh.f32 %v2276_v4 }
 0x8eb   :  { %v2251_v7 = vpop.f32.mrf.mxu2 }
 0x8ec   :  { %v2265_v8 = vadd.f32 %v2251_v7, %v2102_v6 }
 0x8ee   :  { %v2731_v10 = vpop.eup %2730  ;;  %v2277_v11 = vadd.f32 %v4222_v37, %v2265_v8 }
 0x8ef   :  { %2292 = vst.msk [vmem:[#allocation2 + $0x20] sm:$0xff] %vm183_vm1, %v2731_v10 }
 0x8f0   :  { %2732 = vtanh.f32 %v2277_v11 }
 0x8f3   :  { %v2254_v17 = vpop.f32.mrf.mxu2 }
 0x8f4   :  { %v2266_v18 = vadd.f32 %v2254_v17, %v2103_v13 }
 0x8f6   :  { %v2733_v19 = vpop.eup %2732  ;;  %v2278_v20 = vadd.f32 %v4222_v37, %v2266_v18 }
 0x8f7   :  { %2293 = vst.msk [vmem:[#allocation2 + $0x28] sm:$0xff] %vm183_vm1, %v2733_v19 }
 0x8f8   :  { %2734 = vtanh.f32 %v2278_v20 }
 0x8fb   :  { %v2257_v23 = vpop.f32.mrf.mxu2 }
 0x8fc   :  { %v2267_v24 = vadd.f32 %v2257_v23, %v2104_v22 }
 0x8fe   :  { %v2735_v25 = vpop.eup %2734  ;;  %v2279_v26 = vadd.f32 %v4222_v37, %v2267_v24 }
 0x8ff   :  { %2294 = vst.msk [vmem:[#allocation2 + $0x30] sm:$0xff] %vm183_vm1, %v2735_v25 }
 0x900   :  { %2736 = vtanh.f32 %v2279_v26 }
 0x906   :  { %v2737_v15 = vpop.eup %2736 }
 0x907   :  { %2295 = vst.msk [vmem:[#allocation2 + $0x38] sm:$0xff] %vm183_vm1, %v2737_v15 }
 0x908   :  { %2308 = dma.vmem_to_hbm [thread:$0]  %s2301_s10, 1024, %s2303_s17, [#allocation3], %s2765_s1, %s2765_s1, %s2766_s22  }
 0x909   :  { %2762 = dma.done.wait [#allocation3], 1024  }
 0x90a   :  { %2763 = vsyncadd [#allocation3], 4294966272 }
 0x90b   :  { %2313 = vsyncpa [#allocation3], 1 }

</bundles_post_ra>
